<compile_context>
chip_gen: v5e
topology: v5e:2x2
jax: 0.10.0
libtpu: 0.0.40
codegen_flags: <defaults>
</compile_context>

<pallas_src>
import jax
import jax.numpy as jnp
from jax.experimental import pallas as pl
from jax.experimental.pallas import tpu as pltpu

MLP_HIDDEN = 50      # fixed by the PyTorch module (Linear(1,50), Linear(50,50), Linear(50,1))
_HIGHEST = jax.lax.Precision.HIGHEST


def _sigmoid(x):
    # Single-transcendental sigmoid (one EUP tanh instead of exp + recip).
    return 0.5 * (jnp.tanh(0.5 * x) + 1.0)


def _make_flow_kernel(num_mid, num_x):
    """Fused SigmoidFlow2D forward for one (num_x, TILE_B) batch tile.

    theta = MLP(fy0) is computed once and shared by all num_x x-slabs.
    """

    def kernel(*refs):
        idx = 0
        x_ref = refs[idx]; idx += 1            # (num_x, T)
        f_ref = refs[idx]; idx += 1            # (1, T)
        mlp_ref = refs[idx]; idx += 1          # (50, 4): [w1, b1, w3t, b2]
        w2_ref = refs[idx]; idx += 1           # (50, 50)
        l0_ref = refs[idx]; idx += 1           # (n_dim, 4): [au0x, au0t, b0, aul]
        wm0_ref = refs[idx]; idx += 1          # (n_dim, n_dim)
        if num_mid > 0:
            au_mid_ref = refs[idx]; idx += 1   # (num_mid, n_dim, n_dim)
            b_mid_ref = refs[idx]; idx += 1    # (num_mid, n_dim, 1)
            wm_mid_ref = refs[idx]; idx += 1   # (num_mid, n_dim, n_dim)
        scal_ref = refs[idx]; idx += 1         # SMEM (2,): [b3, b_last]
        o_ref = refs[idx]                      # (num_x, T)

        fv = f_ref[...]                        # (1, T)
        xs = x_ref[...]                        # (num_x, T)

        mlp = mlp_ref[...]
        w1, b1 = mlp[:, 0:1], mlp[:, 1:2]
        w3t, b2 = mlp[:, 2:3], mlp[:, 3:4]

        # ---- theta = MLP(fy0): 1 -> 50 -> 50 -> 1 in column layout.
        # Linear(1,50): K=1 matmul == VPU broadcast multiply (no MXU).
        h = jnp.maximum(w1 * fv + b1, 0.0)                                     # (50, T)
        h = jnp.maximum(
            jnp.dot(w2_ref[...], h, preferred_element_type=jnp.float32,
                    precision=_HIGHEST) + b2, 0.0)                             # (50, T)
        # Linear(50,1): M=1 matmul as VPU multiply + XLU sublane reduce.
        theta = jnp.sum(w3t * h, axis=0, keepdims=True) + scal_ref[0]          # (1, T)

        l0 = l0_ref[...]
        au0x, au0t = l0[:, 0:1], l0[:, 1:2]
        b0, aul = l0[:, 2:3], l0[:, 3:4]
        wm0 = wm0_ref[...]
        b_last = scal_ref[1]

        outs = []
        for j in range(num_x):
            xv = xs[j:j + 1, :]                                                # (1, T)
            # ---- first SigmoidLayer (in_dim=2): K=2 matmul unrolled into two
            # column broadcasts (no concat, no MXU).
            inner = au0x * xv + au0t * theta + b0                              # (n_dim, T)
            hcur = jnp.dot(wm0, _sigmoid(inner),
                           preferred_element_type=jnp.float32,
                           precision=_HIGHEST)                                 # (n_dim, T)
            # ---- middle SigmoidLayers (n_dim x n_dim): MXU matmuls.
            for l in range(num_mid):
                inner = jnp.dot(au_mid_ref[l], hcur,
                                preferred_element_type=jnp.float32,
                                precision=_HIGHEST) + b_mid_ref[l]
                hcur = jnp.dot(wm_mid_ref[l], _sigmoid(inner),
                               preferred_element_type=jnp.float32,
                               precision=_HIGHEST)
            # ---- last SigmoidLayer (out_dim=1): M=1 matmul as VPU mul + XLU
            # sublane reduce; softmax of its (1,1) w is exactly 1.0, so the
            # final matmul is the identity.
            inner = jnp.sum(aul * hcur, axis=0, keepdims=True) + b_last        # (1, T)
            outs.append(_sigmoid(inner))

        res = outs[0] if num_x == 1 else jnp.concatenate(outs, axis=0)
        o_ref[...] = res.astype(o_ref.dtype)

    return kernel


# ---------------------------------------------------------------------------
# Wrapper: tile selection, parameter packing, pallas_call.
# ---------------------------------------------------------------------------
def _round_up(n, m):
    return ((n + m - 1) // m) * m


def _pick_tile(batch, tile_b):
    b_ceil = _round_up(max(int(batch), 1), 128)
    t = max(128, (int(tile_b) // 128) * 128)
    t = min(t, b_ceil)
    # Guarantee >= 2 grid steps when the batch allows it: required for v7x
    # megacore sharding of the "parallel" axis and for DMA/compute pipelining.
    if b_ceil >= 256:
        t = min(t, max(128, ((b_ceil // 2) // 128) * 128))
    # Keep >= 512 lanes per step whenever possible (amortize ~0.35us/step).
    if b_ceil >= 1024:
        t = max(t, 512)
    # VMEM ceiling: ~a handful of (56, T) f32 intermediates; 16K lanes stays
    # well under the 32 MiB scoped limit (safe on v7x's 64 MiB physical VMEM).
    t = min(t, 16384)
    return t


def _fullblock(a):
    zeros = (0,) * a.ndim
    # Full-array block, constant index map -> DMA'd once, resident across tiles.
    return pl.BlockSpec(a.shape, lambda i, _z=zeros: _z)


def _prep_params(params):
    """Hoisted parameter prep (once per call): exp/softmax + packing."""
    mlp = params["mlp"]
    w1 = mlp["W1"].reshape(MLP_HIDDEN, 1)
    b1 = mlp["b1"].reshape(MLP_HIDDEN, 1)
    w2 = mlp["W2"].astype(jnp.float32)
    b2 = mlp["b2"].reshape(MLP_HIDDEN, 1)
    w3t = mlp["W3"].reshape(1, MLP_HIDDEN).T
    b3 = mlp["b3"].reshape(())
    mlp_pack = jnp.concatenate([w1, b1, w3t, b2], axis=1).astype(jnp.float32)   # (50, 4)

    def prep(layer):
        au = jnp.exp(layer["log_a"]) * jax.nn.softmax(layer["U"], axis=1)
        wm = jax.nn.softmax(layer["Wm"], axis=1)
        return au, layer["b"], wm

    layers = params["layers"]
    num_mid = len(layers) - 2
    au0, b0, wm0 = prep(layers[0])          # au0 (n_dim,2), b0 (n_dim,1), wm0 (n_dim,n_dim)
    aul, blast, _ = prep(layers[-1])        # aul (1,n_dim), blast (1,1); last wm == [[1.0]]
    l0_pack = jnp.concatenate(
        [au0[:, 0:1], au0[:, 1:2], b0, aul.T], axis=1).astype(jnp.float32)      # (n_dim, 4)
    scal = jnp.stack([b3, blast.reshape(())]).astype(jnp.float32)               # (2,) SMEM

    args = [mlp_pack, w2, l0_pack, wm0.astype(jnp.float32)]
    if num_mid > 0:
        mids = [prep(l) for l in layers[1:-1]]
        args += [jnp.stack([m[0] for m in mids]).astype(jnp.float32),  # (num_mid,n,n)
                 jnp.stack([m[1] for m in mids]).astype(jnp.float32),  # (num_mid,n,1)
                 jnp.stack([m[2] for m in mids]).astype(jnp.float32)]  # (num_mid,n,n)
    args += [scal]
    return num_mid, args


def _run_flow(x_list, fy0, params, *, tile_b=4096):
    """Evaluate the flow for several x slabs sharing one fy0 -> (num_x, batch)."""
    num_x = len(x_list)
    fy0 = fy0.reshape(-1).astype(jnp.float32)
    batch = fy0.shape[0]
    xs = jnp.stack([x.reshape(-1).astype(jnp.float32) for x in x_list], axis=0)

    t = _pick_tile(batch, tile_b)
    b_pad = _round_up(batch, t)
    pad = b_pad - batch
    xs = jnp.pad(xs, ((0, 0), (0, pad)))                 # (num_x, b_pad)
    f2 = jnp.pad(fy0, (0, pad)).reshape(1, b_pad)        # (1, b_pad)

    num_mid, pargs = _prep_params(params)

    in_specs = [
        pl.BlockSpec((num_x, t), lambda i: (0, i)),      # x slabs streamed over batch
        pl.BlockSpec((1, t), lambda i: (0, i)),          # fy0 streamed over batch
    ]
    in_specs += [_fullblock(a) for a in pargs[:-1]]
    in_specs += [pl.BlockSpec(memory_space=pltpu.MemorySpace.SMEM)]  # scalars

    out = pl.pallas_call(
        _make_flow_kernel(num_mid, num_x),
        out_shape=jax.ShapeDtypeStruct((num_x, b_pad), jnp.float32),
        grid=(b_pad // t,),
        in_specs=in_specs,
        out_specs=pl.BlockSpec((num_x, t), lambda i: (0, i)),
        compiler_params=pltpu.CompilerParams(
            dimension_semantics=("parallel",),           # disjoint output slabs
            vmem_limit_bytes=32 * 1024 * 1024,           # safe on v5e/v6e/v7x
        ),
    )(xs, f2, *pargs)

    return out[:, :batch]


def sigmoid_flow_2d_forward(x, fy0, params, *, tile_b=4096):
    """Pallas implementation of SigmoidFlow2D.forward(x, fy0) -> (B, 1, 1)."""
    batch = x.reshape(-1).shape[0]
    out = _run_flow([x], fy0, params, tile_b=tile_b)
    return out[0].reshape(batch, 1, 1)


def sigmoid_flow_2d_cdf(x, fy0, params, *, tile_b=4096):
    """SigmoidFlow2D.cdf: one kernel launch, theta = MLP(fy0) computed once."""
    assert x.shape == fy0.shape
    in_shape = x.shape
    xf = x.reshape(-1)
    final, bottom, top = _run_flow(
        [xf, jnp.zeros_like(xf), jnp.ones_like(xf)], fy0, params, tile_b=tile_b)
    # TODO(synk): the PyTorch module drops into pdb when 1/(top-bottom) is NaN;
    # no kernel-side equivalent — callers should guard the quotient themselves.
    return ((final - bottom) / (top - bottom)).reshape(in_shape)


# ---------------------------------------------------------------------------
# Pure-JAX reference mirroring the PyTorch module, and deterministic params.
# ---------------------------------------------------------------------------
def init_params(key, n_dim, num_layers):
    dims = [(2, n_dim)] + [(n_dim, n_dim)] * (num_layers - 2) + [(n_dim, 1)]
    kmlp, *klayers = jax.random.split(key, num_layers + 1)
    k1, k2, k3, k4, k5, k6 = jax.random.split(kmlp, 6)
    mlp = {
        "W1": jax.random.normal(k1, (MLP_HIDDEN, 1), jnp.float32),
        "b1": jax.random.normal(k2, (MLP_HIDDEN,), jnp.float32),
        "W2": jax.random.normal(k3, (MLP_HIDDEN, MLP_HIDDEN), jnp.float32),
        "b2": jax.random.normal(k4, (MLP_HIDDEN,), jnp.float32),
        "W3": jax.random.normal(k5, (1, MLP_HIDDEN), jnp.float32),
        "b3": jax.random.normal(k6, (1,), jnp.float32),
    }
    layers = []
    for (in_dim, out_dim), kl in zip(dims, klayers):
        ka, kb, ku, kw = jax.random.split(kl, 4)
        layers.append({
            "log_a": jax.random.normal(ka, (out_dim, 1), jnp.float32),
            "b": jax.random.normal(kb, (out_dim, 1), jnp.float32),
            "U": jax.random.normal(ku, (out_dim, in_dim), jnp.float32),
            "Wm": jax.random.normal(kw, (out_dim, out_dim), jnp.float32),
        })
    return {"mlp": mlp, "layers": layers}


def reference_forward(x, fy0, params):
    batch = x.reshape(-1).shape[0]
    xc = x.reshape(batch, 1, 1).astype(jnp.float32)
    fc = fy0.reshape(batch, 1, 1).astype(jnp.float32)
    m = params["mlp"]
    h = jnp.maximum(jnp.matmul(fc, m["W1"].T, precision=_HIGHEST) + m["b1"], 0.0)
    h = jnp.maximum(jnp.matmul(h, m["W2"].T, precision=_HIGHEST) + m["b2"], 0.0)
    theta = jnp.matmul(h, m["W3"].T, precision=_HIGHEST) + m["b3"]
    mono = jnp.concatenate([xc, theta], axis=1)               # torch.hstack on 3-D
    for layer in params["layers"]:
        a = jnp.exp(layer["log_a"])
        u = jax.nn.softmax(layer["U"], axis=1)
        w = jax.nn.softmax(layer["Wm"], axis=1)
        inner = jnp.matmul(a * u, mono, precision=_HIGHEST) + layer["b"]
        mono = jnp.matmul(w, jax.nn.sigmoid(inner), precision=_HIGHEST)
    return mono                                               # (B, 1, 1)


if __name__ == "__main__":
    # Belt-and-suspenders; the kernel/reference already pass precision explicitly.
    jax.config.update("jax_default_matmul_precision", "float32")

    n_dim, num_layers, batch = 8, 4, 1000   # ragged batch -> exercises padding

    key = jax.random.PRNGKey(0)
    kp, kx, kf = jax.random.split(key, 3)
    params = init_params(kp, n_dim, num_layers)
    x = jax.random.normal(kx, (batch,), jnp.float32)
    fy0 = jax.random.normal(kf, (batch,), jnp.float32)

    # Fused forward (num_x = 1). tile picker yields 512-lane tiles, 2 grid steps.
    y = jax.block_until_ready(sigmoid_flow_2d_forward(x, fy0, params))
    y_ref = reference_forward(x, fy0, params)
    assert y.shape == (batch, 1, 1)
    assert jnp.allclose(y, y_ref, atol=1e-4, rtol=1e-4)

    # Theta-reuse kernel (num_x = 3): the three forwards that cdf() needs share
    # a single MLP(fy0) evaluation inside the kernel.
    zeros, ones = jnp.zeros_like(x), jnp.ones_like(x)
    trio = jax.block_until_ready(_run_flow([x, zeros, ones], fy0, params))
    assert trio.shape == (3, batch)
    assert jnp.allclose(trio[0].reshape(batch, 1, 1), y_ref, atol=1e-4, rtol=1e-4)
    assert jnp.allclose(trio[1].reshape(batch, 1, 1),
                        reference_forward(zeros, fy0, params), atol=1e-4, rtol=1e-4)
    assert jnp.allclose(trio[2].reshape(batch, 1, 1),
                        reference_forward(ones, fy0, params), atol=1e-4, rtol=1e-4)

    # cdf wrapper: its three building blocks are verified above; the quotient
    # itself can be ill-conditioned for random params, so only shape-check it.
    c = jax.block_until_ready(sigmoid_flow_2d_cdf(x, fy0, params))
    assert c.shape == x.shape

    print("KERNEL_OK")
</pallas_src>

<mosaic_0001>
module attributes {stable_mosaic.version = 11 : i64} {
  func.func @kernel(%arg0: i32, %arg1: memref<1x512xf32, #tpu.memory_space<vmem>>, %arg2: memref<1x512xf32, #tpu.memory_space<vmem>>, %arg3: memref<50x4xf32, #tpu.memory_space<vmem>>, %arg4: memref<50x50xf32, #tpu.memory_space<vmem>>, %arg5: memref<8x4xf32, #tpu.memory_space<vmem>>, %arg6: memref<8x8xf32, #tpu.memory_space<vmem>>, %arg7: memref<2x8x8xf32, #tpu.memory_space<vmem>>, %arg8: memref<2x8x1xf32, #tpu.memory_space<vmem>>, %arg9: memref<2x8x8xf32, #tpu.memory_space<vmem>>, %arg10: memref<2xf32, #tpu.memory_space<smem>>, %arg11: memref<1x512xf32, #tpu.memory_space<vmem>>) attributes {dimension_semantics = [#tpu.dimension_semantics<parallel>], iteration_bounds = array<i64: 2>, scalar_prefetch = 0 : i64, scratch_operands = 0 : i64, tpu.core_type = #tpu.core_type<tc>, window_params = [{transform_indices = @transform_0, window_bounds = array<i64: 1, 512>}, {transform_indices = @transform_1, window_bounds = array<i64: 1, 512>}, {pipeline_mode = #tpu.pipeline_mode<synchronous>, transform_indices = @transform_2, window_bounds = array<i64: 50, 4>}, {pipeline_mode = #tpu.pipeline_mode<synchronous>, transform_indices = @transform_3, window_bounds = array<i64: 50, 50>}, {pipeline_mode = #tpu.pipeline_mode<synchronous>, transform_indices = @transform_4, window_bounds = array<i64: 8, 4>}, {pipeline_mode = #tpu.pipeline_mode<synchronous>, transform_indices = @transform_5, window_bounds = array<i64: 8, 8>}, {pipeline_mode = #tpu.pipeline_mode<synchronous>, transform_indices = @transform_6, window_bounds = array<i64: 2, 8, 8>}, {pipeline_mode = #tpu.pipeline_mode<synchronous>, transform_indices = @transform_7, window_bounds = array<i64: 2, 8, 1>}, {pipeline_mode = #tpu.pipeline_mode<synchronous>, transform_indices = @transform_8, window_bounds = array<i64: 2, 8, 8>}, {transform_indices = @transform_9, window_bounds = array<i64: 2>}, {transform_indices = @transform_10, window_bounds = array<i64: 1, 512>}]} {
    %c0 = arith.constant 0 : index
    %c0_0 = arith.constant 0 : index
    %0 = vector.load %arg2[%c0, %c0_0] : memref<1x512xf32, #tpu.memory_space<vmem>>, vector<1x512xf32>
    %c0_1 = arith.constant 0 : index
    %c0_2 = arith.constant 0 : index
    %1 = vector.load %arg1[%c0_1, %c0_2] : memref<1x512xf32, #tpu.memory_space<vmem>>, vector<1x512xf32>
    %c0_3 = arith.constant 0 : index
    %c0_4 = arith.constant 0 : index
    %2 = vector.load %arg3[%c0_3, %c0_4] : memref<50x4xf32, #tpu.memory_space<vmem>>, vector<50x4xf32>
    %3 = vector.extract_strided_slice %2 {offsets = [0, 0], sizes = [50, 1], strides = [1, 1]} : vector<50x4xf32> to vector<50x1xf32>
    %4 = vector.extract_strided_slice %2 {offsets = [0, 1], sizes = [50, 1], strides = [1, 1]} : vector<50x4xf32> to vector<50x1xf32>
    %5 = vector.extract_strided_slice %2 {offsets = [0, 2], sizes = [50, 1], strides = [1, 1]} : vector<50x4xf32> to vector<50x1xf32>
    %6 = vector.extract_strided_slice %2 {offsets = [0, 3], sizes = [50, 1], strides = [1, 1]} : vector<50x4xf32> to vector<50x1xf32>
    %7 = vector.broadcast %3 : vector<50x1xf32> to vector<50x512xf32>
    %8 = vector.broadcast %0 : vector<1x512xf32> to vector<50x512xf32>
    %9 = arith.mulf %7, %8 : vector<50x512xf32>
    %10 = vector.broadcast %4 : vector<50x1xf32> to vector<50x512xf32>
    %11 = arith.addf %9, %10 : vector<50x512xf32>
    %cst = arith.constant 0.000000e+00 : f32
    %12 = vector.broadcast %cst : f32 to vector<50x512xf32>
    %13 = arith.maximumf %11, %12 : vector<50x512xf32>
    %c0_5 = arith.constant 0 : index
    %c0_6 = arith.constant 0 : index
    %14 = vector.load %arg4[%c0_5, %c0_6] : memref<50x50xf32, #tpu.memory_space<vmem>>, vector<50x50xf32>
    %cst_7 = arith.constant dense<0.000000e+00> : vector<50x512xf32>
    %15 = tpu.matmul %14, %13, %cst_7 {dimension_numbers = #tpu.dot_dimension_numbers<[1], [0], [0], [1], [0, 0, 1, 1], [], []>, precision = #tpu.contract_precision<fp32>} : vector<50x50xf32>, vector<50x512xf32>, vector<50x512xf32> -> vector<50x512xf32>
    %16 = vector.broadcast %6 : vector<50x1xf32> to vector<50x512xf32>
    %17 = arith.addf %15, %16 : vector<50x512xf32>
    %cst_8 = arith.constant 0.000000e+00 : f32
    %18 = vector.broadcast %cst_8 : f32 to vector<50x512xf32>
    %19 = arith.maximumf %17, %18 : vector<50x512xf32>
    %20 = vector.broadcast %5 : vector<50x1xf32> to vector<50x512xf32>
    %21 = arith.mulf %20, %19 : vector<50x512xf32>
    %cst_9 = arith.constant dense<0.000000e+00> : vector<512xf32>
    %22 = vector.multi_reduction <add>, %21, %cst_9 [0] : vector<50x512xf32> to vector<512xf32>
    %23 = vector.shape_cast %22 : vector<512xf32> to vector<1x512xf32>
    %c0_10 = arith.constant 0 : index
    %24 = memref.load %arg10[%c0_10] : memref<2xf32, #tpu.memory_space<smem>>
    %25 = vector.broadcast %24 : f32 to vector<1x512xf32>
    %26 = arith.addf %23, %25 : vector<1x512xf32>
    %c0_11 = arith.constant 0 : index
    %c0_12 = arith.constant 0 : index
    %27 = vector.load %arg5[%c0_11, %c0_12] : memref<8x4xf32, #tpu.memory_space<vmem>>, vector<8x4xf32>
    %28 = vector.extract_strided_slice %27 {offsets = [0, 0], sizes = [8, 1], strides = [1, 1]} : vector<8x4xf32> to vector<8x1xf32>
    %29 = vector.extract_strided_slice %27 {offsets = [0, 1], sizes = [8, 1], strides = [1, 1]} : vector<8x4xf32> to vector<8x1xf32>
    %30 = vector.extract_strided_slice %27 {offsets = [0, 2], sizes = [8, 1], strides = [1, 1]} : vector<8x4xf32> to vector<8x1xf32>
    %31 = vector.extract_strided_slice %27 {offsets = [0, 3], sizes = [8, 1], strides = [1, 1]} : vector<8x4xf32> to vector<8x1xf32>
    %c0_13 = arith.constant 0 : index
    %c0_14 = arith.constant 0 : index
    %32 = vector.load %arg6[%c0_13, %c0_14] : memref<8x8xf32, #tpu.memory_space<vmem>>, vector<8x8xf32>
    %c1 = arith.constant 1 : index
    %33 = memref.load %arg10[%c1] : memref<2xf32, #tpu.memory_space<smem>>
    %34 = vector.broadcast %28 : vector<8x1xf32> to vector<8x512xf32>
    %35 = vector.broadcast %1 : vector<1x512xf32> to vector<8x512xf32>
    %36 = arith.mulf %34, %35 : vector<8x512xf32>
    %37 = vector.broadcast %29 : vector<8x1xf32> to vector<8x512xf32>
    %38 = vector.broadcast %26 : vector<1x512xf32> to vector<8x512xf32>
    %39 = arith.mulf %37, %38 : vector<8x512xf32>
    %40 = arith.addf %36, %39 : vector<8x512xf32>
    %41 = vector.broadcast %30 : vector<8x1xf32> to vector<8x512xf32>
    %42 = arith.addf %40, %41 : vector<8x512xf32>
    %cst_15 = arith.constant 5.000000e-01 : f32
    %43 = vector.broadcast %cst_15 : f32 to vector<8x512xf32>
    %44 = arith.mulf %43, %42 : vector<8x512xf32>
    %45 = math.tanh %44 : vector<8x512xf32>
    %cst_16 = arith.constant 1.000000e+00 : f32
    %46 = vector.broadcast %cst_16 : f32 to vector<8x512xf32>
    %47 = arith.addf %45, %46 : vector<8x512xf32>
    %cst_17 = arith.constant 5.000000e-01 : f32
    %48 = vector.broadcast %cst_17 : f32 to vector<8x512xf32>
    %49 = arith.mulf %48, %47 : vector<8x512xf32>
    %cst_18 = arith.constant dense<0.000000e+00> : vector<8x512xf32>
    %50 = tpu.matmul %32, %49, %cst_18 {dimension_numbers = #tpu.dot_dimension_numbers<[1], [0], [0], [1], [0, 0, 1, 1], [], []>, precision = #tpu.contract_precision<fp32>} : vector<8x8xf32>, vector<8x512xf32>, vector<8x512xf32> -> vector<8x512xf32>
    %c0_19 = arith.constant 0 : index
    %c0_20 = arith.constant 0 : index
    %c0_21 = arith.constant 0 : index
    %51 = vector.load %arg7[%c0_19, %c0_20, %c0_21] : memref<2x8x8xf32, #tpu.memory_space<vmem>>, vector<1x8x8xf32>
    %52 = vector.shape_cast %51 : vector<1x8x8xf32> to vector<8x8xf32>
    %cst_22 = arith.constant dense<0.000000e+00> : vector<8x512xf32>
    %53 = tpu.matmul %52, %50, %cst_22 {dimension_numbers = #tpu.dot_dimension_numbers<[1], [0], [0], [1], [0, 0, 1, 1], [], []>, precision = #tpu.contract_precision<fp32>} : vector<8x8xf32>, vector<8x512xf32>, vector<8x512xf32> -> vector<8x512xf32>
    %c0_23 = arith.constant 0 : index
    %c0_24 = arith.constant 0 : index
    %c0_25 = arith.constant 0 : index
    %54 = vector.load %arg8[%c0_23, %c0_24, %c0_25] : memref<2x8x1xf32, #tpu.memory_space<vmem>>, vector<1x8x1xf32>
    %55 = vector.shape_cast %54 : vector<1x8x1xf32> to vector<8x1xf32>
    %56 = vector.broadcast %55 : vector<8x1xf32> to vector<8x512xf32>
    %57 = arith.addf %53, %56 : vector<8x512xf32>
    %c0_26 = arith.constant 0 : index
    %c0_27 = arith.constant 0 : index
    %c0_28 = arith.constant 0 : index
    %58 = vector.load %arg9[%c0_26, %c0_27, %c0_28] : memref<2x8x8xf32, #tpu.memory_space<vmem>>, vector<1x8x8xf32>
    %59 = vector.shape_cast %58 : vector<1x8x8xf32> to vector<8x8xf32>
    %cst_29 = arith.constant 5.000000e-01 : f32
    %60 = vector.broadcast %cst_29 : f32 to vector<8x512xf32>
    %61 = arith.mulf %60, %57 : vector<8x512xf32>
    %62 = math.tanh %61 : vector<8x512xf32>
    %cst_30 = arith.constant 1.000000e+00 : f32
    %63 = vector.broadcast %cst_30 : f32 to vector<8x512xf32>
    %64 = arith.addf %62, %63 : vector<8x512xf32>
    %cst_31 = arith.constant 5.000000e-01 : f32
    %65 = vector.broadcast %cst_31 : f32 to vector<8x512xf32>
    %66 = arith.mulf %65, %64 : vector<8x512xf32>
    %cst_32 = arith.constant dense<0.000000e+00> : vector<8x512xf32>
    %67 = tpu.matmul %59, %66, %cst_32 {dimension_numbers = #tpu.dot_dimension_numbers<[1], [0], [0], [1], [0, 0, 1, 1], [], []>, precision = #tpu.contract_precision<fp32>} : vector<8x8xf32>, vector<8x512xf32>, vector<8x512xf32> -> vector<8x512xf32>
    %c1_33 = arith.constant 1 : index
    %c0_34 = arith.constant 0 : index
    %c0_35 = arith.constant 0 : index
    %68 = vector.load %arg7[%c1_33, %c0_34, %c0_35] : memref<2x8x8xf32, #tpu.memory_space<vmem>>, vector<1x8x8xf32>
    %69 = vector.shape_cast %68 : vector<1x8x8xf32> to vector<8x8xf32>
    %cst_36 = arith.constant dense<0.000000e+00> : vector<8x512xf32>
    %70 = tpu.matmul %69, %67, %cst_36 {dimension_numbers = #tpu.dot_dimension_numbers<[1], [0], [0], [1], [0, 0, 1, 1], [], []>, precision = #tpu.contract_precision<fp32>} : vector<8x8xf32>, vector<8x512xf32>, vector<8x512xf32> -> vector<8x512xf32>
    %c1_37 = arith.constant 1 : index
    %c0_38 = arith.constant 0 : index
    %c0_39 = arith.constant 0 : index
    %71 = vector.load %arg8[%c1_37, %c0_38, %c0_39] : memref<2x8x1xf32, #tpu.memory_space<vmem>>, vector<1x8x1xf32>
    %72 = vector.shape_cast %71 : vector<1x8x1xf32> to vector<8x1xf32>
    %73 = vector.broadcast %72 : vector<8x1xf32> to vector<8x512xf32>
    %74 = arith.addf %70, %73 : vector<8x512xf32>
    %c1_40 = arith.constant 1 : index
    %c0_41 = arith.constant 0 : index
    %c0_42 = arith.constant 0 : index
    %75 = vector.load %arg9[%c1_40, %c0_41, %c0_42] : memref<2x8x8xf32, #tpu.memory_space<vmem>>, vector<1x8x8xf32>
    %76 = vector.shape_cast %75 : vector<1x8x8xf32> to vector<8x8xf32>
    %cst_43 = arith.constant 5.000000e-01 : f32
    %77 = vector.broadcast %cst_43 : f32 to vector<8x512xf32>
    %78 = arith.mulf %77, %74 : vector<8x512xf32>
    %79 = math.tanh %78 : vector<8x512xf32>
    %cst_44 = arith.constant 1.000000e+00 : f32
    %80 = vector.broadcast %cst_44 : f32 to vector<8x512xf32>
    %81 = arith.addf %79, %80 : vector<8x512xf32>
    %cst_45 = arith.constant 5.000000e-01 : f32
    %82 = vector.broadcast %cst_45 : f32 to vector<8x512xf32>
    %83 = arith.mulf %82, %81 : vector<8x512xf32>
    %cst_46 = arith.constant dense<0.000000e+00> : vector<8x512xf32>
    %84 = tpu.matmul %76, %83, %cst_46 {dimension_numbers = #tpu.dot_dimension_numbers<[1], [0], [0], [1], [0, 0, 1, 1], [], []>, precision = #tpu.contract_precision<fp32>} : vector<8x8xf32>, vector<8x512xf32>, vector<8x512xf32> -> vector<8x512xf32>
    %85 = vector.broadcast %31 : vector<8x1xf32> to vector<8x512xf32>
    %86 = arith.mulf %85, %84 : vector<8x512xf32>
    %cst_47 = arith.constant dense<0.000000e+00> : vector<512xf32>
    %87 = vector.multi_reduction <add>, %86, %cst_47 [0] : vector<8x512xf32> to vector<512xf32>
    %88 = vector.shape_cast %87 : vector<512xf32> to vector<1x512xf32>
    %89 = vector.broadcast %33 : f32 to vector<1x512xf32>
    %90 = arith.addf %88, %89 : vector<1x512xf32>
    %cst_48 = arith.constant 5.000000e-01 : f32
    %91 = vector.broadcast %cst_48 : f32 to vector<1x512xf32>
    %92 = arith.mulf %91, %90 : vector<1x512xf32>
    %93 = math.tanh %92 : vector<1x512xf32>
    %cst_49 = arith.constant 1.000000e+00 : f32
    %94 = vector.broadcast %cst_49 : f32 to vector<1x512xf32>
    %95 = arith.addf %93, %94 : vector<1x512xf32>
    %cst_50 = arith.constant 5.000000e-01 : f32
    %96 = vector.broadcast %cst_50 : f32 to vector<1x512xf32>
    %97 = arith.mulf %96, %95 : vector<1x512xf32>
    %c0_51 = arith.constant 0 : index
    %c0_52 = arith.constant 0 : index
    %98 = vector.load %arg11[%c0_51, %c0_52] : memref<1x512xf32, #tpu.memory_space<vmem>>, vector<1x512xf32>
    tpu.vector_store %arg11[%c0_51, %c0_52], %97 {strides = array<i32>} : memref<1x512xf32, #tpu.memory_space<vmem>>, vector<1x512xf32>,
    return
  }
  func.func @transform_0(%arg0: i32) -> (i32, i32) {
    %c0_i32 = arith.constant 0 : i32
    %c0_i32_0 = arith.constant 0 : i32
    return %c0_i32, %arg0 : i32, i32
  }
  func.func @transform_1(%arg0: i32) -> (i32, i32) {
    %c0_i32 = arith.constant 0 : i32
    %c0_i32_0 = arith.constant 0 : i32
    return %c0_i32, %arg0 : i32, i32
  }
  func.func @transform_2(%arg0: i32) -> (i32, i32) {
    %c0_i32 = arith.constant 0 : i32
    %c0_i32_0 = arith.constant 0 : i32
    %c0_i32_1 = arith.constant 0 : i32
    return %c0_i32, %c0_i32_0 : i32, i32
  }
  func.func @transform_3(%arg0: i32) -> (i32, i32) {
    %c0_i32 = arith.constant 0 : i32
    %c0_i32_0 = arith.constant 0 : i32
    %c0_i32_1 = arith.constant 0 : i32
    return %c0_i32, %c0_i32_0 : i32, i32
  }
  func.func @transform_4(%arg0: i32) -> (i32, i32) {
    %c0_i32 = arith.constant 0 : i32
    %c0_i32_0 = arith.constant 0 : i32
    %c0_i32_1 = arith.constant 0 : i32
    return %c0_i32, %c0_i32_0 : i32, i32
  }
  func.func @transform_5(%arg0: i32) -> (i32, i32) {
    %c0_i32 = arith.constant 0 : i32
    %c0_i32_0 = arith.constant 0 : i32
    %c0_i32_1 = arith.constant 0 : i32
    return %c0_i32, %c0_i32_0 : i32, i32
  }
  func.func @transform_6(%arg0: i32) -> (i32, i32, i32) {
    %c0_i32 = arith.constant 0 : i32
    %c0_i32_0 = arith.constant 0 : i32
    %c0_i32_1 = arith.constant 0 : i32
    %c0_i32_2 = arith.constant 0 : i32
    return %c0_i32, %c0_i32_0, %c0_i32_1 : i32, i32, i32
  }
  func.func @transform_7(%arg0: i32) -> (i32, i32, i32) {
    %c0_i32 = arith.constant 0 : i32
    %c0_i32_0 = arith.constant 0 : i32
    %c0_i32_1 = arith.constant 0 : i32
    %c0_i32_2 = arith.constant 0 : i32
    return %c0_i32, %c0_i32_0, %c0_i32_1 : i32, i32, i32
  }
  func.func @transform_8(%arg0: i32) -> (i32, i32, i32) {
    %c0_i32 = arith.constant 0 : i32
    %c0_i32_0 = arith.constant 0 : i32
    %c0_i32_1 = arith.constant 0 : i32
    %c0_i32_2 = arith.constant 0 : i32
    return %c0_i32, %c0_i32_0, %c0_i32_1 : i32, i32, i32
  }
  func.func @transform_9(%arg0: i32) -> i32 {
    %c0_i32 = arith.constant 0 : i32
    %c0_i32_0 = arith.constant 0 : i32
    return %c0_i32 : i32
  }
  func.func @transform_10(%arg0: i32) -> (i32, i32) {
    %c0_i32 = arith.constant 0 : i32
    %c0_i32_0 = arith.constant 0 : i32
    return %c0_i32, %arg0 : i32, i32
  }
}

</mosaic_0001>

<bundles_post_ra>
// kernel: tpu_custom_call.1
= control target key start
LH: loop header
LB: loop body
LE: loop exit
PB: predicated region body
PF: predicated region fallthrough
CT: control target
= control target key end

     0   :  { %s7757_s0 = inlined_call_operand.hbm [shape: f32[1,1024], index: 0, kind: input, shape index: {}]   ;;  %s7758_s1 = inlined_call_operand.hbm [shape: f32[1,1024], index: 1, kind: input, shape index: {}]   ;;  %s7759_s2 = inlined_call_operand.vmem [shape: f32[50,4], index: 2, kind: input, shape index: {}]   ;;  %s7760_s3 = inlined_call_operand.vmem [shape: f32[50,50], index: 3, kind: input, shape index: {}]   ;;  %s7761_s4 = inlined_call_operand.vmem [shape: f32[8,4], index: 4, kind: input, shape index: {}]   ;;  %s7762_s5 = inlined_call_operand.hbm [shape: f32[8,8], index: 5, kind: input, shape index: {}]   ;;  %s7763_s6 = inlined_call_operand.vmem [shape: f32[2,8,8], index: 6, kind: input, shape index: {}]   ;;  %s7764_s7 = inlined_call_operand.vmem [shape: f32[2,8,1], index: 7, kind: input, shape index: {}]   ;;  %s7765_s8 = inlined_call_operand.vmem [shape: f32[2,8,8], index: 8, kind: input, shape index: {}]   ;;  %s7766_s9 = inlined_call_operand.vmem [shape: f32[2], index: 9, kind: input, shape index: {}]   ;;  %s7767_s10 = inlined_call_operand.hbm [shape: f32[1,1024], index: 10, kind: output, shape index: {}]  }
   0x1   :  { %7830 = sst [smem:[#allocation39_spill]] %s7762_s5 }
   0x2   :  { %7831 = sst [smem:[#allocation40_spill]] %s7766_s9 }
   0x3   :  { %15 = vsyncpa [#allocation3], 0 }
   0x4   :  { %17 = vsyncpa [#allocation3 + $0x1], 0 }
   0x5   :  { %18 = vsyncpa [#allocation7], 0 }
   0x6   :  { %20 = vsyncpa [#allocation7 + $0x1], 0 }
   0x7   :  { %21 = vsyncpa [#allocation5], 0 }
   0x8   :  { %22 = vsyncpa [#allocation4], 0 }
   0x9   :  { %24 = vsyncpa [#allocation4 + $0x1], 0  ;;  %s6107_s13 = smov 0   ;;  %s6109_s14 = smov 0  }
   0xa   :  { %s6111_s15 = smov 0   ;;  %s6113_s16 = smov 0  }
   0xb LB: > { %7832 = sst [smem:[#allocation16_spill]] %s6032_s13  ;;  %s6128_s17 = sadd.s32 4294967295, %s6044_s16   ;;  %s6044_s16 = sphi %s6113_s16, %s7949_s16   ;;  %s6040_s15 = sphi %s6111_s15, %s7951_s15   ;;  %s6036_s14 = sphi %s6109_s14, %s7953_s14   ;;  %s6032_s13 = sphi %s6107_s13, %s7952_s13  }
   0xc   : > { %7833 = sst [smem:[#allocation17_spill]] %s6040_s15  ;;  %s5709_s18 = sadd.s32 4294967294, %s6044_s16  }
   0xd   : > { %7834 = sst [smem:[#allocation18_spill]] %s6044_s16  ;;  %p50_p0 = scmp.ne.s32.totalorder %s6036_s14, %s6032_s13 }
   0xe   : > { %p51_p1 = scmp.eq.s32.totalorder %s6128_s17, 0  ;;  %p268_p2 = scmp.eq.s32.totalorder %s6128_s17, 1 }
   0xf   : > { %p274_p3 = scmp.eq.s32.totalorder %s5709_s18, 1  ;;  %p5710_p5 = scmp.ge.s32.totalorder %s6044_s16, 1 }
  0x10   : > { %p6137_p4 = por %p51_p1, %p50_p0  ;;  %p281_p7 = scmp.lt.s32.totalorder %s6044_s16, 3 }
  0x11   : > { %p6142_p6 = por %p274_p3, %p50_p0  ;;  %s7838_s5 = sld [smem:[#allocation39_spill]] }
  0x12   : > { %p6150_p8 = pnand %p5710_p5, %p281_p7  ;;  %s6046_s25 = smov [#allocation8]  }
  0x13   : > { %s7836_s20 = scalar_select %p6142_p6, 1, 0 }
  0x14   : > { %p5746_p10 = pneg %p6150_p8  ;;  %s304_s26 = sshll.u32 %s6046_s25, 4  ;;  %s305_s26 = int_to_ptr.vmem [resolvable:$true] %s304_s26 }
  0x15   : > { %7837 = sst [smem:[#allocation19_spill]] %s7836_s20  ;;  %s6047_s30 = smov [#allocation9]  }
  0x16   : > { %s7840_s9 = sld [smem:[#allocation40_spill]]  ;;  %p5747_p11 = pnand %p5746_p10, %p51_p1 }
  0x17   : > { %s302_s23 = sshll.u32 %s7838_s5, 4  ;;  %s6163_s11 = sadd.s32 1, %s6044_s16   ;;  %s303_s23 = int_to_ptr.hbm [resolvable:$true] %s302_s23 }
  0x18   : > { %5749 = dma.hbm_to_vmem [thread:$0]  (!%p5747_p11), %s303_s23, 128, %s305_s26, [#allocation7]  }
  0x19   : > { %7841 = sst [smem:[#allocation20_spill]] %s6163_s11  ;;  %s37_s12 = sadd.s32 1, %s6040_s15 }
  0x1a   : > { %s34_s18 = ssub.s32 %s6044_s16, %s6163_s11  ;;  %p44_p12 = scmp.ne.s32.totalorder %s6040_s15, %s6036_s14 }
  0x1b   : > { %p35_p13 = scmp.eq.s32.totalorder %s34_s18, 0  ;;  %p45_p0 = scmp.eq.s32.totalorder %s6044_s16, 0 }
  0x1c   : > { %s323_s29 = sshll.u32 %s7840_s9, 4  ;;  %p6173_p3 = por %p268_p2, %p44_p12  ;;  %s324_s29 = int_to_ptr.vmem [resolvable:$true] %s323_s29 }
  0x1d   : > { %5752 = dma.vmem_to_smem (!%p5747_p11), %s324_s29, 16, %s6047_s30, [#allocation5]  }
  0x1e   : > { %s7842_s21 = scalar_select %p6173_p3, 1, 0 }
  0x1f   : > { %p5766_p5 = scmp.lt.s32.totalorder %s6044_s16, 2  ;;  %p46_p7 = por %p45_p0, %p44_p12 }
  0x20   : > { %7843 = sst [smem:[#allocation21_spill]] %s7842_s21  ;;  %s334_s23 = sand.u32 1, %s6040_s15  }
  0x21   : > { %s6179_s22 = scalar_select %p35_p13, %s6040_s15, %s37_s12  }
  0x22   : > { %s6182_s25 = sshll.u32 %s334_s23, 2  ;;  %s5715_s26 = sshll.u32 %s6044_s16, 2 }
  0x23   : > { %7844 = sst [smem:[#allocation22_spill]] %s6179_s22  ;;  %s342_s29 = scalar_lea.hbm %s7757_s0, %s5715_s26 }
  0x24   : > { %s338_s30 = scalar_lea.vmem [#allocation2], %s6182_s25  ;;  %s344_s5 = sshll.u32 %s342_s29, 4  ;;  %s345_s5 = int_to_ptr.hbm [resolvable:$true] %s344_s5 }
  0x25   : > { %s346_s18 = sshll.u32 %s338_s30, 4  ;;  %p6189_p2 = pnand %p5766_p5, %p46_p7  ;;  %s347_s18 = int_to_ptr.vmem [resolvable:$true] %s346_s18 }
  0x26   : > { %s361_s15 = scalar_lea.hbm %s7758_s1, %s5715_s26  ;;  %s353_s11 = sand.u32 1, %s6044_s16  }
  0x27   : > { %s335_s20 = scalar_lea.sflag [#allocation3], %s334_s23  ;;  %s5906_s13 = sshra.s32 %s345_s5, 4  ;;  %s5907_s13 = int_to_ptr.hbm [resolvable:$true] %s5906_s13 }
  0x28   : > { %s5908_s27 = scalar_lea.hbm %s5907_s13, 4  ;;  %p5910_p11 = pneg %p6189_p2 }
  0x29   : > { %p5909_p10 = scmp.ne.s32.totalorder %s5907_s13, %s5908_s27  ;;  %s5913_s30 = scalar_lea.hbm %s7757_s0, 8 }
  0x2a   : > { %p5914_p0 = scmp.lt.s32.totalorder %s5907_s13, %s7757_s0  ;;  %p5915_p5 = scmp.lt.s32.totalorder %s5913_s30, %s5908_s27 }
  0x2b   : > { %p5911_p12 = pnand %p5910_p11, %p5909_p10 }
  0x2c   : > { %p5916_p7 = por %p5915_p5, %p5914_p0 }
  0x2d   : > { %p5912_p13 = pneg %p5911_p12 }
  0x2f   : > { %p5917_p9 = pnand %p5916_p7, %p5912_p13 }
  0x31   : > { %5920 = shalt.err (!%p5917_p9)
}
  0x32   : > { %5756 = dma.hbm_to_vmem [thread:$0]  (!%p6189_p2), %s345_s5, 64, %s347_s18, %s335_s20  }
  0x33   : > { %s363_s23 = sshll.u32 %s361_s15, 4  ;;  %s357_s26 = scalar_lea.vmem [#allocation6], %s6182_s25  ;;  %s364_s23 = int_to_ptr.hbm [resolvable:$true] %s363_s23 }
  0x34   : > { %s365_s16 = sshll.u32 %s357_s26, 4  ;;  %s354_s28 = scalar_lea.sflag [#allocation7], %s353_s11  ;;  %s366_s16 = int_to_ptr.vmem [resolvable:$true] %s365_s16 }
  0x35   : > { %s5936_s29 = sshra.s32 %s364_s23, 4  ;;  %s5943_s30 = scalar_lea.hbm %s7758_s1, 8  ;;  %s5937_s29 = int_to_ptr.hbm [resolvable:$true] %s5936_s29 }
  0x36   : > { %s5938_s21 = scalar_lea.hbm %s5937_s29, 4  ;;  %p5944_p9 = scmp.lt.s32.totalorder %s5937_s29, %s7758_s1 }
  0x37   : > { %p5939_p10 = scmp.ne.s32.totalorder %s5937_s29, %s5938_s21  ;;  %p5945_p0 = scmp.lt.s32.totalorder %s5943_s30, %s5938_s21 }
  0x39   : > { %p5941_p12 = pnand %p5939_p10, %p5910_p11  ;;  %p5946_p5 = por %p5945_p0, %p5944_p9 }
  0x3b   : > { %p5942_p13 = pneg %p5941_p12 }
  0x3d   : > { %p5947_p7 = pnand %p5946_p5, %p5942_p13 }
  0x3f   : > { %5950 = shalt.err (!%p5947_p7)
}
  0x40   : > { %5759 = dma.hbm_to_vmem [thread:$0]  (!%p6189_p2), %s364_s23, 64, %s366_s16, %s354_s28  }
  0x41   : > { %374 = sbr.rel (%p6150_p8) target bundleno = 1592 (0x638), region = 60 }
  0x46   : > { %s6225_s15 = sand.u32 1, %s6036_s14  }
  0x47   : > { %s6228_s20 = sshll.u32 %s6225_s15, 2  ;;  %s377_s11 = scalar_lea.sflag [#allocation3], %s6225_s15 }
  0x48   : > { %s380_s21 = scalar_lea.vmem [#allocation2], %s6228_s20 }
  0x49   : > { %6011 = dma.done.wait (%p6137_p4), %s377_s11, 64  }
  0x4a   : > { %6013 = vsyncadd (%p6137_p4), %s377_s11, 4294967232  ;;  %s386_s9 = sand.u32 1, %s6128_s17   ;;  %s390_s24 = scalar_lea.vmem [#allocation6], %s6228_s20 }
  0x4b   : > { %s387_s16 = scalar_lea.sflag [#allocation7], %s386_s9 }
  0x4c   : > { %6015 = dma.done.wait (%p6137_p4), %s387_s16, 64  }
  0x4d   : > { %6017 = vsyncadd (%p6137_p4), %s387_s16, 4294967232 }
  0x4e   : > { %6019 = dma.done.wait (%p51_p1), [#allocation7], 128  }
  0x4f   : > { %6021 = vsyncadd (%p51_p1), [#allocation7], 4294967168 }
  0x50   : > { %6023 = dma.done.wait (%p51_p1), [#allocation5], 16  }
  0x51   : > { %6025 = vsyncadd (%p51_p1), [#allocation5], 4294967280 }
  0x52   : > { %406 = sfence }
  0x53   : > { %v6253_v0 = vld [vmem:[%s7759_s2 + $0x30] sm:$0x3]  ;;  %v6258_v1 = vld [vmem:[%s7759_s2 + $0x28] sm:$0xff]  ;;  %v7776_v2 = vmov 0   ;;  %v7778_v3 = vmov 1   ;;  %v6269_v4 = vld [vmem:[%s7759_s2 + $0x20] sm:$0xff] }
  0x54   : > { %5810 = vset.pattern.permute.xlu1 %v7776_v2  ;;  %5808 = vset.pattern.permute.xlu0 %v7776_v2  ;;  %v6276_v5 = vld [vmem:[%s7759_s2 + $0x18] sm:$0xff]  ;;  %v6285_v6 = vld [vmem:[%s7759_s2 + $0x10] sm:$0xff]  ;;  %v6293_v7 = vld [vmem:[%s7759_s2 + $0x8] sm:$0xff]  ;;  %vm669_vm0 = vcmask 1041408   ;;  %vm647_vm1 = vcmask 408576   ;;  %s2458_s11 = sld [smem:[#allocation9]] }
  0x55   : > { %488 = vperm.xlu0 %5808, %v6253_v0   ;;  %483 = vperm.xlu1 %5810, %v6258_v1   ;;  %v6298_v8 = vld [vmem:[%s7759_s2] sm:$0xff]  ;;  %v447_v10 = vld [vmem:[%s390_s24] sm:$0xf]  ;;  %vm2521_vm2 = vcmask 64512   ;;  %s5724_s13 = sld [smem:[#allocation9 + $0x1]]  ;;  %s5729_s27 = sshll.u32 %s6128_s17, 2 }
  0x56   : > { %5811 = vset.pattern.permute.xlu2 %v7778_v3  ;;  %v6311_v11 = vperm.slane %v447_v10, 2  ;;  %v6313_v12 = vperm.slane %v447_v10, 3  ;;  %v6327_v19 = vperm.slane %v447_v10, 0  ;;  %v6349_v37 = vperm.slane %v447_v10, 1  ;;  %v612_v63 = vld [vmem:[%s7760_s3] sm:$0xff]  ;;  %s5590_s5 = scalar_lea.hbm %s7767_s10, %s5729_s27  ;;  %s5580_s16 = scalar_lea.sflag [#allocation4], %s6225_s15 }
  0x57   : > { %549 = vperm.xlu2 %5811, %v6258_v1   ;;  %vm5568_vm3 = vcmask 1040384   ;;  %vm5570_vm4 = vcmask 1042434   ;;  %s5594_s17 = sshll.u32 %s5590_s5, 4  ;;  %s5986_s19 = scalar_lea.hbm %s7767_s10, 8  ;;  %s5595_s17 = int_to_ptr.hbm [resolvable:$true] %s5594_s17 }
  0x58   : > { %7846 = vst [vmem:[#allocation23_spill] sm:$0xff] %v6313_v12  ;;  %s5980_s24 = sshra.s32 %s5595_s17, 4  ;;  %s5981_s24 = int_to_ptr.hbm [resolvable:$true] %s5980_s24 }
  0x59   : > { %s5982_s25 = scalar_lea.hbm %s5981_s24, 4  ;;  %p5987_p2 = scmp.lt.s32.totalorder %s5981_s24, %s7767_s10 }
  0x5a   : > { %p5983_p1 = scmp.ne.s32.totalorder %s5981_s24, %s5982_s25  ;;  %p5988_p11 = scmp.lt.s32.totalorder %s5986_s19, %s5982_s25 }
  0x5c   : > { %p5984_p4 = pnand %p5983_p1, %p6173_p3  ;;  %p5989_p10 = por %p5988_p11, %p5987_p2 }
  0x5d   : > { %5809 = vset.pattern.permute.xlu0 %v7778_v3  ;;  %478 = vperm.xlu1 %5810, %v6269_v4  }
  0x5e   : > { %553 = vperm.xlu0 %5809, %v6253_v0   ;;  %p5985_p8 = pneg %p5984_p4 }
  0x5f   : > { %5812 = vset.pattern.permute.xlu2 %v7776_v2 }
  0x60   : > { %473 = vperm.xlu2 %5812, %v6276_v5   ;;  %p5990_p12 = pnand %p5989_p10, %p5985_p8 }
  0x65   : > { %5813 = vset.pattern.permute.xlu1 %v7778_v3 }
  0x66   : > { %545 = vperm.xlu1 %5813, %v6269_v4   ;;  %541 = vperm.xlu0 %5809, %v6276_v5  }
  0x68   : > { %468 = vperm.xlu2 %5812, %v6285_v6  }
  0x6e   : > { %5814 = vset.pattern.permute.xlu1 %v7776_v2  ;;  %5816 = vset.pattern.permute.xlu0 %v7776_v2 }
  0x6f   : > { %463 = vperm.xlu1 %5814, %v6293_v7   ;;  %458 = vperm.xlu0 %5816, %v6298_v8  }
  0x70   : > { %5815 = vset.pattern.permute.xlu2 %v7778_v3 }
  0x71   : > { %537 = vperm.xlu2 %5815, %v6285_v6  }
  0x77   : > { %5817 = vset.pattern.permute.xlu1 %v7778_v3 }
  0x78   : > { %533 = vperm.xlu1 %5817, %v6293_v7  }
  0x79   : > { %529 = vperm.xlu2 %5815, %v6298_v8  }
  0xb1   : > { %v550_v9 = vpop.permute.xlu2 %549 }
  0xba   : > { %v6315_v13 = vpop.permute.xlu2 %473 }
  0xbb   : > { %v514_v14 = vmul.f32 %v6311_v11, %v6315_v13  ;;  %v515_v15 = vmul.f32 %v6313_v12, %v6315_v13  ;;  %v512_v54 = vmul.f32 %v6327_v19, %v6315_v13 }
  0xc2   : > { %v6321_v16 = vpop.permute.xlu2 %468 }
  0xc3   : > { %v510_v17 = vmul.f32 %v6311_v11, %v6321_v16  ;;  %v511_v18 = vmul.f32 %v6313_v12, %v6321_v16  ;;  %v508_v34 = vmul.f32 %v6327_v19, %v6321_v16 }
  0xc7   : > { %v484_v20 = vpop.permute.xlu1 %483  ;;  %v489_v21 = vpop.permute.xlu0 %488 }
  0xc8   : > { %v520_v22 = vmul.f32 %v6327_v19, %v484_v20  ;;  %v522_v23 = vmul.f32 %v6311_v11, %v484_v20  ;;  %v523_v24 = vmul.f32 %v6313_v12, %v484_v20  ;;  %v526_v25 = vmul.f32 %v6311_v11, %v489_v21 }
  0xc9   : > { %v527_v26 = vmul.f32 %v6313_v12, %v489_v21  ;;  %v524_v31 = vmul.f32 %v6327_v19, %v489_v21  ;;  %v521_v47 = vmul.f32 %v6349_v37, %v484_v20  ;;  %v525_v48 = vmul.f32 %v6349_v37, %v489_v21 }
  0xca   : > { %v6334_v27 = vadd.f32 %v550_v9, %v522_v23  ;;  %v6336_v28 = vadd.f32 %v550_v9, %v523_v24  ;;  %v576_v29 = vadd.f32 %v550_v9, %v520_v22  ;;  %v513_v22 = vmul.f32 %v6349_v37, %v6315_v13 }
  0xcb   : > { %v6338_v30 = vpop.permute.xlu2 %537  ;;  %v6371_v55 = vadd.f32 %v550_v9, %v521_v47 }
  0xcc   : > { %7847 = vst [vmem:[#allocation24_spill] sm:$0xff] %v6336_v28  ;;  %v6342_v32 = vadd.f32 %v6338_v30, %v510_v17  ;;  %v6345_v33 = vadd.f32 %v6338_v30, %v511_v18  ;;  %v604_v35 = vmax.f32 %v576_v29, 0.0  ;;  %v564_v44 = vadd.f32 %v6338_v30, %v508_v34 }
  0xcd   : > { %v605_v29 = vmax.f32 %v6371_v55, 0.0 }
  0xce   : > { %7848 = vst [vmem:[#allocation25_spill] sm:$0xff] %v6345_v33  ;;  %v6358_v46 = vand.u32 4294901760, %v604_v35  ;;  %v592_v50 = vmax.f32 %v564_v44, 0.0 }
  0xcf   : > { %v479_v36 = vpop.permute.xlu1 %478 }
  0xd0   : > { %v518_v38 = vmul.f32 %v6311_v11, %v479_v36  ;;  %v519_v39 = vmul.f32 %v6313_v12, %v479_v36  ;;  %v554_v40 = vpop.permute.xlu0 %553  ;;  %v516_v52 = vmul.f32 %v6327_v19, %v479_v36  ;;  %v6367_v53 = vsub.f32 %v604_v35, %v6358_v46 }
  0xd1   : > { %v580_v41 = vadd.f32 %v554_v40, %v524_v31  ;;  %v6353_v42 = vadd.f32 %v554_v40, %v526_v25  ;;  %v6355_v43 = vadd.f32 %v554_v40, %v527_v26  ;;  %v581_v59 = vadd.f32 %v554_v40, %v525_v48 }
  0xd2   : > { %v6390_v18 = vand.u32 4294901760, %v592_v50  ;;  %v7782_v21 = vand.u32 4294901760, %v6367_v53  ;;  %v517_v31 = vmul.f32 %v6349_v37, %v479_v36 }
  0xd3   : > { %7849 = vst [vmem:[#allocation26_spill] sm:$0xff] %v6355_v43  ;;  %v608_v45 = vmax.f32 %v580_v41, 0.0  ;;  %v609_v24 = vmax.f32 %v581_v59, 0.0  ;;  %v6447_v55 = vpop.permute.xlu2 %529 }
  0xd4   : > { %v6409_v13 = vsub.f32 %v592_v50, %v6390_v18  ;;  %v780_v36 = vsub.f32 %v6367_v53, %v7782_v21  ;;  %7853 = vst [vmem:[#allocation30_spill] sm:$0xff] %v6447_v55  ;;  %v7783_v21 = vmov 3  }
  0xd5   : > { %v671_v49 = vsel %vm669_vm0, %v608_v45, 0  ;;  %5818 = vset.pattern.permute.xlu1 %v7783_v21  ;;  %5820 = vset.pattern.permute.xlu0 %v7783_v21 }
  0xd6   : > { %v6363_v51 = vand.u32 4294901760, %v671_v49  ;;  %620 = vperm.xlu1 %5818, %v6298_v8   ;;  %5819 = vset.pattern.permute.xlu2 %v7783_v21 }
  0xd7   : > { %628 = vperm.xlu0 %5820, %v6285_v6   ;;  %624 = vperm.xlu2 %5819, %v6293_v7  }
  0xd8   : > { %v546_v56 = vpop.permute.xlu1 %545  ;;  %v542_v57 = vpop.permute.xlu0 %541  ;;  %692 = vmatpush.msra.mxu0 %v6363_v51  ;;  %918 = vmatpush.msra.mxu3 %v6363_v51  ;;  %v6376_v58 = vsub.f32 %v671_v49, %v6363_v51  ;;  %v674_v49 = vsel %vm669_vm0, %v609_v24, 0 }
  0xd9   : > { %v572_v60 = vadd.f32 %v546_v56, %v516_v52  ;;  %v6378_v61 = vadd.f32 %v546_v56, %v518_v38  ;;  %v6380_v62 = vadd.f32 %v546_v56, %v519_v39  ;;  %v568_v9 = vadd.f32 %v542_v57, %v512_v54 }
  0xda   : > { %v6385_v10 = vadd.f32 %v542_v57, %v514_v14  ;;  %v6387_v17 = vadd.f32 %v542_v57, %v515_v15  ;;  %694 = vmatpush.msra.mxu0 %v6358_v46  ;;  %853 = vmatpush.msra.mxu2 %v6376_v58  ;;  %v649_v14 = vsel %vm647_vm1, %v612_v63, 0  ;;  %v509_v15 = vmul.f32 %v6349_v37, %v6321_v16 }
  0xdb   : > { %7850 = vst [vmem:[#allocation27_spill] sm:$0xff] %v6380_v62  ;;  %v600_v20 = vmax.f32 %v572_v60, 0.0  ;;  %920 = vmatpush.msra.mxu3 %v6358_v46  ;;  %v596_v23 = vmax.f32 %v568_v9, 0.0  ;;  %v7785_v26 = vand.u32 4294901760, %v6376_v58  ;;  %v6422_v38 = vand.u32 4294901760, %v649_v14 }
  0xdc   : > { %7851 = vst [vmem:[#allocation28_spill] sm:$0xff] %v6387_v17  ;;  %856 = vmatpush.msra.mxu2 %v6367_v53  ;;  %v6424_v39 = vadd.f32 %v546_v56, %v517_v31  ;;  %v6429_v41 = vadd.f32 %v542_v57, %v513_v22  ;;  %v6438_v50 = vadd.f32 %v6338_v30, %v509_v15  ;;  %v7779_v56 = vand.u32 4294901760, %v6409_v13 }
  0xdd   : > { %v6401_v25 = vand.u32 4294901760, %v600_v20  ;;  %v6406_v34 = vand.u32 4294901760, %v596_v23  ;;  %v774_v16 = vsub.f32 %v6376_v58, %v7785_v26  ;;  %v6450_v57 = vand.u32 4294901760, %v605_v29 }
  0xde   : > { %v781_v30 = vand.u32 4294901760, %v780_v36  ;;  %v6455_v60 = vsub.f32 %v649_v14, %v6422_v38  ;;  %v601_v63 = vmax.f32 %v6424_v39, 0.0  ;;  %v6464_v22 = vand.u32 4294901760, %v674_v49  ;;  %632 = vperm.xlu1 %5818, %v6276_v5  }
  0xdf   : > { %696 = vmatpush.msra.mxu0 %v6401_v25  ;;  %922 = vmatpush.msra.mxu3 %v6401_v25  ;;  %v6417_v35 = vsub.f32 %v600_v20, %v6401_v25  ;;  %v6427_v40 = vsub.f32 %v596_v23, %v6406_v34  ;;  %v775_v44 = vand.u32 4294901760, %v774_v16  ;;  %v597_v23 = vmax.f32 %v6429_v41, 0.0 }
  0xe0   : > { %v798_v16 = vsub.f32 %v6409_v13, %v7779_v56  ;;  %v593_v36 = vmax.f32 %v6438_v50, 0.0  ;;  %v6480_v41 = vsub.f32 %v605_v29, %v6450_v57  ;;  %v6491_v2 = vsub.f32 %v674_v49, %v6464_v22  ;;  %636 = vperm.xlu2 %5819, %v6269_v4  }
  0xe1   : > { %v464_v45 = vpop.permute.xlu1 %463  ;;  %v6431_v47 = vpop.permute.xlu0 %458  ;;  %698 = vmatpush.msra.mxu0 %v6406_v34  ;;  %859 = vmatpush.msra.mxu2 %v6417_v35  ;;  %v7781_v48 = vand.u32 4294901760, %v6417_v35  ;;  %v7780_v20 = vand.u32 4294901760, %v6427_v40  ;;  %v6493_v3 = vand.u32 4294901760, %v597_v23 }
  0xe2   : > { %v6441_v52 = vmul.f32 %v6311_v11, %v464_v45  ;;  %v6444_v54 = vmul.f32 %v6313_v12, %v464_v45  ;;  %924 = vmatpush.msra.mxu3 %v6406_v34  ;;  %776 = vmatpush.msra.mxu1 %v775_v44  ;;  %v500_v59 = vmul.f32 %v6327_v19, %v6431_v47  ;;  %v613_v44 = vld [vmem:[%s7760_s3 + $0x8] sm:$0xff] }
  0xe3   : > { %700 = vmatpush.msra.mxu0 %v6390_v18  ;;  %862 = vmatpush.msra.mxu2 %v6427_v40  ;;  %v786_v9 = vsub.f32 %v6417_v35, %v7781_v48  ;;  %v501_v15 = vmul.f32 %v6349_v37, %v6431_v47  ;;  %v792_v31 = vsub.f32 %v6427_v40, %v7780_v20  ;;  %v652_v20 = vsel %vm647_vm1, %v613_v44, 0 }
  0xe4   : > { %7852 = vst [vmem:[#allocation29_spill] sm:$0xff] %v6444_v54  ;;  %782 = vmatpush.msra.mxu1 %v781_v30  ;;  %v556_v14 = vadd.f32 %v6447_v55, %v500_v59  ;;  %926 = vmatpush.msra.mxu3 %v6390_v18  ;;  %v6485_v59 = vand.u32 4294901760, %v601_v63  ;;  %v504_v50 = vmul.f32 %v6327_v19, %v464_v45  ;;  %v6508_v19 = vand.u32 4294901760, %v593_v36 }
  0xe5   : > { %865 = vmatpush.msra.mxu2 %v6409_v13  ;;  %v787_v24 = vand.u32 4294901760, %v786_v9  ;;  %v793_v30 = vand.u32 4294901760, %v792_v31  ;;  %v6488_v9 = vand.u32 4294901760, %v6455_v60  ;;  %v505_v29 = vmul.f32 %v6349_v37, %v464_v45 }
  0xe6   : > { %v584_v39 = vmax.f32 %v556_v14, 0.0  ;;  %v6500_v56 = vadd.f32 %v6447_v55, %v501_v15  ;;  %v799_v31 = vand.u32 4294901760, %v798_v16  ;;  %v7786_v45 = vand.u32 4294901760, %v6491_v2  ;;  %640 = vperm.xlu1 %5818, %v6258_v1  }
  0xe7   : > { %788 = vmatpush.msra.mxu1 %v787_v24  ;;  %7854 = vst [vmem:[#allocation31_spill] sm:$0xff] %v6488_v9  ;;  %v708_v37 = vsub.f32 %v6455_v60, %v6488_v9  ;;  %v6514_v15 = vsub.f32 %v601_v63, %v6485_v59  ;;  %v6527_v63 = vsub.f32 %v597_v23, %v6493_v3 }
  0xe8   : > { %v6497_v14 = vand.u32 4294901760, %v584_v39  ;;  %v1184_v23 = vsub.f32 %v6491_v2, %v7786_v45  ;;  %v7857_v45 = vand.u32 4294901760, %v6480_v41  ;;  %644 = vperm.xlu2 %5819, %v6253_v0  }
  0xe9   : > { %794 = vmatpush.msra.mxu1 %v793_v30 }
  0xea   : > { %v6502_v24 = vpop.permute.xlu1 %533  ;;  %v6518_v30 = vsub.f32 %v584_v39, %v6497_v14  ;;  %v1190_v26 = vsub.f32 %v6480_v41, %v7857_v45 }
  0xeb   : > { %v560_v49 = vadd.f32 %v6502_v24, %v504_v50  ;;  %v561_v48 = vadd.f32 %v6502_v24, %v505_v29  ;;  %800 = vmatpush.msra.mxu1 %v799_v31  ;;  %v6520_v50 = vand.u32 4294901760, %v652_v20  ;;  %v585_v29 = vmax.f32 %v6500_v56, 0.0 }
  0xec   : > { %v6541_v56 = vand.u32 4294901760, %v708_v37  ;;  %v6557_v37 = vsub.f32 %v593_v36, %v6508_v19  ;;  %v1185_v36 = vand.u32 4294901760, %v1184_v23  ;;  %v7858_v31 = vand.u32 4294901760, %v6514_v15 }
  0xed   : > { %v588_v16 = vmax.f32 %v560_v49, 0.0  ;;  %v589_v44 = vmax.f32 %v561_v48, 0.0  ;;  %v6534_v39 = vsub.f32 %v652_v20, %v6520_v50  ;;  %v614_v49 = vld [vmem:[%s7760_s3 + $0x10] sm:$0xff]  ;;  %v6559_v54 = vand.u32 4294901760, %v585_v29 }
  0xee   : > { %7855 = vst [vmem:[#allocation32_spill] sm:$0xff] %v6541_v56  ;;  %v655_v17 = vsel %vm647_vm1, %v614_v49, 0  ;;  %v1196_v62 = vsub.f32 %v6514_v15, %v7858_v31  ;;  %v7859_v49 = vand.u32 4294901760, %v6376_v58  ;;  %v7860_v43 = vand.u32 4294901760, %v6518_v30 }
  0xef   : > { %v6531_v48 = vand.u32 4294901760, %v588_v16  ;;  %v6539_v21 = vand.u32 4294901760, %v589_v44  ;;  %v6554_v33 = vand.u32 4294901760, %v6534_v39  ;;  %v6577_v12 = vand.u32 4294901760, %v655_v17 }
  0xf0   : > { %v810_v23 = vsub.f32 %v6518_v30, %v7860_v43  ;;  %v7861_v31 = vand.u32 4294901760, %v6527_v63  ;;  %v7862_v43 = vand.u32 4294901760, %v6367_v53 }
  0xf1   : > { %702 = vmatpush.msra.mxu0 %v6531_v48  ;;  %928 = vmatpush.msra.mxu3 %v6531_v48  ;;  %v6550_v20 = vsub.f32 %v588_v16, %v6531_v48  ;;  %7856 = vst [vmem:[#allocation33_spill] sm:$0xff] %v6554_v33  ;;  %v6575_v45 = vsub.f32 %v589_v44, %v6539_v21  ;;  %v1191_v44 = vand.u32 4294901760, %v1190_v26 }
  0xf2   : > { %v6602_v55 = vsub.f32 %v655_v17, %v6577_v12 }
  0xf3   : > { %704 = vmatpush.msra.mxu0 %v6497_v14  ;;  %868 = vmatpush.msra.mxu2 %v6550_v20  ;;  %v803_v16 = vand.u32 4294901760, %v6550_v20  ;;  %v1213_v26 = vand.u32 4294901760, %v6575_v45 }
  0xf4   : > { %930 = vmatpush.msra.mxu3 %v6497_v14  ;;  %710 = vmatmul.f32.vlgmr.msra.gmra.mxu0 %v6541_v56  ;;  %v716_v56 = vsub.f32 %v6534_v39, %v6554_v33 }
  0xf5   : > { %934 = vmatmul.f32.vlgmr.msra.gmra.mxu3 %v6488_v9  ;;  %986 = vmatpush.msrb.mxu0 %v7859_v49  ;;  %v804_v28 = vsub.f32 %v6550_v20, %v803_v16  ;;  %v1202_v9 = vsub.f32 %v6527_v63, %v7861_v31  ;;  %v6594_v49 = vsub.f32 %v585_v29, %v6559_v54  ;;  %v7863_v31 = vand.u32 4294901760, %v6417_v35 }
  0xf6   : > { %1186 = vmatpush.msrb.mxu3 %v1185_v36  ;;  %871 = vmatpush.msra.mxu2 %v6518_v30  ;;  %v1197_v36 = vand.u32 4294901760, %v1196_v62  ;;  %v811_v29 = vand.u32 4294901760, %v810_v23  ;;  %v6606_v58 = vand.u32 4294901760, %v716_v56  ;;  %v7864_v62 = vand.u32 4294901760, %v6557_v37 }
  0xf7   : > { %874 = vmatmul.f32.vlgmr.msra.gmra.mxu2 %v6455_v60  ;;  %990 = vmatpush.msrb.mxu0 %v7862_v43  ;;  %v805_v20 = vand.u32 4294901760, %v804_v28  ;;  %v615_v28 = vld [vmem:[%s7760_s3 + $0x18] sm:$0xff]  ;;  %v1203_v53 = vand.u32 4294901760, %v1202_v9  ;;  %v7865_v35 = vand.u32 4294901760, %v6427_v40  ;;  %v1214_v56 = vsub.f32 %v6575_v45, %v1213_v26 }
  0xf8   : > { %1102 = vmatpush.msrb.mxu2 %v6464_v22  ;;  %1192 = vmatpush.msrb.mxu3 %v1191_v44  ;;  %v1208_v17 = vsub.f32 %v6557_v37, %v7864_v62  ;;  %v1219_v44 = vand.u32 4294901760, %v6594_v49  ;;  %v6623_v23 = vand.u32 4294901760, %v6602_v55  ;;  %v658_v9 = vsel %vm647_vm1, %v615_v28, 0 }
  0xf9   : > { %994 = vmatpush.msrb.mxu0 %v7863_v31  ;;  %806 = vmatpush.msra.mxu1 %v805_v20  ;;  %v7867_v40 = vand.u32 4294901760, %v6409_v13  ;;  %v1215_v31 = vand.u32 4294901760, %v1214_v56  ;;  %v616_v13 = vld [vmem:[%s7760_s3 + $0x20] sm:$0xff]  ;;  %v7868_v28 = vand.u32 4294901760, %v6518_v30 }
  0xfa   : > { %1104 = vmatpush.msrb.mxu2 %v6450_v57  ;;  %1198 = vmatpush.msrb.mxu3 %v1197_v36  ;;  %7866 = vst [vmem:[#allocation34_spill] sm:$0xff] %v6623_v23  ;;  %v1209_v43 = vand.u32 4294901760, %v1208_v17  ;;  %v1220_v20 = vsub.f32 %v6594_v49, %v1219_v44  ;;  %v6636_v36 = vand.u32 4294901760, %v658_v9 }
  0xfb   : > { %998 = vmatpush.msrb.mxu0 %v7865_v35  ;;  %812 = vmatpush.msra.mxu1 %v811_v29  ;;  %v724_v29 = vsub.f32 %v6602_v55, %v6623_v23 }
  0xfc   : > { %1106 = vmatpush.msrb.mxu2 %v6485_v59  ;;  %1204 = vmatpush.msrb.mxu3 %v1203_v53  ;;  %v6650_v53 = vsub.f32 %v658_v9, %v6636_v36 }
  0xfd   : > { %718 = vmatmul.f32.gmra.mxu0 %v6606_v58  ;;  %814 = vmatmul.f32.vlgmr.msra.gmra.mxu1 %v6422_v38 }
  0xfe   : > { %940 = vmatmul.f32.gmra.mxu3 %v6554_v33  ;;  %1002 = vmatpush.msrb.mxu0 %v7867_v40  ;;  %7869 = vst [vmem:[#allocation35_spill] sm:$0xff] %v6650_v53  ;;  %v6664_v30 = vand.u32 4294901760, %v6650_v53  ;;  %v7875_v40 = vand.u32 4294901760, %v6527_v63 }
  0xff   : > { %1050 = vmatpush.msrb.mxu1 %v6363_v51  ;;  %1108 = vmatpush.msrb.mxu2 %v6493_v3  ;;  %v1221_v51 = vand.u32 4294901760, %v1220_v20 }
 0x100   : > { %1210 = vmatpush.msrb.mxu3 %v1209_v43  ;;  %879 = vmatmul.f32.gmra.mxu2 %v6534_v39  ;;  %7871 = vst [vmem:[#allocation36_spill] sm:$0xff] %v6664_v30  ;;  %v732_v17 = vsub.f32 %v6650_v53, %v6664_v30 }
 0x101   : > { %1006 = vmatpush.msrb.mxu0 %v803_v16  ;;  %1052 = vmatpush.msrb.mxu1 %v6358_v46  ;;  %v6653_v46 = vand.u32 4294901760, %v724_v29  ;;  %v661_v16 = vsel %vm647_vm1, %v616_v13, 0  ;;  %v602_v29 = vmax.f32 %v6378_v61, 0.0  ;;  %v6051_v13 = vmov 2  }
 0x102   : > { %1110 = vmatpush.msrb.mxu2 %v6508_v19  ;;  %1216 = vmatpush.msrb.mxu3 %v1215_v31  ;;  %v6666_v62 = vand.u32 4294901760, %v661_v16 }
 0x103   : > { %1010 = vmatpush.msrb.mxu0 %v7868_v28  ;;  %1054 = vmatpush.msrb.mxu1 %v6401_v25  ;;  %v7870_v25 = vand.u32 4294901760, %v6491_v2 }
 0x104   : > { %1112 = vmatpush.msrb.mxu2 %v6539_v21  ;;  %1222 = vmatpush.msrb.mxu3 %v1221_v51  ;;  %v6683_v35 = vsub.f32 %v661_v16, %v6666_v62  ;;  %v562_v51 = vadd.f32 %v6502_v24, %v6441_v52  ;;  %v7878_v16 = vld [vmem:[#allocation30_spill] sm:$0xff] }
 0x105   : > { %1263 = vmatpush.msra.mxu0 %v6491_v2  ;;  %1056 = vmatpush.msrb.mxu1 %v6406_v34  ;;  %v617_v34 = vld [vmem:[%s7760_s3 + $0x28] sm:$0xff]  ;;  %v7872_v2 = vand.u32 4294901760, %v6480_v41 }
 0x106   : > { %1460 = vmatpush.msra.mxu3 %v6464_v22  ;;  %1114 = vmatpush.msrb.mxu2 %v6559_v54  ;;  %v664_v56 = vsel %vm647_vm1, %v617_v34, 0  ;;  %v6698_v9 = vand.u32 4294901760, %v6683_v35 }
 0x107   : > { %1266 = vmatpush.msra.mxu0 %v6480_v41  ;;  %818 = vmatmul.f32.gmra.mxu1 %v6520_v50  ;;  %v6695_v41 = vand.u32 4294901760, %v732_v17  ;;  %v7879_v17 = vld [vmem:[#allocation32_spill] sm:$0xff] }
 0x108   : > { %1396 = vmatpush.msra.mxu2 %v7870_v25  ;;  %1462 = vmatpush.msra.mxu3 %v6450_v57 }
 0x109   : > { %726 = vmatmul.f32.gmra.mxu0 %v6653_v46  ;;  %946 = vmatmul.f32.gmra.mxu3 %v6623_v23 }
 0x10a   : > { %1058 = vmatpush.msrb.mxu1 %v6390_v18  ;;  %1269 = vmatpush.msra.mxu0 %v6514_v15  ;;  %v7873_v18 = vand.u32 4294901760, %v6514_v15  ;;  %v740_v15 = vsub.f32 %v6683_v35, %v6698_v9 }
 0x10b   : > { %1400 = vmatpush.msra.mxu2 %v7872_v2  ;;  %1464 = vmatpush.msra.mxu3 %v6485_v59 }
 0x10c   : > { %884 = vmatmul.f32.gmra.mxu2 %v6602_v55  ;;  %1060 = vmatpush.msrb.mxu1 %v6531_v48  ;;  %v6700_v48 = vand.u32 4294901760, %v664_v56 }
 0x10d   : > { %1272 = vmatpush.msra.mxu0 %v6527_v63  ;;  %1404 = vmatpush.msra.mxu2 %v7873_v18 }
 0x10e   : > { %1466 = vmatpush.msra.mxu3 %v6493_v3  ;;  %1062 = vmatpush.msrb.mxu1 %v6497_v14  ;;  %7874 = vst [vmem:[#allocation37_spill] sm:$0xff] %v6700_v48  ;;  %v7876_v14 = vand.u32 4294901760, %v6557_v37  ;;  %v6718_v63 = vsub.f32 %v664_v56, %v6700_v48 }
 0x10f   : > { %1275 = vmatpush.msra.mxu0 %v6557_v37  ;;  %1408 = vmatpush.msra.mxu2 %v7875_v40  ;;  %v6731_v37 = vand.u32 4294901760, %v740_v15 }
 0x110   : > { %1328 = vmatpush.msra.mxu1 %v6464_v22  ;;  %1468 = vmatpush.msra.mxu3 %v6508_v19  ;;  %v618_v22 = vld [vmem:[%s7760_s3 + $0x30] sm:$0x3]  ;;  %v6734_v43 = vand.u32 4294901760, %v6718_v63 }
 0x111   : > { %1278 = vmatpush.msra.mxu0 %v6575_v45  ;;  %1412 = vmatpush.msra.mxu2 %v7876_v14 }
 0x112   : > { %1330 = vmatpush.msra.mxu1 %v6450_v57  ;;  %1470 = vmatpush.msra.mxu3 %v6539_v21  ;;  %v667_v57 = vsel %vm647_vm1, %v618_v22, 0 }
 0x113   : > { %734 = vmatmul.f32.gmra.mxu0 %v6695_v41  ;;  %822 = vmatmul.f32.gmra.mxu1 %v6577_v12  ;;  %v6736_v20 = vand.u32 4294901760, %v667_v57 }
 0x114   : > { %952 = vmatmul.f32.gmra.mxu3 %v6664_v30  ;;  %1281 = vmatpush.msra.mxu0 %v6594_v49 }
 0x115   : > { %1332 = vmatpush.msra.mxu1 %v6485_v59  ;;  %1416 = vmatpush.msra.mxu2 %v1213_v26  ;;  %v6746_v59 = vsub.f32 %v667_v57, %v6736_v20 }
 0x116   : > { %1472 = vmatpush.msra.mxu3 %v6559_v54  ;;  %889 = vmatmul.f32.gmra.mxu2 %v6650_v53 }
 0x117   : > { %1334 = vmatpush.msra.mxu1 %v6493_v3  ;;  %1420 = vmatpush.msra.mxu2 %v1219_v44  ;;  %v748_v3 = vsub.f32 %v6718_v63, %v6734_v43  ;;  %v606_v44 = vmax.f32 %v6334_v27, 0.0  ;;  %v598_v27 = vmax.f32 %v6385_v10, 0.0  ;;  %v590_v10 = vmax.f32 %v562_v51, 0.0 }
 0x118   : > { %5821 = vset.pattern.permute.xlu0 %v6051_v13  ;;  %5822 = vset.pattern.permute.xlu1 %v6051_v13 }
 0x119   : > { %1336 = vmatpush.msra.mxu1 %v6508_v19  ;;  %v6752_v45 = vand.u32 4294901760, %v748_v3  ;;  %2351 = vperm.xlu0 %5821, %v6298_v8   ;;  %v6783_v28 = vand.u32 4294901760, %v606_v44  ;;  %v6792_v8 = vand.u32 4294901760, %v602_v29  ;;  %v6798_v34 = vand.u32 4294901760, %v598_v27 }
 0x11a   : > { %2355 = vperm.xlu1 %5822, %v6293_v7   ;;  %5823 = vset.pattern.permute.xlu2 %v6051_v13  ;;  %v6817_v18 = vand.u32 4294901760, %v590_v10 }
 0x11b   : > { %1338 = vmatpush.msra.mxu1 %v6539_v21  ;;  %742 = vmatmul.f32.gmra.mxu0 %v6731_v37  ;;  %v6755_v21 = vand.u32 4294901760, %v6746_v59  ;;  %v6796_v52 = vsub.f32 %v606_v44, %v6783_v28  ;;  %v6815_v56 = vsub.f32 %v598_v27, %v6798_v34 }
 0x11c   : > { %826 = vmatmul.f32.gmra.mxu1 %v6636_v36  ;;  %958 = vmatmul.f32.gmra.mxu3 %v6698_v9  ;;  %v6841_v57 = vsub.f32 %v590_v10, %v6817_v18 }
 0x11d   : > { %1340 = vmatpush.msra.mxu1 %v6559_v54  ;;  %v756_v19 = vsub.f32 %v6746_v59, %v6755_v21  ;;  %v610_v54 = vmax.f32 %v6353_v42, 0.0  ;;  %v502_v42 = vmul.f32 %v6311_v11, %v6431_v47  ;;  %2359 = vperm.xlu2 %5823, %v6285_v6   ;;  %v594_v11 = vmax.f32 %v6342_v32, 0.0 }
 0x11e   : > { %894 = vmatmul.f32.gmra.mxu2 %v6683_v35  ;;  %v6806_v32 = vsub.f32 %v602_v29, %v6792_v8  ;;  %v7799_v40 = vand.u32 4294901760, %v6796_v52  ;;  %v7797_v3 = vand.u32 4294901760, %v6815_v56 }
 0x11f   : > { %v6766_v49 = vand.u32 4294901760, %v756_v19  ;;  %v677_v26 = vsel %vm669_vm0, %v610_v54, 0  ;;  %v558_v25 = vadd.f32 %v7878_v16, %v502_v42  ;;  %v6808_v2 = vand.u32 4294901760, %v594_v11 }
 0x120   : > { %v6773_v31 = vand.u32 4294901760, %v677_v26  ;;  %v7798_v15 = vand.u32 4294901760, %v6806_v32  ;;  %v1612_v29 = vsub.f32 %v6815_v56, %v7797_v3  ;;  %v7795_v42 = vand.u32 4294901760, %v6841_v57 }
 0x121   : > { %7877 = vst [vmem:[#allocation38_spill] sm:$0xff] %v6766_v49  ;;  %v586_v7 = vmax.f32 %v558_v25, 0.0  ;;  %2371 = vperm.xlu0 %5821, %v6258_v1   ;;  %v6828_v1 = vsub.f32 %v594_v11, %v6808_v2 }
 0x122   : > { %v6787_v61 = vsub.f32 %v677_v26, %v6773_v31  ;;  %2363 = vperm.xlu1 %5822, %v6276_v5   ;;  %v1600_v5 = vsub.f32 %v6796_v52, %v7799_v40  ;;  %v1613_v11 = vand.u32 4294901760, %v1612_v29  ;;  %v1624_v25 = vsub.f32 %v6841_v57, %v7795_v42  ;;  %v7888_v42 = vld [vmem:[#allocation25_spill] sm:$0xff] }
 0x123   : > { %750 = vmatmul.f32.gmra.mxu0 %v6752_v45  ;;  %v6830_v14 = vand.u32 4294901760, %v586_v7  ;;  %v7796_v26 = vand.u32 4294901760, %v6828_v1 }
 0x124   : > { %830 = vmatmul.f32.gmra.mxu1 %v6666_v62  ;;  %964 = vmatmul.f32.gmra.mxu3 %v6734_v43  ;;  %v7800_v6 = vand.u32 4294901760, %v6787_v61  ;;  %v1601_v44 = vand.u32 4294901760, %v1600_v5  ;;  %v7880_v5 = vmov 1  }
 0x125   : > { %2367 = vperm.xlu2 %5823, %v6269_v4   ;;  %v1606_v4 = vsub.f32 %v6806_v32, %v7798_v15  ;;  %v6852_v54 = vsub.f32 %v586_v7, %v6830_v14  ;;  %v1618_v27 = vsub.f32 %v6828_v1, %v7796_v26  ;;  %v595_v26 = vmax.f32 %v7888_v42, 0.0 }
 0x126   : > { %899 = vmatmul.f32.gmra.mxu2 %v6718_v63  ;;  %v1594_v22 = vsub.f32 %v6787_v61, %v7800_v6 }
 0x127   : > { %v1607_v13 = vand.u32 4294901760, %v1606_v4  ;;  %v7794_v51 = vand.u32 4294901760, %v6852_v54  ;;  %v1619_v10 = vand.u32 4294901760, %v1618_v27  ;;  %v7881_v4 = vmov 0  }
 0x128   : > { %v1595_v19 = vand.u32 4294901760, %v1594_v22  ;;  %v1625_v22 = vand.u32 4294901760, %v1624_v25  ;;  %v7884_v25 = vld [vmem:[#allocation27_spill] sm:$0xff] }
 0x129   : > { %v1630_v7 = vsub.f32 %v6852_v54, %v7794_v51  ;;  %5825 = vset.pattern.permute.xlu0 %v7880_v5  ;;  %v7887_v51 = vld [vmem:[#allocation29_spill] sm:$0xff] }
 0x12a   : > { %2375 = vperm.xlu1 %5822, %v6253_v0   ;;  %v7882_v0 = vld [vmem:[#allocation26_spill] sm:$0xff] }
 0x12b   : > { %758 = vmatmul.f32.gmra.mxu0 %v6766_v49 }
 0x12c   : > { %834 = vmatmul.f32.gmra.mxu1 %v6700_v48  ;;  %970 = vmatmul.f32.gmra.mxu3 %v6755_v21 }
 0x12d   : > { %5824 = vset.pattern.permute.xlu2 %v7881_v4 }
 0x12e   : > { %904 = vmatmul.f32.gmra.mxu2 %v6746_v59 }
 0x133   : > { %1012 = vmatmul.f32.vlgmr.msrb.gmra.mxu0 %v6422_v38 }
 0x134   : > { %838 = vmatmul.f32.gmra.mxu1 %v6736_v20  ;;  %1224 = vmatmul.f32.vlgmr.msrb.gmra.mxu3 %v6422_v38 }
 0x135   : > { %1512 = vmatpush.msrb.mxu0 %v6773_v31  ;;  %1738 = vmatpush.msrb.mxu3 %v6773_v31 }
 0x136   : > { %1120 = vmatmul.f32.vlgmr.msrb.gmra.mxu2 %v7879_v17 }
 0x137   : > { %1514 = vmatpush.msrb.mxu0 %v6783_v28  ;;  %1673 = vmatpush.msrb.mxu2 %v6787_v61 }
 0x138   : > { %1740 = vmatpush.msrb.mxu3 %v6783_v28 }
 0x139   : > { %1516 = vmatpush.msrb.mxu0 %v6792_v8  ;;  %1676 = vmatpush.msrb.mxu2 %v6796_v52 }
 0x13a   : > { %1742 = vmatpush.msrb.mxu3 %v6792_v8 }
 0x13b   : > { %1518 = vmatpush.msrb.mxu0 %v6798_v34  ;;  %1679 = vmatpush.msrb.mxu2 %v6806_v32 }
 0x13c   : > { %1744 = vmatpush.msrb.mxu3 %v6798_v34  ;;  %1016 = vmatmul.f32.gmra.mxu0 %v6520_v50 }
 0x13d   : > { %1064 = vmatmul.f32.vlgmr.msrb.gmra.mxu1 %v6422_v38  ;;  %1228 = vmatmul.f32.gmra.mxu3 %v6520_v50 }
 0x13e   : > { %1520 = vmatpush.msrb.mxu0 %v6808_v2  ;;  %1596 = vmatpush.msrb.mxu1 %v1595_v19  ;;  %v1631_v19 = vand.u32 4294901760, %v1630_v7 }
 0x13f   : > { %1682 = vmatpush.msrb.mxu2 %v6815_v56  ;;  %1746 = vmatpush.msrb.mxu3 %v6808_v2 }
 0x140   : > { %1128 = vmatmul.f32.gmra.mxu2 %v6606_v58  ;;  %1522 = vmatpush.msrb.mxu0 %v6817_v18 }
 0x141   : > { %1602 = vmatpush.msrb.mxu1 %v1601_v44  ;;  %1685 = vmatpush.msrb.mxu2 %v6828_v1  ;;  %v611_v44 = vmax.f32 %v7882_v0, 0.0 }
 0x142   : > { %1748 = vmatpush.msrb.mxu3 %v6817_v18  ;;  %1524 = vmatpush.msrb.mxu0 %v6830_v14 }
 0x143   : > { %1608 = vmatpush.msrb.mxu1 %v1607_v13  ;;  %1688 = vmatpush.msrb.mxu2 %v6841_v57  ;;  %v680_v29 = vsel %vm669_vm0, %v611_v44, 0  ;;  %v7883_v13 = vld [vmem:[#allocation24_spill] sm:$0xff] }
 0x144   : > { %1750 = vmatpush.msrb.mxu3 %v6830_v14  ;;  %1020 = vmatmul.f32.gmra.mxu0 %v6577_v12  ;;  %v607_v27 = vmax.f32 %v7883_v13, 0.0 }
 0x145   : > { %1614 = vmatpush.msrb.mxu1 %v1613_v11  ;;  %1691 = vmatpush.msrb.mxu2 %v6852_v54  ;;  %v6899_v11 = vand.u32 4294901760, %v680_v29 }
 0x146   : > { %1068 = vmatmul.f32.gmra.mxu1 %v6520_v50  ;;  %1232 = vmatmul.f32.gmra.mxu3 %v6577_v12  ;;  %v6904_v7 = vand.u32 4294901760, %v607_v27 }
 0x147   : > { %1620 = vmatpush.msrb.mxu1 %v1619_v10  ;;  %v603_v10 = vmax.f32 %v7884_v25, 0.0  ;;  %v6911_v44 = vsub.f32 %v680_v29, %v6899_v11  ;;  %v563_v25 = vadd.f32 %v6502_v24, %v7887_v51  ;;  %v6931_v24 = vand.u32 4294901760, %v595_v26 }
 0x148   : > { %1136 = vmatmul.f32.gmra.mxu2 %v6653_v46 }
 0x149   : > { %1626 = vmatpush.msrb.mxu1 %v1625_v22  ;;  %v7885_v22 = vld [vmem:[#allocation28_spill] sm:$0xff]  ;;  %v6913_v13 = vand.u32 4294901760, %v603_v10  ;;  %v591_v29 = vmax.f32 %v563_v25, 0.0  ;;  %v6945_v25 = vsub.f32 %v595_v26, %v6931_v24 }
 0x14a   : > { %v599_v5 = vmax.f32 %v7885_v22, 0.0  ;;  %v6922_v22 = vsub.f32 %v607_v27, %v6904_v7 }
 0x14b   : > { %1632 = vmatpush.msrb.mxu1 %v1631_v19  ;;  %v7886_v19 = vld [vmem:[#allocation23_spill] sm:$0xff]  ;;  %v6938_v27 = vand.u32 4294901760, %v591_v29 }
 0x14c   : > { %1024 = vmatmul.f32.gmra.mxu0 %v6636_v36  ;;  %v503_v0 = vmul.f32 %v7886_v19, %v6431_v47  ;;  %v6918_v3 = vand.u32 4294901760, %v599_v5  ;;  %v6926_v47 = vsub.f32 %v603_v10, %v6913_v13  ;;  %v7801_v19 = vand.u32 4294901760, %v6911_v44 }
 0x14d   : > { %v7804_v51 = vand.u32 4294901760, %v6922_v22  ;;  %v6955_v6 = vsub.f32 %v591_v29, %v6938_v27 }
 0x14e   : > { %1072 = vmatmul.f32.gmra.mxu1 %v6577_v12  ;;  %1236 = vmatmul.f32.gmra.mxu3 %v6636_v36  ;;  %v559_v15 = vadd.f32 %v7878_v16, %v503_v0  ;;  %v6934_v42 = vsub.f32 %v599_v5, %v6918_v3  ;;  %v2004_v10 = vsub.f32 %v6911_v44, %v7801_v19  ;;  %v7889_v19 = vand.u32 4294901760, %v6787_v61 }
 0x14f   : > { %v7890_v26 = vand.u32 4294901760, %v6926_v47  ;;  %v7891_v5 = vand.u32 4294901760, %v6796_v52  ;;  %v7805_v52 = vand.u32 4294901760, %v6955_v6 }
 0x150   : > { %1144 = vmatmul.f32.gmra.mxu2 %v6695_v41  ;;  %v587_v16 = vmax.f32 %v559_v15, 0.0  ;;  %v2010_v15 = vsub.f32 %v6922_v22, %v7804_v51  ;;  %v2005_v0 = vand.u32 4294901760, %v2004_v10  ;;  %v7892_v61 = vand.u32 4294901760, %v6934_v42 }
 0x151   : > { %v7807_v10 = vand.u32 4294901760, %v6945_v25 }
 0x152   : > { %v6947_v40 = vand.u32 4294901760, %v587_v16  ;;  %v2011_v29 = vand.u32 4294901760, %v2010_v15 }
 0x154   : > { %1028 = vmatmul.f32.gmra.mxu0 %v6666_v62  ;;  %v6965_v51 = vsub.f32 %v587_v16, %v6947_v40 }
 0x156   : > { %1076 = vmatmul.f32.gmra.mxu1 %v6636_v36  ;;  %1240 = vmatmul.f32.gmra.mxu3 %v6666_v62 }
 0x158   : > { %1152 = vmatmul.f32.gmra.mxu2 %v6731_v37 }
 0x15c   : > { %1032 = vmatmul.f32.gmra.mxu0 %v6700_v48 }
 0x15e   : > { %1080 = vmatmul.f32.gmra.mxu1 %v6666_v62  ;;  %1244 = vmatmul.f32.gmra.mxu3 %v6700_v48 }
 0x160   : > { %1160 = vmatmul.f32.gmra.mxu2 %v6752_v45 }
 0x164   : > { %1036 = vmatmul.f32.gmra.mxu0 %v6736_v20 }
 0x166   : > { %1084 = vmatmul.f32.gmra.mxu1 %v6700_v48  ;;  %1248 = vmatmul.f32.gmra.mxu3 %v6736_v20 }
 0x168   : > { %1168 = vmatmul.f32.gmra.mxu2 %v6766_v49  ;;  %v2016_v49 = vsub.f32 %v6926_v47, %v7890_v26  ;;  %v6977_v26 = vld [vmem:[%s7761_s4] sm:$0xff] }
 0x169   : > { %7893 = vst [vmem:[#allocation30_spill] sm:$0xff] %v6977_v26  ;;  %2486 = vperm.xlu0 %5825, %v6977_v26   ;;  %2498 = vperm.xlu1 %5822, %v6977_v26  }
 0x16a   : > { %v2017_v16 = vand.u32 4294901760, %v2016_v49  ;;  %v7895_v49 = vand.u32 4294901760, %v6815_v56  ;;  %2469 = vperm.xlu2 %5824, %v6977_v26  }
 0x16c   : > { %1284 = vmatmul.f32.vlgmr.msra.gmra.mxu0 %v6455_v60 }
 0x16d   : > { %1806 = vmatpush.msra.mxu0 %v7889_v19  ;;  %v2022_v19 = vsub.f32 %v6934_v42, %v7892_v61  ;;  %v2028_v61 = vsub.f32 %v6945_v25, %v7807_v10 }
 0x16e   : > { %1088 = vmatmul.f32.gmra.mxu1 %v6736_v20  ;;  %1474 = vmatmul.f32.vlgmr.msra.gmra.mxu3 %v6422_v38 }
 0x16f   : > { %2006 = vmatpush.msra.mxu3 %v2005_v0  ;;  %1810 = vmatpush.msra.mxu0 %v7891_v5  ;;  %v7894_v0 = vand.u32 4294901760, %v6806_v32  ;;  %v2023_v5 = vand.u32 4294901760, %v2022_v19  ;;  %v2034_v32 = vsub.f32 %v6955_v6, %v7805_v52  ;;  %v7896_v19 = vld [vmem:[#allocation31_spill] sm:$0xff]  ;;  %v2029_v56 = vand.u32 4294901760, %v2028_v61 }
 0x170   : > { %1422 = vmatmul.f32.vlgmr.msra.gmra.mxu2 %v6422_v38  ;;  %v7898_v52 = vand.u32 4294901760, %v6841_v57 }
 0x171   : > { %1922 = vmatpush.msra.mxu2 %v6899_v11  ;;  %2012 = vmatpush.msra.mxu3 %v2011_v29  ;;  %v6983_v15 = vpop.f32.mrf.mxu0  ;;  %v7806_v29 = vand.u32 4294901760, %v6965_v51 }
 0x172   : > { %1814 = vmatpush.msra.mxu0 %v7894_v0  ;;  %5826 = vset.pattern.permute.xlu1 %v7881_v4 }
 0x173   : > { %1924 = vmatpush.msra.mxu2 %v6904_v7  ;;  %2018 = vmatpush.msra.mxu3 %v2017_v16  ;;  %v7897_v16 = vand.u32 4294901760, %v6828_v1  ;;  %v2040_v0 = vsub.f32 %v6965_v51, %v7806_v29 }
 0x174   : > { %1818 = vmatpush.msra.mxu0 %v7895_v49 }
 0x175   : > { %1926 = vmatpush.msra.mxu2 %v6913_v13  ;;  %2024 = vmatpush.msra.mxu3 %v2023_v5  ;;  %v2035_v5 = vand.u32 4294901760, %v2034_v32  ;;  %v2041_v1 = vand.u32 4294901760, %v2040_v0 }
 0x176   : > { %1289 = vmatmul.f32.gmra.mxu0 %v6534_v39  ;;  %1344 = vmatmul.f32.vlgmr.msra.gmra.mxu1 %v7896_v19 }
 0x177   : > { %1478 = vmatmul.f32.gmra.mxu3 %v6520_v50  ;;  %1822 = vmatpush.msra.mxu0 %v7897_v16 }
 0x178   : > { %1870 = vmatpush.msra.mxu1 %v6773_v31  ;;  %1928 = vmatpush.msra.mxu2 %v6918_v3  ;;  %v7009_v49 = vpop.f32.mrf.mxu3  ;;  %v7899_v31 = vand.u32 4294901760, %v6852_v54  ;;  %v7049_v54 = vpop.permute.xlu1 %620 }
 0x179   : > { %2030 = vmatpush.msra.mxu3 %v2029_v56  ;;  %1426 = vmatmul.f32.gmra.mxu2 %v6520_v50 }
 0x17a   : > { %1826 = vmatpush.msra.mxu0 %v7898_v52  ;;  %1872 = vmatpush.msra.mxu1 %v6783_v28  ;;  %v7015_v61 = vpop.f32.mrf.mxu2  ;;  %v7020_v16 = vpop.f32.mrf.mxu0 }
 0x17b   : > { %1930 = vmatpush.msra.mxu2 %v6931_v24  ;;  %2036 = vmatpush.msra.mxu3 %v2035_v5  ;;  %v7022_v32 = vpop.f32.mrf.mxu1 }
 0x17c   : > { %1830 = vmatpush.msra.mxu0 %v7899_v31  ;;  %1874 = vmatpush.msra.mxu1 %v6792_v8  ;;  %v7900_v8 = vmov 3  }
 0x17d   : > { %1932 = vmatpush.msra.mxu2 %v6938_v27  ;;  %2042 = vmatpush.msra.mxu3 %v2041_v1 }
 0x17e   : > { %1876 = vmatpush.msra.mxu1 %v6798_v34  ;;  %1294 = vmatmul.f32.gmra.mxu0 %v6602_v55 }
 0x17f   : > { %1934 = vmatpush.msra.mxu2 %v6947_v40  ;;  %1350 = vmatmul.f32.gmra.mxu1 %v6554_v33 }
 0x180   : > { %1482 = vmatmul.f32.gmra.mxu3 %v6577_v12  ;;  %1878 = vmatpush.msra.mxu1 %v6808_v2  ;;  %v7056_v31 = vpop.permute.xlu1 %632 }
 0x181   : > { %1430 = vmatmul.f32.gmra.mxu2 %v6577_v12  ;;  %v7035_v28 = vpop.f32.mrf.mxu3  ;;  %5828 = vset.pattern.permute.xlu0 %v7900_v8  ;;  %7902 = vst [vmem:[#allocation26_spill] sm:$0xff] %v7056_v31 }
 0x182   : > { %1880 = vmatpush.msra.mxu1 %v6817_v18  ;;  %v7047_v18 = vpop.permute.xlu0 %628 }
 0x183   : > { %v7039_v34 = vpop.f32.mrf.mxu2  ;;  %7901 = vst [vmem:[#allocation32_spill] sm:$0xff] %v7047_v18 }
 0x184   : > { %1882 = vmatpush.msra.mxu1 %v6830_v14  ;;  %v7042_v2 = vpop.f32.mrf.mxu1 }
 0x186   : > { %1299 = vmatmul.f32.gmra.mxu0 %v6650_v53  ;;  %v727_v57 = vpop.f32.mrf.mxu0 }
 0x187   : > { %1356 = vmatmul.f32.gmra.mxu1 %v6623_v23  ;;  %v728_v4 = vadd.f32 %v727_v57, %v7047_v18 }
 0x188   : > { %1486 = vmatmul.f32.gmra.mxu3 %v6636_v36 }
 0x189   : > { %1434 = vmatmul.f32.gmra.mxu2 %v6636_v36 }
 0x18c   : > { %v947_v14 = vpop.f32.mrf.mxu3 }
 0x18e   : > { %1304 = vmatmul.f32.gmra.mxu0 %v6683_v35 }
 0x18f   : > { %1362 = vmatmul.f32.gmra.mxu1 %v6664_v30  ;;  %v885_v52 = vpop.f32.mrf.mxu2 }
 0x190   : > { %1490 = vmatmul.f32.gmra.mxu3 %v6666_v62  ;;  %v735_v56 = vpop.f32.mrf.mxu0  ;;  %v823_v0 = vpop.f32.mrf.mxu1 }
 0x191   : > { %1438 = vmatmul.f32.gmra.mxu2 %v6666_v62  ;;  %v824_v5 = vadd.f32 %v823_v0, %v728_v4  ;;  %v736_v57 = vadd.f32 %v735_v56, %v7056_v31 }
 0x193   : > { %v886_v1 = vadd.f32 %v885_v52, %v824_v5 }
 0x195   : > { %v7058_v29 = vadd.f32 %v947_v14, %v886_v1 }
 0x196   : > { %1309 = vmatmul.f32.gmra.mxu0 %v6718_v63 }
 0x197   : > { %1368 = vmatmul.f32.gmra.mxu1 %v6698_v9  ;;  %v953_v10 = vpop.f32.mrf.mxu3 }
 0x198   : > { %1494 = vmatmul.f32.gmra.mxu3 %v6700_v48  ;;  %v7064_v26 = vpop.f32.mrf.mxu0 }
 0x199   : > { %1442 = vmatmul.f32.gmra.mxu2 %v6700_v48  ;;  %v827_v8 = vpop.f32.mrf.mxu1  ;;  %v890_v4 = vpop.f32.mrf.mxu2 }
 0x19a   : > { %v828_v52 = vadd.f32 %v827_v8, %v736_v57 }
 0x19c   : > { %v891_v0 = vadd.f32 %v890_v4, %v828_v52  ;;  %v7903_v52 = vand.u32 4294901760, %v6911_v44 }
 0x19e   : > { %v7067_v5 = vadd.f32 %v953_v10, %v891_v0  ;;  %1314 = vmatmul.f32.gmra.mxu0 %v6746_v59  ;;  %v7904_v0 = vand.u32 4294901760, %v6922_v22 }
 0x19f   : > { %1374 = vmatmul.f32.gmra.mxu1 %v6734_v43  ;;  %v7071_v14 = vpop.f32.mrf.mxu3 }
 0x1a0   : > { %1498 = vmatmul.f32.gmra.mxu3 %v6736_v20  ;;  %v7074_v56 = vpop.f32.mrf.mxu0 }
 0x1a1   : > { %1446 = vmatmul.f32.gmra.mxu2 %v6736_v20  ;;  %v7077_v1 = vpop.f32.mrf.mxu1  ;;  %v7079_v48 = vpop.f32.mrf.mxu2 }
 0x1a6   : > { %1530 = vmatmul.f32.vlgmr.msrb.gmra.mxu0 %v7879_v17 }
 0x1a7   : > { %1380 = vmatmul.f32.gmra.mxu1 %v6755_v21  ;;  %2083 = vmatpush.msrb.mxu0 %v6911_v44  ;;  %v7084_v10 = vpop.f32.mrf.mxu3 }
 0x1a8   : > { %1754 = vmatmul.f32.vlgmr.msrb.gmra.mxu3 %v7896_v19  ;;  %v7087_v8 = vpop.f32.mrf.mxu0  ;;  %v7905_v19 = vand.u32 4294901760, %v6926_v47 }
 0x1a9   : > { %2280 = vmatpush.msrb.mxu3 %v6899_v11  ;;  %1694 = vmatmul.f32.vlgmr.msrb.gmra.mxu2 %v6455_v60  ;;  %v7091_v57 = vpop.f32.mrf.mxu1  ;;  %v7093_v4 = vpop.f32.mrf.mxu2 }
 0x1aa   : > { %2086 = vmatpush.msrb.mxu0 %v6922_v22  ;;  %2216 = vmatpush.msrb.mxu2 %v7903_v52  ;;  %v7906_v22 = vand.u32 4294901760, %v6934_v42 }
 0x1ab   : > { %2282 = vmatpush.msrb.mxu3 %v6904_v7 }
 0x1ac   : > { %2089 = vmatpush.msrb.mxu0 %v6926_v47  ;;  %2220 = vmatpush.msrb.mxu2 %v7904_v0 }
 0x1ad   : > { %2284 = vmatpush.msrb.mxu3 %v6913_v13 }
 0x1ae   : > { %2092 = vmatpush.msrb.mxu0 %v6934_v42  ;;  %2224 = vmatpush.msrb.mxu2 %v7905_v19  ;;  %v7907_v19 = vand.u32 4294901760, %v6945_v25  ;;  %v7131_v42 = vpop.permute.xlu2 %624 }
 0x1af   : > { %2286 = vmatpush.msrb.mxu3 %v6918_v3  ;;  %1538 = vmatmul.f32.gmra.mxu0 %v6606_v58  ;;  %v7108_v44 = vpop.f32.mrf.mxu3  ;;  %7909 = vst [vmem:[#allocation24_spill] sm:$0xff] %v7131_v42 }
 0x1b0   : > { %1634 = vmatmul.f32.vlgmr.msrb.gmra.mxu1 %v6422_v38  ;;  %2095 = vmatpush.msrb.mxu0 %v6945_v25  ;;  %v1013_v52 = vpop.f32.mrf.mxu0  ;;  %v7910_v25 = vand.u32 4294901760, %v6965_v51 }
 0x1b1   : > { %2148 = vmatpush.msrb.mxu1 %v6899_v11  ;;  %2228 = vmatpush.msrb.mxu2 %v7906_v22  ;;  %v7115_v0 = vpop.f32.mrf.mxu1  ;;  %v7117_v47 = vpop.f32.mrf.mxu2  ;;  %v7908_v11 = vand.u32 4294901760, %v6955_v6 }
 0x1b2   : > { %2288 = vmatpush.msrb.mxu3 %v6931_v24  ;;  %1699 = vmatmul.f32.gmra.mxu2 %v6534_v39 }
 0x1b3   : > { %2098 = vmatpush.msrb.mxu0 %v6955_v6  ;;  %2150 = vmatpush.msrb.mxu1 %v6904_v7  ;;  %v720_v6 = vadd.f32 %v7020_v16, %v7131_v42 }
 0x1b4   : > { %2232 = vmatpush.msrb.mxu2 %v7907_v19  ;;  %2290 = vmatpush.msrb.mxu3 %v6938_v27 }
 0x1b5   : > { %1760 = vmatmul.f32.gmra.mxu3 %v6554_v33  ;;  %2101 = vmatpush.msrb.mxu0 %v6965_v51 }
 0x1b6   : > { %2152 = vmatpush.msrb.mxu1 %v6913_v13  ;;  %2236 = vmatpush.msrb.mxu2 %v7908_v11  ;;  %v712_v11 = vadd.f32 %v6983_v15, %v7049_v54  ;;  %v7155_v16 = vpop.permute.xlu2 %636 }
 0x1b7   : > { %2292 = vmatpush.msrb.mxu3 %v6947_v40  ;;  %1546 = vmatmul.f32.gmra.mxu0 %v6653_v46  ;;  %v7135_v7 = vpop.f32.mrf.mxu3 }
 0x1b8   : > { %2154 = vmatpush.msrb.mxu1 %v6918_v3  ;;  %2240 = vmatpush.msrb.mxu2 %v7910_v25  ;;  %v820_v3 = vadd.f32 %v7042_v2, %v720_v6  ;;  %v816_v51 = vadd.f32 %v7022_v32, %v712_v11  ;;  %v7162_v6 = vpop.permute.xlu1 %640 }
 0x1b9   : > { %1638 = vmatmul.f32.gmra.mxu1 %v6520_v50  ;;  %v1017_v22 = vpop.f32.mrf.mxu0  ;;  %v7141_v13 = vpop.f32.mrf.mxu2 }
 0x1ba   : > { %2156 = vmatpush.msrb.mxu1 %v6931_v24  ;;  %1704 = vmatmul.f32.gmra.mxu2 %v6602_v55  ;;  %v1065_v19 = vpop.f32.mrf.mxu1  ;;  %v881_v15 = vadd.f32 %v7039_v34, %v820_v3  ;;  %v876_v2 = vadd.f32 %v7015_v61, %v816_v51 }
 0x1bc   : > { %2158 = vmatpush.msrb.mxu1 %v6938_v27  ;;  %v942_v32 = vadd.f32 %v7035_v28, %v881_v15  ;;  %v936_v34 = vadd.f32 %v7009_v49, %v876_v2 }
 0x1bd   : > { %1766 = vmatmul.f32.gmra.mxu3 %v6623_v23 }
 0x1be   : > { %2160 = vmatpush.msrb.mxu1 %v6947_v40  ;;  %v7170_v3 = vpop.permute.xlu2 %644 }
 0x1bf   : > { %1554 = vmatmul.f32.gmra.mxu0 %v6695_v41 }
 0x1c0   : > { %v1229_v24 = vpop.f32.mrf.mxu3  ;;  %v7176_v49 = vpop.permute.xlu1 %2355 }
 0x1c1   : > { %1642 = vmatmul.f32.gmra.mxu1 %v6577_v12  ;;  %v1021_v25 = vpop.f32.mrf.mxu0 }
 0x1c2   : > { %1709 = vmatmul.f32.gmra.mxu2 %v6650_v53  ;;  %v1018_v53 = vadd.f32 %v1017_v22, %v942_v32 }
 0x1c3   : > { %v1069_v27 = vpop.f32.mrf.mxu1  ;;  %v1129_v23 = vpop.f32.mrf.mxu2 }
 0x1c4   : > { %v1130_v40 = vadd.f32 %v1129_v23, %v7131_v42  ;;  %v1014_v23 = vadd.f32 %v1013_v52, %v936_v34  ;;  %v1022_v42 = vadd.f32 %v1021_v25, %v7058_v29  ;;  %v1070_v33 = vadd.f32 %v1069_v27, %v1018_v53  ;;  %v7182_v29 = vpop.permute.xlu0 %2351 }
 0x1c5   : > { %1772 = vmatmul.f32.gmra.mxu3 %v6664_v30 }
 0x1c6   : > { %v7166_v11 = vadd.f32 %v1229_v24, %v1130_v40  ;;  %v1066_v15 = vadd.f32 %v1065_v19, %v1014_v23  ;;  %v2326_v22 = vmax.f32 %v1070_v33, 0.0  ;;  %v7184_v25 = vpop.permute.xlu2 %2359  ;;  %v744_v33 = vadd.f32 %v7064_v26, %v7155_v16 }
 0x1c7   : > { %1562 = vmatmul.f32.gmra.mxu0 %v6731_v37 }
 0x1c8   : > { %v2322_v52 = vmax.f32 %v1066_v15, 0.0  ;;  %v2382_v27 = vmul.f32 %v7176_v49, %v2326_v22  ;;  %v752_v15 = vadd.f32 %v7074_v56, %v7162_v6  ;;  %v832_v26 = vadd.f32 %v7077_v1, %v744_v33 }
 0x1c9   : > { %1646 = vmatmul.f32.gmra.mxu1 %v6636_v36  ;;  %v1025_v61 = vpop.f32.mrf.mxu0  ;;  %v1233_v51 = vpop.f32.mrf.mxu3  ;;  %v760_v1 = vadd.f32 %v7087_v8, %v7170_v3 }
 0x1ca   : > { %1714 = vmatmul.f32.gmra.mxu2 %v6683_v35  ;;  %v1026_v32 = vadd.f32 %v1025_v61, %v7067_v5  ;;  %v7198_v5 = vpop.permute.xlu1 %2363 }
 0x1cb   : > { %v1073_v28 = vpop.f32.mrf.mxu1  ;;  %v1137_v24 = vpop.f32.mrf.mxu2 }
 0x1cc   : > { %v1074_v40 = vadd.f32 %v1073_v28, %v1022_v42  ;;  %v1138_v30 = vadd.f32 %v1137_v24, %v7047_v18  ;;  %v7911_v18 = vld [vmem:[#allocation38_spill] sm:$0xff] }
 0x1cd   : > { %1778 = vmatmul.f32.gmra.mxu3 %v6698_v9 }
 0x1ce   : > { %v7179_v2 = vadd.f32 %v1233_v51, %v1138_v30  ;;  %v2330_v53 = vmax.f32 %v1074_v40, 0.0  ;;  %v2378_v51 = vmul.f32 %v7182_v29, %v2322_v52 }
 0x1cf   : > { %1570 = vmatmul.f32.gmra.mxu0 %v6752_v45 }
 0x1d0   : > { %v2386_v23 = vmul.f32 %v7184_v25, %v2330_v53  ;;  %v2406_v61 = vadd.f32 %v2382_v27, %v2378_v51 }
 0x1d1   : > { %1650 = vmatmul.f32.gmra.mxu1 %v6666_v62  ;;  %v1029_v42 = vpop.f32.mrf.mxu0  ;;  %v1237_v19 = vpop.f32.mrf.mxu3 }
 0x1d2   : > { %1719 = vmatmul.f32.gmra.mxu2 %v6718_v63  ;;  %v2407_v52 = vadd.f32 %v2406_v61, %v2386_v23  ;;  %v840_v23 = vadd.f32 %v7115_v0, %v760_v1 }
 0x1d3   : > { %v1077_v30 = vpop.f32.mrf.mxu1  ;;  %v1145_v34 = vpop.f32.mrf.mxu2 }
 0x1d4   : > { %v1078_v28 = vadd.f32 %v1077_v30, %v1026_v32  ;;  %v1146_v24 = vadd.f32 %v1145_v34, %v7056_v31  ;;  %v836_v32 = vadd.f32 %v7091_v57, %v752_v15  ;;  %v7912_v30 = vld [vmem:[#allocation37_spill] sm:$0xff] }
 0x1d5   : > { %1784 = vmatmul.f32.gmra.mxu3 %v6734_v43 }
 0x1d6   : > { %v2334_v40 = vmax.f32 %v1078_v28, 0.0  ;;  %v7200_v22 = vadd.f32 %v1237_v19, %v1146_v24  ;;  %v896_v19 = vadd.f32 %v7079_v48, %v832_v26  ;;  %v901_v33 = vadd.f32 %v7093_v4, %v836_v32 }
 0x1d7   : > { %1578 = vmatmul.f32.gmra.mxu0 %v7911_v18 }
 0x1d8   : > { %v2390_v53 = vmul.f32 %v7198_v5, %v2334_v40  ;;  %v960_v57 = vadd.f32 %v7071_v14, %v896_v19  ;;  %v966_v28 = vadd.f32 %v7084_v10, %v901_v33  ;;  %v906_v14 = vadd.f32 %v7117_v47, %v840_v23 }
 0x1d9   : > { %1654 = vmatmul.f32.gmra.mxu1 %v7912_v30  ;;  %v1033_v56 = vpop.f32.mrf.mxu0  ;;  %v7207_v34 = vpop.f32.mrf.mxu3 }
 0x1da   : > { %v2408_v31 = vadd.f32 %v2407_v52, %v2390_v53  ;;  %1724 = vmatmul.f32.gmra.mxu2 %v6746_v59  ;;  %v1030_v24 = vadd.f32 %v1029_v42, %v960_v57  ;;  %v1034_v8 = vadd.f32 %v1033_v56, %v966_v28  ;;  %v972_v10 = vadd.f32 %v7108_v44, %v906_v14  ;;  %v7231_v42 = vpop.permute.xlu2 %2367  ;;  %v7236_v56 = vpop.permute.xlu0 %2371 }
 0x1db   : > { %v1081_v27 = vpop.f32.mrf.mxu1  ;;  %v7211_v51 = vpop.f32.mrf.mxu2  ;;  %v1122_v44 = vadd.f32 %v7141_v13, %v7049_v54 }
 0x1dc   : > { %v1082_v4 = vadd.f32 %v1081_v27, %v1030_v24  ;;  %v7246_v57 = vpop.permute.xlu1 %2375 }
 0x1dd   : > { %1790 = vmatmul.f32.gmra.mxu3 %v6755_v21  ;;  %v1226_v24 = vadd.f32 %v7135_v7, %v1122_v44 }
 0x1de   : > { %v2338_v26 = vmax.f32 %v1082_v4, 0.0 }
 0x1df   : > { %1832 = vmatmul.f32.vlgmr.msra.gmra.mxu0 %v6422_v38 }
 0x1e0   : > { %v2394_v47 = vmul.f32 %v7231_v42, %v2338_v26 }
 0x1e1   : > { %1658 = vmatmul.f32.gmra.mxu1 %v6736_v20  ;;  %v1037_v48 = vpop.f32.mrf.mxu0  ;;  %v7222_v15 = vpop.f32.mrf.mxu3 }
 0x1e2   : > { %1940 = vmatmul.f32.vlgmr.msra.gmra.mxu2 %v7879_v17  ;;  %v1038_v32 = vadd.f32 %v1037_v48, %v972_v10  ;;  %v2409_v28 = vadd.f32 %v2408_v31, %v2394_v47 }
 0x1e3   : > { %v1085_v61 = vpop.f32.mrf.mxu1  ;;  %v7225_v40 = vpop.f32.mrf.mxu2 }
 0x1e4   : > { %v1086_v0 = vadd.f32 %v1085_v61, %v1034_v8 }
 0x1e5   : > { %2044 = vmatmul.f32.vlgmr.msra.gmra.mxu3 %v6422_v38 }
 0x1e6   : > { %v2342_v52 = vmax.f32 %v1086_v0, 0.0 }
 0x1e7   : > { %1836 = vmatmul.f32.gmra.mxu0 %v6520_v50 }
 0x1e8   : > { %v2398_v33 = vmul.f32 %v7236_v56, %v2342_v52 }
 0x1e9   : > { %1884 = vmatmul.f32.vlgmr.msra.gmra.mxu1 %v6422_v38  ;;  %v1285_v17 = vpop.f32.mrf.mxu0  ;;  %v7234_v53 = vpop.f32.mrf.mxu3 }
 0x1ea   : > { %1948 = vmatmul.f32.gmra.mxu2 %v6606_v58  ;;  %v2410_v48 = vadd.f32 %v2409_v28, %v2398_v33  ;;  %v1286_v4 = vadd.f32 %v1285_v17, %v1226_v24  ;;  %v7260_v17 = vld [vmem:[%s380_s21] sm:$0xf] }
 0x1eb   : > { %v1089_v19 = vpop.f32.mrf.mxu1  ;;  %v7240_v27 = vpop.f32.mrf.mxu2 }
 0x1ec   : > { %v1090_v1 = vadd.f32 %v1089_v19, %v1038_v32 }
 0x1ed   : > { %2048 = vmatmul.f32.gmra.mxu3 %v6520_v50 }
 0x1ee   : > { %v2346_v23 = vmax.f32 %v1090_v1, 0.0 }
 0x1ef   : > { %1840 = vmatmul.f32.gmra.mxu0 %v6577_v12 }
 0x1f0   : > { %v2402_v58 = vmul.f32 %v7246_v57, %v2346_v23 }
 0x1f1   : > { %1888 = vmatmul.f32.gmra.mxu1 %v6520_v50  ;;  %v1475_v8 = vpop.f32.mrf.mxu3 }
 0x1f2   : > { %v2411_v13 = vsel %vm669_vm0, %v2402_v58, 0.0  ;;  %1956 = vmatmul.f32.gmra.mxu2 %v6653_v46  ;;  %v2473_v58 = vperm.slane %v7260_v17, 0 }
 0x1f3   : > { %v2412_v61 = vadd.f32 %v2411_v13, %v2410_v48  ;;  %v1290_v14 = vpop.f32.mrf.mxu0  ;;  %v1345_v0 = vpop.f32.mrf.mxu1 }
 0x1f4   : > { %v1423_v31 = vpop.f32.mrf.mxu2  ;;  %v1346_v10 = vadd.f32 %v1345_v0, %v1286_v4  ;;  %v1291_v47 = vadd.f32 %v1290_v14, %v7166_v11  ;;  %v7265_v48 = vpop.permute.xlu2 %2469 }
 0x1f5   : > { %v2413_v26 = vrot.slane %v2412_v61, 4  ;;  %2052 = vmatmul.f32.gmra.mxu3 %v6577_v12  ;;  %v7270_v11 = vpop.permute.xlu0 %2486 }
 0x1f6   : > { %v1424_v52 = vadd.f32 %v1423_v31, %v1346_v10  ;;  %v7276_v31 = vpop.permute.xlu1 %2498 }
 0x1f7   : > { %v2414_v7 = vadd.f32 %v2413_v26, %v2412_v61  ;;  %1844 = vmatmul.f32.gmra.mxu0 %v6636_v36 }
 0x1f8   : > { %v1476_v23 = vadd.f32 %v1475_v8, %v1424_v52  ;;  %v2481_v8 = vmul.f32 %v2473_v58, %v7265_v48 }
 0x1f9   : > { %1892 = vmatmul.f32.gmra.mxu1 %v6577_v12  ;;  %v2415_v32 = vrot.slane %v2414_v7, 2 }
 0x1fa   : > { %1964 = vmatmul.f32.gmra.mxu2 %v6695_v41  ;;  %v1479_v46 = vpop.f32.mrf.mxu3  ;;  %v7267_v41 = vstv %s2458_s11  ;;  %v2323_v61 = vmax.f32 %v1476_v23, 0.0  ;;  %s443_s11 = scalar_lea.vmem [#allocation10], %s6228_s20 }
 0x1fb   : > { %v1295_v19 = vpop.f32.mrf.mxu0  ;;  %v2416_v1 = vadd.f32 %v2415_v32, %v2414_v7  ;;  %s5592_s21 = sshll.u32 %s443_s11, 4  ;;  %s5593_s21 = int_to_ptr.vmem [resolvable:$true] %s5592_s21 }
 0x1fc   : > { %v1351_v44 = vpop.f32.mrf.mxu1  ;;  %v1427_v33 = vpop.f32.mrf.mxu2  ;;  %v1296_v26 = vadd.f32 %v1295_v19, %v7179_v2 }
 0x1fd   : > { %2056 = vmatmul.f32.gmra.mxu3 %v6636_v36  ;;  %v1352_v28 = vadd.f32 %v1351_v44, %v1291_v47  ;;  %v2417_v24 = vrot.slane %v2416_v1, 1 }
 0x1ff   : > { %v1428_v13 = vadd.f32 %v1427_v33, %v1352_v28  ;;  %1848 = vmatmul.f32.gmra.mxu0 %v6666_v62  ;;  %v2418_v4 = vadd.f32 %v2417_v24, %v2416_v1 }
 0x201   : > { %v1480_v14 = vadd.f32 %v1479_v46, %v1428_v13  ;;  %1896 = vmatmul.f32.gmra.mxu1 %v6636_v36  ;;  %v2460_v0 = vadd.f32 %v7267_v41, %v2418_v4  ;;  %v2379_v46 = vmul.f32 %v7182_v29, %v2323_v61 }
 0x202   : > { %1972 = vmatmul.f32.gmra.mxu2 %v6731_v37 }
 0x203   : > { %v2327_v10 = vmax.f32 %v1480_v14, 0.0  ;;  %v2489_v7 = vmul.f32 %v7270_v11, %v2460_v0  ;;  %v1300_v52 = vpop.f32.mrf.mxu0  ;;  %v1483_v32 = vpop.f32.mrf.mxu3 }
 0x204   : > { %v1357_v47 = vpop.f32.mrf.mxu1  ;;  %v1431_v1 = vpop.f32.mrf.mxu2  ;;  %v1301_v24 = vadd.f32 %v1300_v52, %v7200_v22 }
 0x205   : > { %v2383_v44 = vmul.f32 %v7176_v49, %v2327_v10  ;;  %v2493_v33 = vadd.f32 %v2489_v7, %v2481_v8  ;;  %2060 = vmatmul.f32.gmra.mxu3 %v6666_v62  ;;  %v1358_v23 = vadd.f32 %v1357_v47, %v1296_v26 }
 0x207   : > { %v2419_v37 = vadd.f32 %v2383_v44, %v2379_v46  ;;  %v1432_v28 = vadd.f32 %v1431_v1, %v1358_v23  ;;  %v2501_v58 = vadd.f32 %v7276_v31, %v2493_v33  ;;  %1852 = vmatmul.f32.gmra.mxu0 %v7912_v30 }
 0x209   : > { %v1484_v2 = vadd.f32 %v1483_v32, %v1432_v28  ;;  %v2505_v19 = vmul.f32 0.5, %v2501_v58  ;;  %1900 = vmatmul.f32.gmra.mxu1 %v6666_v62  ;;  %v1162_v28 = vadd.f32 %v7225_v40, %v7162_v6 }
 0x20a   : > { %1980 = vmatmul.f32.gmra.mxu2 %v6752_v45  ;;  %v1154_v45 = vadd.f32 %v7211_v51, %v7155_v16 }
 0x20b   : > { %v2331_v13 = vmax.f32 %v1484_v2, 0.0  ;;  %5829 = vtanh.f32 %v2505_v19  ;;  %v1305_v4 = vpop.f32.mrf.mxu0  ;;  %v1487_v61 = vpop.f32.mrf.mxu3 }
 0x20c   : > { %v1363_v14 = vpop.f32.mrf.mxu1  ;;  %v1435_v8 = vpop.f32.mrf.mxu2  ;;  %v1242_v44 = vadd.f32 %v7207_v34, %v1154_v45  ;;  %v1246_v34 = vadd.f32 %v7222_v15, %v1162_v28 }
 0x20d   : > { %v2387_v0 = vmul.f32 %v7184_v25, %v2331_v13  ;;  %2064 = vmatmul.f32.gmra.mxu3 %v7912_v30  ;;  %v1364_v26 = vadd.f32 %v1363_v14, %v1301_v24 }
 0x20e   : > { %v1306_v58 = vadd.f32 %v1305_v4, %v1242_v44 }
 0x20f   : > { %v2420_v10 = vadd.f32 %v2419_v37, %v2387_v0  ;;  %v1436_v7 = vadd.f32 %v1435_v8, %v1364_v26  ;;  %1856 = vmatmul.f32.gmra.mxu0 %v6736_v20  ;;  %v1170_v26 = vadd.f32 %v7240_v27, %v7170_v3 }
 0x211   : > { %v5830_v32 = vpop.eup %5829  ;;  %v1488_v22 = vadd.f32 %v1487_v61, %v1436_v7  ;;  %1904 = vmatmul.f32.gmra.mxu1 %v7912_v30 }
 0x212   : > { %v2513_v52 = vadd.f32 1.0, %v5830_v32  ;;  %1988 = vmatmul.f32.gmra.mxu2 %v7911_v18  ;;  %v1250_v32 = vadd.f32 %v7234_v53, %v1170_v26 }
 0x213   : > { %v2335_v47 = vmax.f32 %v1488_v22, 0.0  ;;  %v1310_v1 = vpop.f32.mrf.mxu0  ;;  %v1491_v46 = vpop.f32.mrf.mxu3  ;;  %v7913_v22 = vld [vmem:[#allocation31_spill] sm:$0xff] }
 0x214   : > { %v2517_v33 = vmul.f32 0.5, %v2513_v52  ;;  %v1369_v23 = vpop.f32.mrf.mxu1  ;;  %v1439_v37 = vpop.f32.mrf.mxu2  ;;  %v1311_v13 = vadd.f32 %v1310_v1, %v1246_v34 }
 0x215   : > { %v2391_v51 = vmul.f32 %v7198_v5, %v2335_v47  ;;  %2068 = vmatmul.f32.gmra.mxu3 %v6736_v20  ;;  %v1370_v18 = vadd.f32 %v1369_v23, %v1306_v58 }
 0x216   : > { %v2540_v2 = vand.u32 4294901760, %v2517_v33 }
 0x217   : > { %v2421_v19 = vadd.f32 %v2420_v10, %v2391_v51  ;;  %2104 = vmatmul.f32.vlgmr.msrb.gmra.mxu0 %v6455_v60  ;;  %v1440_v4 = vadd.f32 %v1439_v37, %v1370_v18  ;;  %v7914_v51 = vld [vmem:[#allocation33_spill] sm:$0xff] }
 0x218   : > { %2541 = vmatpush.msra.mxu0 %v2540_v2  ;;  %2617 = vmatpush.msra.mxu3 %v2540_v2  ;;  %v2567_v24 = vsub.f32 %v2517_v33, %v2540_v2 }
 0x219   : > { %1908 = vmatmul.f32.gmra.mxu1 %v6736_v20  ;;  %v1492_v45 = vadd.f32 %v1491_v46, %v1440_v4 }
 0x21a   : > { %2242 = vmatmul.f32.vlgmr.msrb.gmra.mxu2 %v6422_v38  ;;  %v2568_v40 = vand.u32 4294901760, %v2567_v24 }
 0x21b   : > { %2594 = vmatpush.msra.mxu2 %v2567_v24  ;;  %v1315_v61 = vpop.f32.mrf.mxu0  ;;  %v1495_v14 = vpop.f32.mrf.mxu3  ;;  %v2339_v44 = vmax.f32 %v1492_v45, 0.0 }
 0x21c   : > { %v1375_v8 = vpop.f32.mrf.mxu1  ;;  %v1443_v0 = vpop.f32.mrf.mxu2  ;;  %2643 = vmatpush.msrb.mxu0 %v2568_v40  ;;  %v2569_v60 = vsub.f32 %v2567_v24, %v2568_v40  ;;  %v1316_v47 = vadd.f32 %v1315_v61, %v1250_v32 }
 0x21d   : > { %v1376_v10 = vadd.f32 %v1375_v8, %v1311_v13  ;;  %2294 = vmatmul.f32.vlgmr.msrb.gmra.mxu3 %v6422_v38  ;;  %v3110_v38 = vld [vmem:[%s7764_s7] sm:$0xff]  ;;  %v2395_v37 = vmul.f32 %v7231_v42, %v2339_v44  ;;  %v7916_v13 = vld [vmem:[#allocation30_spill] sm:$0xff] }
 0x21e   : > { %v2570_v15 = vand.u32 4294901760, %v2569_v60  ;;  %3113 = vperm.xlu2 %5824, %v3110_v38  }
 0x21f   : > { %v1444_v7 = vadd.f32 %v1443_v0, %v1376_v10  ;;  %2109 = vmatmul.f32.gmra.mxu0 %v6534_v39  ;;  %v2422_v18 = vadd.f32 %v2421_v19, %v2395_v37  ;;  %v7917_v19 = vld [vmem:[#allocation35_spill] sm:$0xff]  ;;  %v7918_v0 = vld [vmem:[#allocation34_spill] sm:$0xff] }
 0x220   : > { %2571 = vmatpush.msra.mxu1 %v2570_v15 }
 0x221   : > { %2164 = vmatmul.f32.vlgmr.msrb.gmra.mxu1 %v7913_v22  ;;  %v1496_v52 = vadd.f32 %v1495_v14, %v1444_v7  ;;  %v7919_v22 = vld [vmem:[#allocation36_spill] sm:$0xff] }
 0x222   : > { %2665 = vmatpush.msrb.mxu1 %v2540_v2  ;;  %2246 = vmatmul.f32.gmra.mxu2 %v6520_v50 }
 0x223   : > { %v7311_v1 = vpop.f32.mrf.mxu0  ;;  %v1499_v27 = vpop.f32.mrf.mxu3  ;;  %v2343_v53 = vmax.f32 %v1496_v52, 0.0  ;;  %v2474_v52 = vperm.slane %v7260_v17, 1 }
 0x224   : > { %v1381_v39 = vpop.f32.mrf.mxu1  ;;  %v1447_v46 = vpop.f32.mrf.mxu2 }
 0x225   : > { %v1382_v33 = vadd.f32 %v1381_v39, %v1316_v47  ;;  %2298 = vmatmul.f32.gmra.mxu3 %v6520_v50  ;;  %v2399_v58 = vmul.f32 %v7236_v56, %v2343_v53  ;;  %v7915_v50 = vmov 3  }
 0x226   : > { %5827 = vset.pattern.permute.xlu2 %v7915_v50 }
 0x227   : > { %v1448_v23 = vadd.f32 %v1447_v46, %v1382_v33  ;;  %2114 = vmatmul.f32.gmra.mxu0 %v6602_v55  ;;  %5509 = vperm.xlu2 %5827, %v7916_v13   ;;  %v2423_v61 = vadd.f32 %v2422_v18, %v2399_v58  ;;  %v2482_v46 = vmul.f32 %v2474_v52, %v7265_v48 }
 0x229   : > { %v1500_v28 = vadd.f32 %v1499_v27, %v1448_v23  ;;  %2170 = vmatmul.f32.gmra.mxu1 %v7914_v51  ;;  %v2465_v27 = vld [vmem:[#allocation8] sm:$0xff] }
 0x22a   : > { %2250 = vmatmul.f32.gmra.mxu2 %v6577_v12 }
 0x22b   : > { %v2347_v2 = vmax.f32 %v1500_v28, 0.0  ;;  %v7332_v14 = vpop.f32.mrf.mxu3 }
 0x22c   : > { %v7322_v24 = vpop.f32.mrf.mxu0  ;;  %v7324_v34 = vpop.f32.mrf.mxu2 }
 0x22d   : > { %v2403_v40 = vmul.f32 %v7246_v57, %v2347_v2  ;;  %v7328_v55 = vpop.f32.mrf.mxu1  ;;  %2302 = vmatmul.f32.gmra.mxu3 %v6577_v12 }
 0x22f   : > { %v2424_v4 = vsel %vm669_vm0, %v2403_v40, 0.0  ;;  %2119 = vmatmul.f32.gmra.mxu0 %v7917_v19 }
 0x230   : > { %v2425_v8 = vadd.f32 %v2424_v4, %v2423_v61 }
 0x231   : > { %2176 = vmatmul.f32.gmra.mxu1 %v7918_v0 }
 0x232   : > { %v2426_v60 = vrot.slane %v2425_v8, 4  ;;  %2254 = vmatmul.f32.gmra.mxu2 %v6636_v36 }
 0x234   : > { %v2427_v26 = vadd.f32 %v2426_v60, %v2425_v8  ;;  %v7338_v10 = vpop.f32.mrf.mxu0 }
 0x235   : > { %v7340_v15 = vpop.f32.mrf.mxu2  ;;  %2306 = vmatmul.f32.gmra.mxu3 %v6636_v36  ;;  %v2523_v36 = vsel %vm2521_vm2, %v2465_v27, 0 }
 0x236   : > { %v2428_v12 = vrot.slane %v2427_v26, 2  ;;  %v7343_v7 = vpop.f32.mrf.mxu1 }
 0x237   : > { %2124 = vmatmul.f32.gmra.mxu0 %v6683_v35  ;;  %v7357_v35 = vand.u32 4294901760, %v2523_v36 }
 0x238   : > { %v2429_v45 = vadd.f32 %v2428_v12, %v2427_v26  ;;  %v7346_v32 = vpop.f32.mrf.mxu3 }
 0x239   : > { %2182 = vmatmul.f32.gmra.mxu1 %v7919_v22  ;;  %7920 = vst [vmem:[#allocation27_spill] sm:$0xff] %v7357_v35  ;;  %v7365_v23 = vsub.f32 %v2523_v36, %v7357_v35 }
 0x23a   : > { %v2430_v47 = vrot.slane %v2429_v45, 1  ;;  %2258 = vmatmul.f32.gmra.mxu2 %v6666_v62 }
 0x23b   : > { %7921 = vst [vmem:[#allocation28_spill] sm:$0xff] %v7365_v23  ;;  %v7373_v51 = vand.u32 4294901760, %v7365_v23 }
 0x23c   : > { %v2431_v38 = vadd.f32 %v2430_v47, %v2429_v45  ;;  %v7351_v44 = vpop.f32.mrf.mxu0 }
 0x23d   : > { %v7354_v39 = vpop.f32.mrf.mxu2  ;;  %2310 = vmatmul.f32.gmra.mxu3 %v6666_v62  ;;  %7922 = vst [vmem:[#allocation23_spill] sm:$0xff] %v7373_v51 }
 0x23e   : > { %v2461_v33 = vadd.f32 %v7267_v41, %v2431_v38  ;;  %v7361_v53 = vpop.f32.mrf.mxu1 }
 0x23f   : > { %2129 = vmatmul.f32.gmra.mxu0 %v6718_v63 }
 0x240   : > { %v7367_v37 = vpop.f32.mrf.mxu3  ;;  %v2490_v28 = vmul.f32 %v7270_v11, %v2461_v33 }
 0x241   : > { %2188 = vmatmul.f32.gmra.mxu1 %v6698_v9  ;;  %v2545_v9 = vsub.f32 %v7365_v23, %v7373_v51 }
 0x242   : > { %2262 = vmatmul.f32.gmra.mxu2 %v7912_v30  ;;  %v2494_v62 = vadd.f32 %v2490_v28, %v2482_v46 }
 0x243   : > { %v7390_v13 = vand.u32 4294901760, %v2545_v9 }
 0x244   : > { %v7375_v58 = vpop.f32.mrf.mxu0  ;;  %v2502_v2 = vadd.f32 %v7276_v31, %v2494_v62 }
 0x245   : > { %v7378_v63 = vpop.f32.mrf.mxu2  ;;  %2314 = vmatmul.f32.gmra.mxu3 %v7912_v30  ;;  %7923 = vst [vmem:[#allocation29_spill] sm:$0xff] %v7390_v13 }
 0x246   : > { %v7381_v18 = vpop.f32.mrf.mxu1  ;;  %v2506_v50 = vmul.f32 0.5, %v2502_v2 }
 0x247   : > { %2134 = vmatmul.f32.gmra.mxu0 %v6746_v59 }
 0x248   : > { %v7386_v40 = vpop.f32.mrf.mxu3  ;;  %5831 = vtanh.f32 %v2506_v50 }
 0x249   : > { %2194 = vmatmul.f32.gmra.mxu1 %v6734_v43 }
 0x24a   : > { %2266 = vmatmul.f32.gmra.mxu2 %v6736_v20 }
 0x24c   : > { %v7392_v61 = vpop.f32.mrf.mxu0 }
 0x24d   : > { %v7394_v30 = vpop.f32.mrf.mxu2  ;;  %2318 = vmatmul.f32.gmra.mxu3 %v6736_v20 }
 0x24e   : > { %v5832_v4 = vpop.eup %5831  ;;  %v7397_v59 = vpop.f32.mrf.mxu1 }
 0x24f   : > { %v2514_v19 = vadd.f32 1.0, %v5832_v4  ;;  %2547 = vmatmul.f32.vlgmr.msra.gmra.mxu0 %v7390_v13 }
 0x250   : > { %v7400_v8 = vpop.f32.mrf.mxu3 }
 0x251   : > { %2200 = vmatmul.f32.gmra.mxu1 %v6755_v21  ;;  %v2518_v43 = vmul.f32 0.5, %v2514_v19 }
 0x252   : > { %2597 = vmatmul.f32.vlgmr.msra.gmra.mxu2 %v7365_v23 }
 0x253   : > { %v2686_v0 = vand.u32 4294901760, %v2518_v43 }
 0x254   : > { %v7404_v60 = vpop.f32.mrf.mxu0 }
 0x255   : > { %v7406_v26 = vpop.f32.mrf.mxu2  ;;  %2687 = vmatpush.msrb.mxu2 %v2686_v0  ;;  %v2713_v20 = vsub.f32 %v2518_v43, %v2686_v0  ;;  %2621 = vmatmul.f32.vlgmr.msra.gmra.mxu3 %v7373_v51 }
 0x256   : > { %v1655_v12 = vpop.f32.mrf.mxu1 }
 0x257   : > { %2740 = vmatpush.msra.mxu0 %v2713_v20  ;;  %v2714_v45 = vand.u32 4294901760, %v2713_v20 }
 0x258   : > { %v7409_v22 = vpop.f32.mrf.mxu3  ;;  %2645 = vmatmul.f32.vlgmr.msrb.gmra.mxu0 %v7357_v35 }
 0x259   : > { %2573 = vmatmul.f32.vlgmr.msra.gmra.mxu1 %v7357_v35  ;;  %2789 = vmatpush.msra.mxu2 %v2714_v45  ;;  %v2715_v21 = vsub.f32 %v2713_v20, %v2714_v45  ;;  %v7929_v20 = vld [vmem:[#allocation24_spill] sm:$0xff] }
 0x25a   : > { %2763 = vmatpush.msra.mxu1 %v2686_v0  ;;  %2693 = vmatmul.f32.vlgmr.msrb.gmra.mxu2 %v7390_v13  ;;  %v1540_v45 = vadd.f32 %v7322_v24, %v7929_v20 }
 0x25b   : > { %v2716_v52 = vand.u32 4294901760, %v2715_v21 }
 0x25c   : > { %v1833_v47 = vpop.f32.mrf.mxu0 }
 0x25d   : > { %v7414_v27 = vpop.f32.mrf.mxu2  ;;  %2717 = vmatpush.msrb.mxu3 %v2716_v52  ;;  %v1532_v52 = vadd.f32 %v7311_v1, %v7049_v54 }
 0x25e   : > { %v1659_v38 = vpop.f32.mrf.mxu1  ;;  %2719 = vmatmul.f32.vlgmr.msrb.gmra.mxu3 %v7357_v35 }
 0x25f   : > { %2811 = vmatpush.msra.mxu3 %v2686_v0 }
 0x260   : > { %v7417_v36 = vpop.f32.mrf.mxu3  ;;  %2743 = vmatmul.f32.vlgmr.msra.gmra.mxu0 %v7365_v23 }
 0x261   : > { %2667 = vmatmul.f32.vlgmr.msrb.gmra.mxu1 %v7357_v35 }
 0x262   : > { %2791 = vmatmul.f32.vlgmr.msra.gmra.mxu2 %v7357_v35 }
 0x264   : > { %v1837_v46 = vpop.f32.mrf.mxu0 }
 0x265   : > { %v7422_v33 = vpop.f32.mrf.mxu2 }
 0x266   : > { %7924 = vst [vmem:[#allocation25_spill] sm:$0xff] %v7422_v33  ;;  %v1885_v28 = vpop.f32.mrf.mxu1  ;;  %2813 = vmatmul.f32.vlgmr.msra.gmra.mxu3 %v7357_v35  ;;  %v7931_v35 = vld [vmem:[#allocation32_spill] sm:$0xff] }
 0x267   : > { %v1548_v23 = vadd.f32 %v7338_v10, %v7931_v35 }
 0x268   : > { %v7425_v62 = vpop.f32.mrf.mxu3 }
 0x269   : > { %7925 = vst [vmem:[#allocation38_spill] sm:$0xff] %v7425_v62  ;;  %2767 = vmatmul.f32.vlgmr.msra.gmra.mxu1 %v7373_v51  ;;  %v7932_v51 = vld [vmem:[#allocation26_spill] sm:$0xff]  ;;  %v1640_v62 = vadd.f32 %v7343_v7, %v1540_v45  ;;  %v1644_v24 = vadd.f32 %v7361_v53, %v1548_v23 }
 0x26a   : > { %v1556_v13 = vadd.f32 %v7351_v44, %v7932_v51  ;;  %v1572_v44 = vadd.f32 %v7392_v61, %v7162_v6 }
 0x26b   : > { %v1701_v10 = vadd.f32 %v7340_v15, %v1640_v62  ;;  %v1706_v45 = vadd.f32 %v7354_v39, %v1644_v24 }
 0x26c   : > { %v1841_v2 = vpop.f32.mrf.mxu0  ;;  %v1648_v1 = vadd.f32 %v7381_v18, %v1556_v13 }
 0x26d   : > { %v7428_v50 = vpop.f32.mrf.mxu2  ;;  %v1762_v23 = vadd.f32 %v7346_v32, %v1701_v10  ;;  %v1768_v13 = vadd.f32 %v7367_v37, %v1706_v45 }
 0x26e   : > { %7926 = vst [vmem:[#allocation37_spill] sm:$0xff] %v7428_v50  ;;  %v1889_v9 = vpop.f32.mrf.mxu1  ;;  %v1711_v53 = vadd.f32 %v7378_v63, %v1648_v1 }
 0x26f   : > { %v1838_v62 = vadd.f32 %v1837_v46, %v1762_v23 }
 0x270   : > { %v7430_v4 = vpop.f32.mrf.mxu3  ;;  %v1774_v39 = vadd.f32 %v7386_v40, %v1711_v53 }
 0x271   : > { %7927 = vst [vmem:[#allocation31_spill] sm:$0xff] %v7430_v4 }
 0x274   : > { %v1845_v19 = vpop.f32.mrf.mxu0 }
 0x275   : > { %v7432_v43 = vpop.f32.mrf.mxu2  ;;  %v1846_v37 = vadd.f32 %v1845_v19, %v1774_v39 }
 0x276   : > { %7928 = vst [vmem:[#allocation33_spill] sm:$0xff] %v7432_v43  ;;  %v1893_v0 = vpop.f32.mrf.mxu1  ;;  %v1636_v43 = vadd.f32 %v7328_v55, %v1532_v52 }
 0x278   : > { %v7436_v21 = vpop.f32.mrf.mxu3  ;;  %v1696_v7 = vadd.f32 %v7324_v34, %v1636_v43  ;;  %v1890_v43 = vadd.f32 %v1889_v9, %v1838_v62 }
 0x279   : > { %7930 = vst [vmem:[#allocation30_spill] sm:$0xff] %v7436_v21  ;;  %v1564_v21 = vadd.f32 %v7375_v58, %v7155_v16  ;;  %v1656_v58 = vadd.f32 %v1655_v12, %v1572_v44  ;;  %v1842_v12 = vadd.f32 %v1841_v2, %v1768_v13 }
 0x27a   : > { %v1756_v15 = vadd.f32 %v7332_v14, %v1696_v7  ;;  %v2328_v10 = vmax.f32 %v1890_v43, 0.0 }
 0x27b   : > { %v1652_v55 = vadd.f32 %v7397_v59, %v1564_v21  ;;  %v1580_v59 = vadd.f32 %v7404_v60, %v7170_v3  ;;  %v1721_v63 = vadd.f32 %v7406_v26, %v1656_v58  ;;  %v1894_v1 = vadd.f32 %v1893_v0, %v1842_v12 }
 0x27c   : > { %v1849_v4 = vpop.f32.mrf.mxu0  ;;  %v1834_v32 = vadd.f32 %v1833_v47, %v1756_v15 }
 0x27d   : > { %v7445_v33 = vpop.f32.mrf.mxu2  ;;  %v1716_v61 = vadd.f32 %v7394_v30, %v1652_v55  ;;  %v1660_v30 = vadd.f32 %v1659_v38, %v1580_v59  ;;  %v1786_v46 = vadd.f32 %v7409_v22, %v1721_v63  ;;  %v2332_v47 = vmax.f32 %v1894_v1, 0.0 }
 0x27e   : > { %v1897_v50 = vpop.f32.mrf.mxu1  ;;  %v1886_v24 = vadd.f32 %v1885_v28, %v1834_v32 }
 0x27f   : > { %v1780_v14 = vadd.f32 %v7400_v8, %v1716_v61  ;;  %v1898_v44 = vadd.f32 %v1897_v50, %v1846_v37  ;;  %v1726_v55 = vadd.f32 %v7414_v27, %v1660_v30  ;;  %v2384_v8 = vmul.f32 %v7176_v49, %v2328_v10 }
 0x280   : > { %v7455_v51 = vpop.f32.mrf.mxu3  ;;  %v2324_v26 = vmax.f32 %v1886_v24, 0.0  ;;  %v2388_v50 = vmul.f32 %v7184_v25, %v2332_v47 }
 0x281   : > { %v1850_v40 = vadd.f32 %v1849_v4, %v1780_v14  ;;  %v2336_v28 = vmax.f32 %v1898_v44, 0.0  ;;  %v1792_v0 = vadd.f32 %v7417_v36, %v1726_v55 }
 0x282   : > { %v2380_v22 = vmul.f32 %v7182_v29, %v2324_v26 }
 0x283   : > { %v2392_v23 = vmul.f32 %v7198_v5, %v2336_v28 }
 0x284   : > { %v1853_v52 = vpop.f32.mrf.mxu0  ;;  %v2432_v53 = vadd.f32 %v2384_v8, %v2380_v22 }
 0x285   : > { %v7462_v18 = vpop.f32.mrf.mxu2  ;;  %v1854_v2 = vadd.f32 %v1853_v52, %v1786_v46 }
 0x286   : > { %v1901_v34 = vpop.f32.mrf.mxu1  ;;  %v2433_v13 = vadd.f32 %v2432_v53, %v2388_v50 }
 0x287   : > { %v1902_v9 = vadd.f32 %v1901_v34, %v1850_v40 }
 0x288   : > { %v7471_v21 = vpop.f32.mrf.mxu3  ;;  %v2434_v39 = vadd.f32 %v2433_v13, %v2392_v23 }
 0x289   : > { %v2340_v4 = vmax.f32 %v1902_v9, 0.0  ;;  %v2475_v9 = vperm.slane %v7260_v17, 2 }
 0x28b   : > { %v2396_v61 = vmul.f32 %v7231_v42, %v2340_v4  ;;  %v2483_v28 = vmul.f32 %v2475_v9, %v7265_v48 }
 0x28c   : > { %v1857_v7 = vpop.f32.mrf.mxu0 }
 0x28d   : > { %v7475_v60 = vpop.f32.mrf.mxu2  ;;  %v1858_v15 = vadd.f32 %v1857_v7, %v1792_v0  ;;  %v2435_v36 = vadd.f32 %v2434_v39, %v2396_v61 }
 0x28e   : > { %v1905_v45 = vpop.f32.mrf.mxu1 }
 0x28f   : > { %v1906_v19 = vadd.f32 %v1905_v45, %v1854_v2 }
 0x290   : > { %v7479_v38 = vpop.f32.mrf.mxu3 }
 0x291   : > { %v2344_v58 = vmax.f32 %v1906_v19, 0.0 }
 0x293   : > { %v2400_v59 = vmul.f32 %v7236_v56, %v2344_v58 }
 0x294   : > { %v2105_v52 = vpop.f32.mrf.mxu0 }
 0x295   : > { %v7485_v27 = vpop.f32.mrf.mxu2  ;;  %v2436_v43 = vadd.f32 %v2435_v36, %v2400_v59  ;;  %v7935_v59 = vld [vmem:[#allocation33_spill] sm:$0xff] }
 0x296   : > { %v1909_v62 = vpop.f32.mrf.mxu1 }
 0x297   : > { %v1910_v34 = vadd.f32 %v1909_v62, %v1858_v15  ;;  %v7933_v15 = vld [vmem:[#allocation37_spill] sm:$0xff] }
 0x298   : > { %v7489_v63 = vpop.f32.mrf.mxu3  ;;  %v1950_v13 = vadd.f32 %v7933_v15, %v7929_v20  ;;  %v7939_v20 = vld [vmem:[#allocation30_spill] sm:$0xff] }
 0x299   : > { %v2348_v32 = vmax.f32 %v1910_v34, 0.0  ;;  %v7934_v34 = vld [vmem:[#allocation25_spill] sm:$0xff] }
 0x29a   : > { %v1942_v39 = vadd.f32 %v7934_v34, %v7049_v54 }
 0x29b   : > { %v2404_v12 = vmul.f32 %v7246_v57, %v2348_v32  ;;  %v1958_v32 = vadd.f32 %v7935_v59, %v7931_v35 }
 0x29c   : > { %v2110_v14 = vpop.f32.mrf.mxu0 }
 0x29d   : > { %v2437_v24 = vsel %vm669_vm0, %v2404_v12, 0.0  ;;  %v2243_v37 = vpop.f32.mrf.mxu2  ;;  %v2054_v9 = vadd.f32 %v7939_v20, %v1958_v32 }
 0x29e   : > { %v2438_v1 = vadd.f32 %v2437_v24, %v2436_v43  ;;  %v2165_v30 = vpop.f32.mrf.mxu1  ;;  %v7936_v43 = vld [vmem:[#allocation31_spill] sm:$0xff] }
 0x29f   : > { %v2050_v24 = vadd.f32 %v7936_v43, %v1950_v13 }
 0x2a0   : > { %v2439_v46 = vrot.slane %v2438_v1, 4  ;;  %v7493_v10 = vpop.f32.mrf.mxu3 }
 0x2a1   : > { %v2111_v54 = vadd.f32 %v2110_v14, %v2050_v24 }
 0x2a2   : > { %v2440_v40 = vadd.f32 %v2439_v46, %v2438_v1  ;;  %v7937_v1 = vld [vmem:[#allocation26_spill] sm:$0xff] }
 0x2a3   : > { %v1966_v46 = vadd.f32 %v7445_v33, %v7937_v1 }
 0x2a4   : > { %v2441_v44 = vrot.slane %v2440_v40, 2  ;;  %v2115_v7 = vpop.f32.mrf.mxu0 }
 0x2a5   : > { %v2247_v26 = vpop.f32.mrf.mxu2  ;;  %v2058_v35 = vadd.f32 %v7455_v51, %v1966_v46  ;;  %v7942_v46 = vld [vmem:[#allocation28_spill] sm:$0xff] }
 0x2a6   : > { %v2442_v47 = vadd.f32 %v2441_v44, %v2440_v40  ;;  %v2171_v2 = vpop.f32.mrf.mxu1  ;;  %v7938_v44 = vld [vmem:[#allocation38_spill] sm:$0xff] }
 0x2a8   : > { %v2443_v45 = vrot.slane %v2442_v47, 1  ;;  %v2299_v55 = vpop.f32.mrf.mxu3 }
 0x2aa   : > { %v2444_v8 = vadd.f32 %v2443_v45, %v2442_v47  ;;  %v2046_v47 = vadd.f32 %v7938_v44, %v1942_v39  ;;  %v1974_v45 = vadd.f32 %v7462_v18, %v7155_v16  ;;  %v1982_v39 = vadd.f32 %v7475_v60, %v7162_v6  ;;  %v7941_v6 = vld [vmem:[#allocation23_spill] sm:$0xff] }
 0x2ac   : > { %v2462_v19 = vadd.f32 %v7267_v41, %v2444_v8  ;;  %v2120_v22 = vpop.f32.mrf.mxu0  ;;  %v2062_v15 = vadd.f32 %v7471_v21, %v1974_v45  ;;  %v2066_v24 = vadd.f32 %v7479_v38, %v1982_v39  ;;  %v1990_v38 = vadd.f32 %v7485_v27, %v7170_v3  ;;  %v7943_v3 = vld [vmem:[#allocation27_spill] sm:$0xff] }
 0x2ad   : > { %v2251_v50 = vpop.f32.mrf.mxu2  ;;  %v2121_v13 = vadd.f32 %v2120_v22, %v2058_v35 }
 0x2ae   : > { %v2177_v4 = vpop.f32.mrf.mxu1  ;;  %v2491_v0 = vmul.f32 %v7270_v11, %v2462_v19  ;;  %v2116_v19 = vadd.f32 %v2115_v7, %v2054_v9 }
 0x2b0   : > { %v2303_v53 = vpop.f32.mrf.mxu3  ;;  %v2495_v23 = vadd.f32 %v2491_v0, %v2483_v28  ;;  %v2106_v28 = vadd.f32 %v2105_v52, %v2046_v47  ;;  %v2172_v0 = vadd.f32 %v2171_v2, %v2111_v54 }
 0x2b2   : > { %v2503_v58 = vadd.f32 %v7276_v31, %v2495_v23  ;;  %v2166_v33 = vadd.f32 %v2165_v30, %v2106_v28  ;;  %v2248_v16 = vadd.f32 %v2247_v26, %v2172_v0 }
 0x2b4   : > { %v2507_v61 = vmul.f32 0.5, %v2503_v58  ;;  %v2125_v36 = vpop.f32.mrf.mxu0  ;;  %v2244_v7 = vadd.f32 %v2243_v37, %v2166_v33  ;;  %v2300_v30 = vadd.f32 %v2299_v55, %v2248_v16 }
 0x2b5   : > { %v2255_v62 = vpop.f32.mrf.mxu2  ;;  %v2126_v18 = vadd.f32 %v2125_v36, %v2062_v15 }
 0x2b6   : > { %v2183_v12 = vpop.f32.mrf.mxu1  ;;  %5833 = vtanh.f32 %v2507_v61  ;;  %v2178_v61 = vadd.f32 %v2177_v4, %v2116_v19  ;;  %v7940_v4 = vld [vmem:[#allocation29_spill] sm:$0xff]  ;;  %v2329_v44 = vmax.f32 %v2300_v30, 0.0 }
 0x2b7   : > { %v2184_v14 = vadd.f32 %v2183_v12, %v2121_v13  ;;  %v2296_v12 = vadd.f32 %v7493_v10, %v2244_v7 }
 0x2b8   : > { %v2307_v40 = vpop.f32.mrf.mxu3  ;;  %v2252_v2 = vadd.f32 %v2251_v50, %v2178_v61  ;;  %v2385_v28 = vmul.f32 %v7176_v49, %v2329_v44 }
 0x2b9   : > { %v2256_v22 = vadd.f32 %v2255_v62, %v2184_v14  ;;  %v2325_v54 = vmax.f32 %v2296_v12, 0.0 }
 0x2ba   : > { %v2304_v37 = vadd.f32 %v2303_v53, %v2252_v2  ;;  %v2070_v53 = vadd.f32 %v7489_v63, %v1990_v38 }
 0x2bb   : > { %v2308_v47 = vadd.f32 %v2307_v40, %v2256_v22  ;;  %v2381_v40 = vmul.f32 %v7182_v29, %v2325_v54 }
 0x2bc   : > { %v5834_v8 = vpop.eup %5833  ;;  %v2130_v32 = vpop.f32.mrf.mxu0 }
 0x2bd   : > { %v2259_v23 = vpop.f32.mrf.mxu2  ;;  %v2515_v58 = vadd.f32 1.0, %v5834_v8  ;;  %v2131_v60 = vadd.f32 %v2130_v32, %v2066_v24  ;;  %v2333_v8 = vmax.f32 %v2304_v37, 0.0  ;;  %v2337_v19 = vmax.f32 %v2308_v47, 0.0 }
 0x2be   : > { %v2189_v34 = vpop.f32.mrf.mxu1  ;;  %v2445_v63 = vadd.f32 %v2385_v28, %v2381_v40 }
 0x2bf   : > { %v2519_v59 = vmul.f32 0.5, %v2515_v58  ;;  %v2190_v43 = vadd.f32 %v2189_v34, %v2126_v18  ;;  %v2393_v61 = vmul.f32 %v7198_v5, %v2337_v19 }
 0x2c0   : > { %v2311_v51 = vpop.f32.mrf.mxu3 }
 0x2c1   : > { %v2832_v52 = vand.u32 4294901760, %v2519_v59  ;;  %v2260_v50 = vadd.f32 %v2259_v23, %v2190_v43  ;;  %v2389_v23 = vmul.f32 %v7184_v25, %v2333_v8 }
 0x2c3   : > { %2833 = vmatpush.msrb.mxu0 %v2832_v52  ;;  %2909 = vmatpush.msrb.mxu3 %v2832_v52  ;;  %v2859_v21 = vsub.f32 %v2519_v59, %v2832_v52  ;;  %v2312_v35 = vadd.f32 %v2311_v51, %v2260_v50  ;;  %v2446_v59 = vadd.f32 %v2445_v63, %v2389_v23 }
 0x2c4   : > { %2839 = vmatmul.f32.vlgmr.msrb.gmra.mxu0 %v7940_v4  ;;  %2913 = vmatmul.f32.vlgmr.msrb.gmra.mxu3 %v7941_v6  ;;  %v2135_v10 = vpop.f32.mrf.mxu0 }
 0x2c5   : > { %2886 = vmatpush.msrb.mxu2 %v2859_v21  ;;  %v2860_v26 = vand.u32 4294901760, %v2859_v21  ;;  %v2263_v36 = vpop.f32.mrf.mxu2  ;;  %v2136_v27 = vadd.f32 %v2135_v10, %v2070_v53  ;;  %v2341_v58 = vmax.f32 %v2312_v35, 0.0  ;;  %v2447_v14 = vadd.f32 %v2446_v59, %v2393_v61 }
 0x2c6   : > { %v2195_v1 = vpop.f32.mrf.mxu1  ;;  %2889 = vmatmul.f32.vlgmr.msrb.gmra.mxu2 %v7942_v46 }
 0x2c7   : > { %v2196_v55 = vadd.f32 %v2195_v1, %v2131_v60  ;;  %2935 = vmatpush.msra.mxu0 %v2860_v26  ;;  %v2861_v62 = vsub.f32 %v2859_v21, %v2860_v26  ;;  %v2397_v16 = vmul.f32 %v7231_v42, %v2341_v58  ;;  %v2476_v1 = vperm.slane %v7260_v17, 3 }
 0x2c8   : > { %v2315_v20 = vpop.f32.mrf.mxu3 }
 0x2c9   : > { %v2264_v9 = vadd.f32 %v2263_v36, %v2196_v55  ;;  %v2862_v45 = vand.u32 4294901760, %v2861_v62  ;;  %v2448_v25 = vadd.f32 %v2447_v14, %v2397_v16 }
 0x2cb   : > { %2863 = vmatpush.msrb.mxu1 %v2862_v45  ;;  %v2316_v0 = vadd.f32 %v2315_v20, %v2264_v9  ;;  %v2484_v20 = vmul.f32 %v2476_v1, %v7265_v48 }
 0x2cc   : > { %2865 = vmatmul.f32.vlgmr.msrb.gmra.mxu1 %v7943_v3  ;;  %2937 = vmatmul.f32.vlgmr.msra.gmra.mxu0 %v7943_v3  ;;  %v2548_v2 = vpop.f32.mrf.mxu0 }
 0x2cd   : > { %2957 = vmatpush.msra.mxu1 %v2832_v52  ;;  %v2267_v33 = vpop.f32.mrf.mxu2  ;;  %v2345_v49 = vmax.f32 %v2316_v0, 0.0 }
 0x2ce   : > { %v2201_v15 = vpop.f32.mrf.mxu1 }
 0x2cf   : > { %v2202_v13 = vadd.f32 %v2201_v15, %v2136_v27  ;;  %v2401_v32 = vmul.f32 %v7236_v56, %v2345_v49 }
 0x2d0   : > { %v2319_v34 = vpop.f32.mrf.mxu3 }
 0x2d1   : > { %v2268_v39 = vadd.f32 %v2267_v33, %v2202_v13  ;;  %v2449_v7 = vadd.f32 %v2448_v25, %v2401_v32 }
 0x2d3   : > { %v2320_v18 = vadd.f32 %v2319_v34, %v2268_v39 }
 0x2d4   : > { %2959 = vmatmul.f32.vlgmr.msra.gmra.mxu1 %v7943_v3 }
 0x2d5   : > { %v2349_v29 = vmax.f32 %v2320_v18, 0.0  ;;  %v2598_v21 = vpop.f32.mrf.mxu2  ;;  %v2646_v12 = vpop.f32.mrf.mxu0 }
 0x2d6   : > { %v2574_v51 = vpop.f32.mrf.mxu1 }
 0x2d7   : > { %v2405_v52 = vmul.f32 %v7246_v57, %v2349_v29  ;;  %v2575_v43 = vadd.f32 %v2574_v51, %v2548_v2 }
 0x2d8   : > { %v2622_v60 = vpop.f32.mrf.mxu3 }
 0x2d9   : > { %v2450_v5 = vsel %vm669_vm0, %v2405_v52, 0.0  ;;  %v2599_v42 = vadd.f32 %v2598_v21, %v2575_v43 }
 0x2da   : > { %v2451_v24 = vadd.f32 %v2450_v5, %v2449_v7 }
 0x2db   : > { %v2623_v56 = vadd.f32 %v2622_v60, %v2599_v42 }
 0x2dc   : > { %v2452_v30 = vrot.slane %v2451_v24, 4 }
 0x2dd   : > { %v2647_v50 = vadd.f32 %v2646_v12, %v2623_v56  ;;  %v2694_v62 = vpop.f32.mrf.mxu2  ;;  %v2744_v54 = vpop.f32.mrf.mxu0 }
 0x2de   : > { %v2453_v22 = vadd.f32 %v2452_v30, %v2451_v24  ;;  %v2668_v38 = vpop.f32.mrf.mxu1 }
 0x2df   : > { %v2669_v44 = vadd.f32 %v2668_v38, %v2647_v50 }
 0x2e0   : > { %v2454_v26 = vrot.slane %v2453_v22, 2 }
 0x2e1   : > { %v2720_v47 = vpop.f32.mrf.mxu3  ;;  %v3134_v35 = vand.u32 4294901760, %v2669_v44 }
 0x2e2   : > { %v2455_v36 = vadd.f32 %v2454_v26, %v2453_v22  ;;  %v2721_v45 = vadd.f32 %v2720_v47, %v2694_v62 }
 0x2e3   : > { %v3161_v19 = vsub.f32 %v2669_v44, %v3134_v35 }
 0x2e4   : > { %v2456_v37 = vrot.slane %v2455_v36, 1  ;;  %v2745_v10 = vadd.f32 %v2744_v54, %v2721_v45 }
 0x2e5   : > { %v2792_v27 = vpop.f32.mrf.mxu2 }
 0x2e6   : > { %v2457_v57 = vadd.f32 %v2456_v37, %v2455_v36  ;;  %v2768_v28 = vpop.f32.mrf.mxu1 }
 0x2e7   : > { %v2769_v0 = vadd.f32 %v2768_v28, %v2745_v10  ;;  %v3703_v28 = vld [vmem:[%s7765_s8] sm:$0xff] }
 0x2e8   : > { %v2463_v55 = vadd.f32 %v7267_v41, %v2457_v57  ;;  %v3109_v41 = vld [vmem:[%s7763_s6] sm:$0xff] }
 0x2e9   : > { %v3117_v48 = vsel %vm2521_vm2, %v3109_v41, 0  ;;  %v2793_v40 = vadd.f32 %v2792_v27, %v2769_v0  ;;  %v2814_v58 = vpop.f32.mrf.mxu3 }
 0x2ea   : > { %v2492_v9 = vmul.f32 %v7270_v11, %v2463_v55  ;;  %v3162_v11 = vand.u32 4294901760, %v3161_v19  ;;  %v7545_v23 = vand.u32 4294901760, %v3117_v48 }
 0x2eb   : > { %v2815_v13 = vadd.f32 %v2814_v58, %v2793_v40 }
 0x2ec   : > { %v2496_v8 = vadd.f32 %v2492_v9, %v2484_v20  ;;  %v7548_v63 = vsub.f32 %v3117_v48, %v7545_v23  ;;  %v7581_v20 = vpop.permute.xlu2 %3113  ;;  %v3721_v48 = vsel %vm2521_vm2, %v3703_v28, 0 }
 0x2ed   : > { %v3280_v39 = vand.u32 4294901760, %v2815_v13 }
 0x2ee   : > { %v2504_v53 = vadd.f32 %v7276_v31, %v2496_v8  ;;  %v3163_v31 = vsub.f32 %v3161_v19, %v3162_v11  ;;  %v7551_v59 = vand.u32 4294901760, %v7548_v63 }
 0x2ef   : > { %v3307_v14 = vsub.f32 %v2815_v13, %v3280_v39 }
 0x2f0   : > { %v2508_v17 = vmul.f32 0.5, %v2504_v53  ;;  %v3164_v34 = vand.u32 4294901760, %v3163_v31  ;;  %v3139_v32 = vsub.f32 %v7548_v63, %v7551_v59 }
 0x2f1   : > { %v3308_v51 = vand.u32 4294901760, %v3307_v14 }
 0x2f2   : > { %5835 = vtanh.f32 %v2508_v17 }
 0x2f8   : > { %v5836_v15 = vpop.eup %5835 }
 0x2f9   : > { %v2516_v33 = vadd.f32 1.0, %v5836_v15 }
 0x2fb   : > { %v2520_v61 = vmul.f32 0.5, %v2516_v33  ;;  %v7591_v33 = vand.u32 4294901760, %v3721_v48 }
 0x2fd   : > { %v2978_v49 = vand.u32 4294901760, %v2520_v61 }
 0x2ff   : > { %2979 = vmatpush.msra.mxu2 %v2978_v49  ;;  %3055 = vmatpush.msrb.mxu1 %v2978_v49  ;;  %v3005_v16 = vsub.f32 %v2520_v61, %v2978_v49 }
 0x300   : > { %2985 = vmatmul.f32.vlgmr.msra.gmra.mxu2 %v7940_v4  ;;  %3059 = vmatmul.f32.vlgmr.msrb.gmra.mxu1 %v7941_v6  ;;  %v7558_v4 = vand.u32 4294901760, %v3139_v32  ;;  %v3309_v6 = vsub.f32 %v3307_v14, %v3308_v51 }
 0x301   : > { %3032 = vmatpush.msrb.mxu0 %v3005_v16  ;;  %v3006_v18 = vand.u32 4294901760, %v3005_v16  ;;  %3165 = vmatpush.msra.mxu1 %v3164_v34 }
 0x302   : > { %3035 = vmatmul.f32.vlgmr.msrb.gmra.mxu0 %v7942_v46  ;;  %v3310_v46 = vand.u32 4294901760, %v3309_v6 }
 0x303   : > { %3259 = vmatpush.msrb.mxu1 %v3134_v35  ;;  %3081 = vmatpush.msrb.mxu2 %v3006_v18  ;;  %v3007_v29 = vsub.f32 %v3005_v16, %v3006_v18 }
 0x304   : > { %3135 = vmatpush.msra.mxu0 %v3134_v35 }
 0x305   : > { %3188 = vmatpush.msra.mxu2 %v3161_v19  ;;  %v3008_v25 = vand.u32 4294901760, %v3007_v29 }
 0x306   : > { %3237 = vmatpush.msrb.mxu0 %v3162_v11 }
 0x307   : > { %3009 = vmatpush.msra.mxu3 %v3008_v25 }
 0x308   : > { %3011 = vmatmul.f32.vlgmr.msra.gmra.mxu3 %v7943_v3  ;;  %3083 = vmatmul.f32.vlgmr.msrb.gmra.mxu2 %v7943_v3 }
 0x309   : > { %3103 = vmatpush.msrb.mxu3 %v2978_v49  ;;  %3167 = vmatmul.f32.vlgmr.msra.gmra.mxu1 %v7545_v23 }
 0x30a   : > { %3141 = vmatmul.f32.vlgmr.msra.gmra.mxu0 %v7558_v4  ;;  %3281 = vmatpush.msrb.mxu2 %v3280_v39 }
 0x30b   : > { %3211 = vmatpush.msra.mxu3 %v3134_v35  ;;  %3334 = vmatpush.msra.mxu0 %v3307_v14 }
 0x30c   : > { %3357 = vmatpush.msra.mxu1 %v3280_v39 }
 0x310   : > { %3105 = vmatmul.f32.vlgmr.msrb.gmra.mxu3 %v7943_v3  ;;  %3191 = vmatmul.f32.vlgmr.msra.gmra.mxu2 %v7548_v63 }
 0x311   : > { %3311 = vmatpush.msrb.mxu3 %v3310_v46  ;;  %3261 = vmatmul.f32.vlgmr.msrb.gmra.mxu1 %v7545_v23 }
 0x312   : > { %3239 = vmatmul.f32.vlgmr.msrb.gmra.mxu0 %v7545_v23  ;;  %3383 = vmatpush.msra.mxu2 %v3308_v51 }
 0x318   : > { %3215 = vmatmul.f32.vlgmr.msra.gmra.mxu3 %v7551_v59  ;;  %3287 = vmatmul.f32.vlgmr.msrb.gmra.mxu2 %v7558_v4 }
 0x319   : > { %3405 = vmatpush.msra.mxu3 %v3280_v39  ;;  %3361 = vmatmul.f32.vlgmr.msra.gmra.mxu1 %v7551_v59 }
 0x31a   : > { %3337 = vmatmul.f32.vlgmr.msra.gmra.mxu0 %v7548_v63 }
 0x320   : > { %3313 = vmatmul.f32.vlgmr.msrb.gmra.mxu3 %v7545_v23  ;;  %3385 = vmatmul.f32.vlgmr.msra.gmra.mxu2 %v7545_v23 }
 0x328   : > { %3407 = vmatmul.f32.vlgmr.msra.gmra.mxu3 %v7545_v23 }
 0x341   : > { %v2840_v3 = vpop.f32.mrf.mxu0 }
 0x347   : > { %v2914_v5 = vpop.f32.mrf.mxu3 }
 0x349   : > { %v2866_v52 = vpop.f32.mrf.mxu1  ;;  %v2890_v7 = vpop.f32.mrf.mxu2 }
 0x34a   : > { %v2867_v2 = vadd.f32 %v2866_v52, %v2840_v3  ;;  %v2938_v24 = vpop.f32.mrf.mxu0 }
 0x34c   : > { %v2891_v43 = vadd.f32 %v2890_v7, %v2867_v2 }
 0x34e   : > { %v2915_v21 = vadd.f32 %v2914_v5, %v2891_v43 }
 0x350   : > { %v2939_v30 = vadd.f32 %v2938_v24, %v2915_v21 }
 0x351   : > { %v2960_v42 = vpop.f32.mrf.mxu1 }
 0x352   : > { %v2961_v22 = vadd.f32 %v2960_v42, %v2939_v30 }
 0x354   : > { %v3426_v60 = vand.u32 4294901760, %v2961_v22 }
 0x356   : > { %v3453_v26 = vsub.f32 %v2961_v22, %v3426_v60  ;;  %3427 = vmatpush.msrb.mxu0 %v3426_v60  ;;  %3503 = vmatpush.msrb.mxu3 %v3426_v60 }
 0x357   : > { %3433 = vmatmul.f32.vlgmr.msrb.gmra.mxu0 %v7558_v4  ;;  %3507 = vmatmul.f32.vlgmr.msrb.gmra.mxu3 %v7551_v59 }
 0x358   : > { %v3454_v56 = vand.u32 4294901760, %v3453_v26  ;;  %3480 = vmatpush.msrb.mxu2 %v3453_v26 }
 0x359   : > { %3483 = vmatmul.f32.vlgmr.msrb.gmra.mxu2 %v7548_v63 }
 0x35a   : > { %v3455_v36 = vsub.f32 %v3453_v26, %v3454_v56  ;;  %3529 = vmatpush.msra.mxu0 %v3454_v56 }
 0x35c   : > { %v3456_v12 = vand.u32 4294901760, %v3455_v36 }
 0x35e   : > { %3457 = vmatpush.msrb.mxu1 %v3456_v12 }
 0x35f   : > { %3459 = vmatmul.f32.vlgmr.msrb.gmra.mxu1 %v7545_v23  ;;  %3531 = vmatmul.f32.vlgmr.msra.gmra.mxu0 %v7545_v23 }
 0x360   : > { %3551 = vmatpush.msra.mxu1 %v3426_v60 }
 0x367   : > { %3553 = vmatmul.f32.vlgmr.msra.gmra.mxu1 %v7545_v23 }
 0x37d   : > { %v3060_v1 = vpop.f32.mrf.mxu1 }
 0x37f   : > { %v3036_v50 = vpop.f32.mrf.mxu0 }
 0x383   : > { %v2986_v37 = vpop.f32.mrf.mxu2 }
 0x386   : > { %v3168_v45 = vpop.f32.mrf.mxu1 }
 0x387   : > { %v3142_v47 = vpop.f32.mrf.mxu0 }
 0x388   : > { %v3143_v8 = vadd.f32 %v3142_v47, %v7581_v20 }
 0x38a   : > { %v3169_v17 = vadd.f32 %v3168_v45, %v3143_v8 }
 0x38b   : > { %v3012_v57 = vpop.f32.mrf.mxu3  ;;  %v3084_v38 = vpop.f32.mrf.mxu2 }
 0x38c   : > { %v3013_v55 = vadd.f32 %v3012_v57, %v2986_v37 }
 0x38e   : > { %v3037_v62 = vadd.f32 %v3036_v50, %v3013_v55  ;;  %v3262_v40 = vpop.f32.mrf.mxu1 }
 0x38f   : > { %v3240_v19 = vpop.f32.mrf.mxu0 }
 0x390   : > { %v3061_v44 = vadd.f32 %v3060_v1, %v3037_v62 }
 0x392   : > { %v3085_v9 = vadd.f32 %v3084_v38, %v3061_v44 }
 0x393   : > { %v3106_v54 = vpop.f32.mrf.mxu3  ;;  %v3192_v10 = vpop.f32.mrf.mxu2 }
 0x394   : > { %v3107_v35 = vadd.f32 %v3106_v54, %v3085_v9  ;;  %v3193_v0 = vadd.f32 %v3192_v10, %v3169_v17 }
 0x396   : > { %v3572_v53 = vand.u32 4294901760, %v3107_v35  ;;  %v3362_v14 = vpop.f32.mrf.mxu1 }
 0x397   : > { %v3338_v16 = vpop.f32.mrf.mxu0 }
 0x398   : > { %v3599_v41 = vsub.f32 %v3107_v35, %v3572_v53  ;;  %3573 = vmatpush.msra.mxu2 %v3572_v53  ;;  %3649 = vmatpush.msrb.mxu1 %v3572_v53 }
 0x399   : > { %3579 = vmatmul.f32.vlgmr.msra.gmra.mxu2 %v7558_v4  ;;  %3653 = vmatmul.f32.vlgmr.msrb.gmra.mxu1 %v7551_v59 }
 0x39a   : > { %3626 = vmatpush.msrb.mxu0 %v3599_v41  ;;  %v3600_v27 = vand.u32 4294901760, %v3599_v41 }
 0x39b   : > { %v3216_v11 = vpop.f32.mrf.mxu3  ;;  %3629 = vmatmul.f32.vlgmr.msrb.gmra.mxu0 %v7548_v63  ;;  %v3288_v61 = vpop.f32.mrf.mxu2  ;;  %v7597_v63 = vsub.f32 %v3721_v48, %v7591_v33 }
 0x39c   : > { %v3217_v58 = vadd.f32 %v3216_v11, %v3193_v0  ;;  %3675 = vmatpush.msrb.mxu2 %v3600_v27  ;;  %v3601_v15 = vsub.f32 %v3599_v41, %v3600_v27  ;;  %v3289_v34 = vadd.f32 %v3288_v61, %v7581_v20 }
 0x39d   : > { %v7600_v29 = vand.u32 4294901760, %v7597_v63 }
 0x39e   : > { %v3241_v31 = vadd.f32 %v3240_v19, %v3217_v58  ;;  %v3602_v13 = vand.u32 4294901760, %v3601_v15 }
 0x39f   : > { %v3743_v46 = vsub.f32 %v7597_v63, %v7600_v29 }
 0x3a0   : > { %v3263_v49 = vadd.f32 %v3262_v40, %v3241_v31  ;;  %3603 = vmatpush.msra.mxu3 %v3602_v13 }
 0x3a1   : > { %3605 = vmatmul.f32.vlgmr.msra.gmra.mxu3 %v7545_v23  ;;  %3677 = vmatmul.f32.vlgmr.msrb.gmra.mxu2 %v7545_v23  ;;  %v7605_v43 = vand.u32 4294901760, %v3743_v46 }
 0x3a2   : > { %v3704_v39 = vmul.f32 0.5, %v3263_v49  ;;  %3697 = vmatpush.msrb.mxu3 %v3572_v53 }
 0x3a3   : > { %v3314_v59 = vpop.f32.mrf.mxu3  ;;  %v3386_v25 = vpop.f32.mrf.mxu2 }
 0x3a4   : > { %5837 = vtanh.f32 %v3704_v39  ;;  %v3315_v18 = vadd.f32 %v3314_v59, %v3289_v34 }
 0x3a6   : > { %v3339_v32 = vadd.f32 %v3338_v16, %v3315_v18 }
 0x3a8   : > { %v3363_v51 = vadd.f32 %v3362_v14, %v3339_v32 }
 0x3a9   : > { %3699 = vmatmul.f32.vlgmr.msrb.gmra.mxu3 %v7545_v23 }
 0x3aa   : > { %v5838_v4 = vpop.eup %5837  ;;  %v3387_v6 = vadd.f32 %v3386_v25, %v3363_v51 }
 0x3ab   : > { %v3712_v3 = vadd.f32 1.0, %v5838_v4  ;;  %v3408_v52 = vpop.f32.mrf.mxu3 }
 0x3ac   : > { %v3409_v7 = vadd.f32 %v3408_v52, %v3387_v6 }
 0x3ad   : > { %v3716_v2 = vmul.f32 0.5, %v3712_v3  ;;  %v5725_v3 = vld [vmem:[%s7763_s6 + $0x8] sm:$0xff] }
 0x3ae   : > { %v3705_v5 = vmul.f32 0.5, %v3409_v7 }
 0x3af   : > { %v3738_v24 = vand.u32 4294901760, %v3716_v2 }
 0x3b0   : > { %5839 = vtanh.f32 %v3705_v5 }
 0x3b1   : > { %v3765_v21 = vsub.f32 %v3716_v2, %v3738_v24  ;;  %3739 = vmatpush.msra.mxu0 %v3738_v24  ;;  %3815 = vmatpush.msra.mxu3 %v3738_v24  ;;  %v4317_v2 = vsel %vm2521_vm2, %v5725_v3, 0 }
 0x3b2   : > { %3745 = vmatmul.f32.vlgmr.msra.gmra.mxu0 %v7605_v43  ;;  %3819 = vmatmul.f32.vlgmr.msra.gmra.mxu3 %v7600_v29 }
 0x3b3   : > { %3792 = vmatpush.msra.mxu2 %v3765_v21  ;;  %v3766_v23 = vand.u32 4294901760, %v3765_v21 }
 0x3b4   : > { %3795 = vmatmul.f32.vlgmr.msra.gmra.mxu2 %v7597_v63 }
 0x3b5   : > { %3841 = vmatpush.msrb.mxu0 %v3766_v23  ;;  %v3767_v30 = vsub.f32 %v3765_v21, %v3766_v23 }
 0x3b6   : > { %v5840_v42 = vpop.eup %5839 }
 0x3b7   : > { %v3713_v22 = vadd.f32 1.0, %v5840_v42  ;;  %v3768_v60 = vand.u32 4294901760, %v3767_v30 }
 0x3b9   : > { %v3717_v26 = vmul.f32 0.5, %v3713_v22  ;;  %3769 = vmatpush.msra.mxu1 %v3768_v60 }
 0x3ba   : > { %3843 = vmatmul.f32.vlgmr.msrb.gmra.mxu0 %v7591_v33  ;;  %3771 = vmatmul.f32.vlgmr.msra.gmra.mxu1 %v7591_v33 }
 0x3bb   : > { %3863 = vmatpush.msrb.mxu1 %v3738_v24  ;;  %v3884_v56 = vand.u32 4294901760, %v3717_v26  ;;  %v7631_v24 = vand.u32 4294901760, %v4317_v2 }
 0x3bd   : > { %v3911_v36 = vsub.f32 %v3717_v26, %v3884_v56  ;;  %3885 = vmatpush.msrb.mxu2 %v3884_v56  ;;  %3961 = vmatpush.msra.mxu1 %v3884_v56  ;;  %v7636_v42 = vsub.f32 %v4317_v2, %v7631_v24 }
 0x3be   : > { %3891 = vmatmul.f32.vlgmr.msrb.gmra.mxu2 %v7605_v43 }
 0x3bf   : > { %3938 = vmatpush.msra.mxu0 %v3911_v36  ;;  %v3912_v12 = vand.u32 4294901760, %v3911_v36 }
 0x3c1   : > { %3987 = vmatpush.msra.mxu2 %v3912_v12  ;;  %v3913_v37 = vsub.f32 %v3911_v36, %v3912_v12 }
 0x3c2   : > { %3941 = vmatmul.f32.vlgmr.msra.gmra.mxu0 %v7597_v63  ;;  %3865 = vmatmul.f32.vlgmr.msrb.gmra.mxu1 %v7591_v33 }
 0x3c3   : > { %v3914_v50 = vand.u32 4294901760, %v3913_v37 }
 0x3c5   : > { %3915 = vmatpush.msrb.mxu3 %v3914_v50 }
 0x3c6   : > { %3989 = vmatmul.f32.vlgmr.msra.gmra.mxu2 %v7591_v33  ;;  %3917 = vmatmul.f32.vlgmr.msrb.gmra.mxu3 %v7591_v33 }
 0x3c7   : > { %4009 = vmatpush.msra.mxu3 %v3884_v56  ;;  %v7640_v56 = vand.u32 4294901760, %v7636_v42 }
 0x3ca   : > { %3965 = vmatmul.f32.vlgmr.msra.gmra.mxu1 %v7600_v29 }
 0x3ce   : > { %4011 = vmatmul.f32.vlgmr.msra.gmra.mxu3 %v7591_v33 }
 0x3d4   : > { %v3434_v1 = vpop.f32.mrf.mxu0 }
 0x3d5   : > { %v3435_v57 = vadd.f32 %v3434_v1, %v7581_v20 }
 0x3da   : > { %v3508_v44 = vpop.f32.mrf.mxu3 }
 0x3dc   : > { %v3460_v38 = vpop.f32.mrf.mxu1  ;;  %v3484_v55 = vpop.f32.mrf.mxu2 }
 0x3dd   : > { %v3461_v62 = vadd.f32 %v3460_v38, %v3435_v57  ;;  %v3532_v9 = vpop.f32.mrf.mxu0 }
 0x3df   : > { %v3485_v47 = vadd.f32 %v3484_v55, %v3461_v62 }
 0x3e1   : > { %v3509_v45 = vadd.f32 %v3508_v44, %v3485_v47 }
 0x3e3   : > { %v3533_v54 = vadd.f32 %v3532_v9, %v3509_v45 }
 0x3e4   : > { %v3554_v8 = vpop.f32.mrf.mxu1 }
 0x3e5   : > { %v3555_v35 = vadd.f32 %v3554_v8, %v3533_v54 }
 0x3e7   : > { %v3706_v10 = vmul.f32 0.5, %v3555_v35 }
 0x3e9   : > { %5841 = vtanh.f32 %v3706_v10 }
 0x3ef   : > { %v5842_v53 = vpop.eup %5841 }
 0x3f0   : > { %v3714_v28 = vadd.f32 1.0, %v5842_v53 }
 0x3f2   : > { %v3718_v17 = vmul.f32 0.5, %v3714_v28 }
 0x3f4   : > { %v4030_v41 = vand.u32 4294901760, %v3718_v17 }
 0x3f6   : > { %v4057_v19 = vsub.f32 %v3718_v17, %v4030_v41  ;;  %4031 = vmatpush.msrb.mxu0 %v4030_v41  ;;  %4107 = vmatpush.msrb.mxu3 %v4030_v41 }
 0x3f7   : > { %4037 = vmatmul.f32.vlgmr.msrb.gmra.mxu0 %v7605_v43  ;;  %4111 = vmatmul.f32.vlgmr.msrb.gmra.mxu3 %v7600_v29 }
 0x3f8   : > { %4084 = vmatpush.msrb.mxu2 %v4057_v19  ;;  %v4058_v0 = vand.u32 4294901760, %v4057_v19 }
 0x3f9   : > { %4087 = vmatmul.f32.vlgmr.msrb.gmra.mxu2 %v7597_v63 }
 0x3fa   : > { %4133 = vmatpush.msra.mxu0 %v4058_v0  ;;  %v4059_v27 = vsub.f32 %v4057_v19, %v4058_v0  ;;  %v5726_v19 = vld [vmem:[%s7764_s7 + $0x8] sm:$0xff] }
 0x3fb   : > { %4313 = vperm.xlu1 %5826, %v5726_v19  }
 0x3fc   : > { %v4060_v48 = vand.u32 4294901760, %v4059_v27 }
 0x3fe   : > { %4061 = vmatpush.msrb.mxu1 %v4060_v48 }
 0x3ff   : > { %4135 = vmatmul.f32.vlgmr.msra.gmra.mxu0 %v7591_v33  ;;  %4063 = vmatmul.f32.vlgmr.msrb.gmra.mxu1 %v7591_v33 }
 0x400   : > { %4155 = vmatpush.msra.mxu1 %v4030_v41 }
 0x407   : > { %4157 = vmatmul.f32.vlgmr.msra.gmra.mxu1 %v7591_v33 }
 0x416   : > { %v3654_v13 = vpop.f32.mrf.mxu1 }
 0x418   : > { %v3630_v15 = vpop.f32.mrf.mxu0 }
 0x41c   : > { %v3580_v11 = vpop.f32.mrf.mxu2 }
 0x41d   : > { %v3581_v40 = vadd.f32 %v3580_v11, %v7581_v20 }
 0x424   : > { %v3606_v58 = vpop.f32.mrf.mxu3  ;;  %v3678_v49 = vpop.f32.mrf.mxu2 }
 0x425   : > { %v3607_v31 = vadd.f32 %v3606_v58, %v3581_v40 }
 0x427   : > { %v3631_v61 = vadd.f32 %v3630_v15, %v3607_v31 }
 0x429   : > { %v3655_v34 = vadd.f32 %v3654_v13, %v3631_v61 }
 0x42b   : > { %v3679_v39 = vadd.f32 %v3678_v49, %v3655_v34 }
 0x42c   : > { %v3700_v59 = vpop.f32.mrf.mxu3 }
 0x42d   : > { %v3701_v16 = vadd.f32 %v3700_v59, %v3679_v39 }
 0x42f   : > { %v3707_v18 = vmul.f32 0.5, %v3701_v16  ;;  %v3746_v14 = vpop.f32.mrf.mxu0 }
 0x431   : > { %5843 = vtanh.f32 %v3707_v18 }
 0x435   : > { %v3820_v7 = vpop.f32.mrf.mxu3 }
 0x437   : > { %v5844_v32 = vpop.eup %5843  ;;  %v3772_v51 = vpop.f32.mrf.mxu1 }
 0x438   : > { %v3715_v25 = vadd.f32 1.0, %v5844_v32  ;;  %v3773_v4 = vadd.f32 %v3772_v51, %v3746_v14  ;;  %v3796_v46 = vpop.f32.mrf.mxu2  ;;  %v3844_v23 = vpop.f32.mrf.mxu0 }
 0x43a   : > { %v3719_v6 = vmul.f32 0.5, %v3715_v25  ;;  %v3797_v20 = vadd.f32 %v3796_v46, %v3773_v4 }
 0x43c   : > { %v4176_v52 = vand.u32 4294901760, %v3719_v6  ;;  %v3821_v5 = vadd.f32 %v3820_v7, %v3797_v20 }
 0x43e   : > { %v4203_v21 = vsub.f32 %v3719_v6, %v4176_v52  ;;  %4177 = vmatpush.msra.mxu2 %v4176_v52  ;;  %4253 = vmatpush.msrb.mxu1 %v4176_v52  ;;  %v3845_v30 = vadd.f32 %v3844_v23, %v3821_v5 }
 0x43f   : > { %4183 = vmatmul.f32.vlgmr.msra.gmra.mxu2 %v7605_v43  ;;  %4257 = vmatmul.f32.vlgmr.msrb.gmra.mxu1 %v7600_v29  ;;  %v3866_v60 = vpop.f32.mrf.mxu1  ;;  %v4339_v43 = vsub.f32 %v7636_v42, %v7640_v56 }
 0x440   : > { %4230 = vmatpush.msrb.mxu0 %v4203_v21  ;;  %v4204_v22 = vand.u32 4294901760, %v4203_v21  ;;  %v3867_v26 = vadd.f32 %v3866_v60, %v3845_v30  ;;  %v3942_v55 = vpop.f32.mrf.mxu0 }
 0x441   : > { %4233 = vmatmul.f32.vlgmr.msrb.gmra.mxu0 %v7597_v63  ;;  %v3892_v37 = vpop.f32.mrf.mxu2  ;;  %v7644_v1 = vand.u32 4294901760, %v4339_v43 }
 0x442   : > { %4279 = vmatpush.msrb.mxu2 %v4204_v22  ;;  %v4205_v36 = vsub.f32 %v4203_v21, %v4204_v22  ;;  %v4334_v12 = vand.u32 4294901760, %v3867_v26 }
 0x444   : > { %v4206_v29 = vand.u32 4294901760, %v4205_v36  ;;  %v4361_v50 = vsub.f32 %v3867_v26, %v4334_v12  ;;  %4335 = vmatpush.msra.mxu0 %v4334_v12 }
 0x446   : > { %4207 = vmatpush.msra.mxu3 %v4206_v29  ;;  %v4362_v63 = vand.u32 4294901760, %v4361_v50  ;;  %4388 = vmatpush.msra.mxu2 %v4361_v50 }
 0x447   : > { %4209 = vmatmul.f32.vlgmr.msra.gmra.mxu3 %v7591_v33  ;;  %4281 = vmatmul.f32.vlgmr.msrb.gmra.mxu2 %v7591_v33  ;;  %v3966_v47 = vpop.f32.mrf.mxu1 }
 0x448   : > { %4301 = vmatpush.msrb.mxu3 %v4176_v52  ;;  %v4363_v57 = vsub.f32 %v4361_v50, %v4362_v63  ;;  %4437 = vmatpush.msrb.mxu0 %v4362_v63 }
 0x449   : > { %4341 = vmatmul.f32.vlgmr.msra.gmra.mxu0 %v7644_v1  ;;  %v3918_v38 = vpop.f32.mrf.mxu3  ;;  %v3990_v45 = vpop.f32.mrf.mxu2 }
 0x44a   : > { %4411 = vmatpush.msra.mxu3 %v4334_v12  ;;  %v3919_v62 = vadd.f32 %v3918_v38, %v3892_v37  ;;  %v4364_v44 = vand.u32 4294901760, %v4363_v57 }
 0x44c   : > { %v3943_v9 = vadd.f32 %v3942_v55, %v3919_v62  ;;  %4365 = vmatpush.msra.mxu1 %v4364_v44 }
 0x44d   : > { %4367 = vmatmul.f32.vlgmr.msra.gmra.mxu1 %v7631_v24 }
 0x44e   : > { %v3967_v54 = vadd.f32 %v3966_v47, %v3943_v9  ;;  %4459 = vmatpush.msrb.mxu1 %v4334_v12 }
 0x44f   : > { %4303 = vmatmul.f32.vlgmr.msrb.gmra.mxu3 %v7591_v33  ;;  %4391 = vmatmul.f32.vlgmr.msra.gmra.mxu2 %v7636_v42 }
 0x450   : > { %v3991_v8 = vadd.f32 %v3990_v45, %v3967_v54 }
 0x451   : > { %4439 = vmatmul.f32.vlgmr.msrb.gmra.mxu0 %v7631_v24  ;;  %v4012_v35 = vpop.f32.mrf.mxu3 }
 0x452   : > { %v4013_v10 = vadd.f32 %v4012_v35, %v3991_v8 }
 0x454   : > { %v4480_v53 = vand.u32 4294901760, %v4013_v10 }
 0x455   : > { %4461 = vmatmul.f32.vlgmr.msrb.gmra.mxu1 %v7631_v24 }
 0x456   : > { %v4507_v28 = vsub.f32 %v4013_v10, %v4480_v53  ;;  %4481 = vmatpush.msrb.mxu2 %v4480_v53  ;;  %4557 = vmatpush.msra.mxu1 %v4480_v53 }
 0x457   : > { %4415 = vmatmul.f32.vlgmr.msra.gmra.mxu3 %v7640_v56  ;;  %4487 = vmatmul.f32.vlgmr.msrb.gmra.mxu2 %v7644_v1 }
 0x458   : > { %v4508_v33 = vand.u32 4294901760, %v4507_v28  ;;  %4534 = vmatpush.msra.mxu0 %v4507_v28 }
 0x459   : > { %4537 = vmatmul.f32.vlgmr.msra.gmra.mxu0 %v7636_v42 }
 0x45a   : > { %4583 = vmatpush.msra.mxu2 %v4508_v33  ;;  %v4509_v17 = vsub.f32 %v4507_v28, %v4508_v33 }
 0x45c   : > { %v4510_v41 = vand.u32 4294901760, %v4509_v17 }
 0x45d   : > { %4561 = vmatmul.f32.vlgmr.msra.gmra.mxu1 %v7640_v56 }
 0x45e   : > { %4511 = vmatpush.msrb.mxu3 %v4510_v41 }
 0x45f   : > { %4585 = vmatmul.f32.vlgmr.msra.gmra.mxu2 %v7631_v24  ;;  %4513 = vmatmul.f32.vlgmr.msrb.gmra.mxu3 %v7631_v24 }
 0x460   : > { %4605 = vmatpush.msra.mxu3 %v4480_v53 }
 0x467   : > { %4607 = vmatmul.f32.vlgmr.msra.gmra.mxu3 %v7631_v24 }
 0x46d   : > { %v7675_v29 = vpop.permute.xlu1 %4313 }
 0x474   : > { %v4038_v0 = vpop.f32.mrf.mxu0 }
 0x47a   : > { %v4112_v40 = vpop.f32.mrf.mxu3 }
 0x47c   : > { %v4064_v27 = vpop.f32.mrf.mxu1  ;;  %v4088_v48 = vpop.f32.mrf.mxu2 }
 0x47d   : > { %v4065_v11 = vadd.f32 %v4064_v27, %v4038_v0  ;;  %v4136_v15 = vpop.f32.mrf.mxu0 }
 0x47f   : > { %v4089_v58 = vadd.f32 %v4088_v48, %v4065_v11 }
 0x481   : > { %v4113_v31 = vadd.f32 %v4112_v40, %v4089_v58  ;;  %v5727_v40 = vld [vmem:[%s7765_s8 + $0x8] sm:$0xff] }
 0x482   : > { %v4922_v58 = vsel %vm2521_vm2, %v5727_v40, 0 }
 0x483   : > { %v4137_v13 = vadd.f32 %v4136_v15, %v4113_v31  ;;  %v7684_v15 = vand.u32 4294901760, %v4922_v58 }
 0x484   : > { %v4158_v61 = vpop.f32.mrf.mxu1 }
 0x485   : > { %v4159_v49 = vadd.f32 %v4158_v61, %v4137_v13  ;;  %v7687_v61 = vsub.f32 %v4922_v58, %v7684_v15 }
 0x487   : > { %v4626_v34 = vand.u32 4294901760, %v4159_v49 }
 0x489   : > { %v4653_v39 = vsub.f32 %v4159_v49, %v4626_v34  ;;  %4627 = vmatpush.msrb.mxu0 %v4626_v34  ;;  %4703 = vmatpush.msrb.mxu3 %v4626_v34 }
 0x48a   : > { %4633 = vmatmul.f32.vlgmr.msrb.gmra.mxu0 %v7644_v1  ;;  %4707 = vmatmul.f32.vlgmr.msrb.gmra.mxu3 %v7640_v56 }
 0x48b   : > { %v4654_v59 = vand.u32 4294901760, %v4653_v39  ;;  %4680 = vmatpush.msrb.mxu2 %v4653_v39 }
 0x48c   : > { %4683 = vmatmul.f32.vlgmr.msrb.gmra.mxu2 %v7636_v42 }
 0x48d   : > { %v4655_v16 = vsub.f32 %v4653_v39, %v4654_v59  ;;  %4729 = vmatpush.msra.mxu0 %v4654_v59 }
 0x48f   : > { %v4656_v18 = vand.u32 4294901760, %v4655_v16 }
 0x491   : > { %4657 = vmatpush.msrb.mxu1 %v4656_v18 }
 0x492   : > { %4659 = vmatmul.f32.vlgmr.msrb.gmra.mxu1 %v7631_v24  ;;  %4731 = vmatmul.f32.vlgmr.msra.gmra.mxu0 %v7631_v24 }
 0x493   : > { %4751 = vmatpush.msra.mxu1 %v4626_v34  ;;  %v7690_v34 = vand.u32 4294901760, %v7687_v61 }
 0x495   : > { %v4944_v16 = vsub.f32 %v7687_v61, %v7690_v34 }
 0x49a   : > { %4753 = vmatmul.f32.vlgmr.msra.gmra.mxu1 %v7631_v24 }
 0x4bc   : > { %v4258_v4 = vpop.f32.mrf.mxu1 }
 0x4be   : > { %v4234_v25 = vpop.f32.mrf.mxu0 }
 0x4c2   : > { %v4184_v14 = vpop.f32.mrf.mxu2 }
 0x4c6   : > { %v4342_v2 = vpop.f32.mrf.mxu0 }
 0x4ca   : > { %v4210_v32 = vpop.f32.mrf.mxu3  ;;  %v4282_v46 = vpop.f32.mrf.mxu2 }
 0x4cb   : > { %v4211_v51 = vadd.f32 %v4210_v32, %v4184_v14  ;;  %v4368_v21 = vpop.f32.mrf.mxu1  ;;  %v7697_v32 = vand.u32 4294901760, %v4944_v16 }
 0x4cd   : > { %v4235_v6 = vadd.f32 %v4234_v25, %v4211_v51 }
 0x4ce   : > { %v4440_v12 = vpop.f32.mrf.mxu0 }
 0x4cf   : > { %v4259_v20 = vadd.f32 %v4258_v4, %v4235_v6 }
 0x4d1   : > { %v4283_v3 = vadd.f32 %v4282_v46, %v4259_v20 }
 0x4d2   : > { %v4304_v52 = vpop.f32.mrf.mxu3  ;;  %v4392_v30 = vpop.f32.mrf.mxu2 }
 0x4d3   : > { %v4305_v7 = vadd.f32 %v4304_v52, %v4283_v3  ;;  %v4462_v43 = vpop.f32.mrf.mxu1 }
 0x4d5   : > { %v4772_v5 = vand.u32 4294901760, %v4305_v7 }
 0x4d6   : > { %v4538_v55 = vpop.f32.mrf.mxu0 }
 0x4d7   : > { %v4799_v23 = vsub.f32 %v4305_v7, %v4772_v5  ;;  %4773 = vmatpush.msra.mxu2 %v4772_v5  ;;  %4849 = vmatpush.msrb.mxu1 %v4772_v5 }
 0x4d8   : > { %4779 = vmatmul.f32.vlgmr.msra.gmra.mxu2 %v7644_v1  ;;  %4853 = vmatmul.f32.vlgmr.msrb.gmra.mxu1 %v7640_v56  ;;  %v4343_v56 = vadd.f32 %v4342_v2, %v7675_v29 }
 0x4d9   : > { %v4800_v22 = vand.u32 4294901760, %v4799_v23  ;;  %4826 = vmatpush.msrb.mxu0 %v4799_v23 }
 0x4da   : > { %4829 = vmatmul.f32.vlgmr.msrb.gmra.mxu0 %v7636_v42  ;;  %v4416_v26 = vpop.f32.mrf.mxu3  ;;  %v4488_v37 = vpop.f32.mrf.mxu2  ;;  %v4369_v42 = vadd.f32 %v4368_v21, %v4343_v56 }
 0x4db   : > { %v4801_v60 = vsub.f32 %v4799_v23, %v4800_v22  ;;  %4875 = vmatpush.msrb.mxu2 %v4800_v22  ;;  %v4489_v50 = vadd.f32 %v4488_v37, %v7675_v29  ;;  %v4562_v47 = vpop.f32.mrf.mxu1 }
 0x4dc   : > { %v4393_v1 = vadd.f32 %v4392_v30, %v4369_v42 }
 0x4dd   : > { %v4802_v36 = vand.u32 4294901760, %v4801_v60 }
 0x4de   : > { %v4417_v38 = vadd.f32 %v4416_v26, %v4393_v1 }
 0x4df   : > { %4803 = vmatpush.msra.mxu3 %v4802_v36 }
 0x4e0   : > { %4805 = vmatmul.f32.vlgmr.msra.gmra.mxu3 %v7631_v24  ;;  %4877 = vmatmul.f32.vlgmr.msrb.gmra.mxu2 %v7631_v24  ;;  %v4441_v44 = vadd.f32 %v4440_v12, %v4417_v38 }
 0x4e1   : > { %4897 = vmatpush.msrb.mxu3 %v4772_v5 }
 0x4e2   : > { %v4514_v63 = vpop.f32.mrf.mxu3  ;;  %v4463_v45 = vadd.f32 %v4462_v43, %v4441_v44  ;;  %v4586_v54 = vpop.f32.mrf.mxu2 }
 0x4e3   : > { %v4515_v57 = vadd.f32 %v4514_v63, %v4489_v50 }
 0x4e4   : > { %v4905_v35 = vmul.f32 0.5, %v4463_v45 }
 0x4e5   : > { %v4539_v62 = vadd.f32 %v4538_v55, %v4515_v57 }
 0x4e6   : > { %5845 = vtanh.f32 %v4905_v35 }
 0x4e7   : > { %v4563_v9 = vadd.f32 %v4562_v47, %v4539_v62 }
 0x4e8   : > { %4899 = vmatmul.f32.vlgmr.msrb.gmra.mxu3 %v7631_v24 }
 0x4e9   : > { %v4587_v8 = vadd.f32 %v4586_v54, %v4563_v9 }
 0x4ea   : > { %v4608_v10 = vpop.f32.mrf.mxu3 }
 0x4eb   : > { %v4609_v53 = vadd.f32 %v4608_v10, %v4587_v8 }
 0x4ec   : > { %v5846_v33 = vpop.eup %5845 }
 0x4ed   : > { %v4906_v28 = vmul.f32 0.5, %v4609_v53  ;;  %v4913_v17 = vadd.f32 1.0, %v5846_v33 }
 0x4ef   : > { %5847 = vtanh.f32 %v4906_v28  ;;  %v4917_v19 = vmul.f32 0.5, %v4913_v17 }
 0x4f1   : > { %v4939_v0 = vand.u32 4294901760, %v4917_v19 }
 0x4f3   : > { %v4966_v48 = vsub.f32 %v4917_v19, %v4939_v0  ;;  %4940 = vmatpush.msra.mxu0 %v4939_v0  ;;  %5016 = vmatpush.msra.mxu3 %v4939_v0 }
 0x4f4   : > { %5020 = vmatmul.f32.vlgmr.msra.gmra.mxu3 %v7690_v34  ;;  %4946 = vmatmul.f32.vlgmr.msra.gmra.mxu0 %v7697_v32 }
 0x4f5   : > { %v5848_v41 = vpop.eup %5847  ;;  %4993 = vmatpush.msra.mxu2 %v4966_v48  ;;  %v4967_v13 = vand.u32 4294901760, %v4966_v48 }
 0x4f6   : > { %v4914_v24 = vadd.f32 1.0, %v5848_v41  ;;  %4996 = vmatmul.f32.vlgmr.msra.gmra.mxu2 %v7687_v61 }
 0x4f7   : > { %v4968_v49 = vsub.f32 %v4966_v48, %v4967_v13  ;;  %5042 = vmatpush.msrb.mxu0 %v4967_v13 }
 0x4f8   : > { %v4918_v27 = vmul.f32 0.5, %v4914_v24 }
 0x4f9   : > { %v4969_v59 = vand.u32 4294901760, %v4968_v49 }
 0x4fa   : > { %v5085_v11 = vand.u32 4294901760, %v4918_v27 }
 0x4fb   : > { %4970 = vmatpush.msra.mxu1 %v4969_v59 }
 0x4fc   : > { %5086 = vmatpush.msrb.mxu2 %v5085_v11  ;;  %v5112_v25 = vsub.f32 %v4918_v27, %v5085_v11  ;;  %4972 = vmatmul.f32.vlgmr.msra.gmra.mxu1 %v7684_v15 }
 0x4fd   : > { %5064 = vmatpush.msrb.mxu1 %v4939_v0  ;;  %5044 = vmatmul.f32.vlgmr.msrb.gmra.mxu0 %v7684_v15 }
 0x4fe   : > { %5139 = vmatpush.msra.mxu0 %v5112_v25  ;;  %5092 = vmatmul.f32.vlgmr.msrb.gmra.mxu2 %v7697_v32  ;;  %v5113_v60 = vand.u32 4294901760, %v5112_v25 }
 0x4ff   : > { %5162 = vmatpush.msra.mxu1 %v5085_v11 }
 0x500   : > { %v5114_v36 = vsub.f32 %v5112_v25, %v5113_v60  ;;  %5188 = vmatpush.msra.mxu2 %v5113_v60 }
 0x502   : > { %v5115_v43 = vand.u32 4294901760, %v5114_v36 }
 0x504   : > { %5066 = vmatmul.f32.vlgmr.msrb.gmra.mxu1 %v7684_v15  ;;  %5116 = vmatpush.msrb.mxu3 %v5115_v43 }
 0x505   : > { %5142 = vmatmul.f32.vlgmr.msra.gmra.mxu0 %v7687_v61  ;;  %5118 = vmatmul.f32.vlgmr.msrb.gmra.mxu3 %v7684_v15 }
 0x506   : > { %5190 = vmatmul.f32.vlgmr.msra.gmra.mxu2 %v7684_v15  ;;  %5210 = vmatpush.msra.mxu3 %v5085_v11 }
 0x507   : > { %v4634_v31 = vpop.f32.mrf.mxu0 }
 0x508   : > { %v4635_v39 = vadd.f32 %v4634_v31, %v7675_v29 }
 0x50c   : > { %5166 = vmatmul.f32.vlgmr.msra.gmra.mxu1 %v7690_v34 }
 0x50d   : > { %v4708_v4 = vpop.f32.mrf.mxu3  ;;  %5212 = vmatmul.f32.vlgmr.msra.gmra.mxu3 %v7684_v15 }
 0x50f   : > { %v4660_v18 = vpop.f32.mrf.mxu1  ;;  %v4684_v14 = vpop.f32.mrf.mxu2 }
 0x510   : > { %v4661_v51 = vadd.f32 %v4660_v18, %v4635_v39  ;;  %v4732_v46 = vpop.f32.mrf.mxu0 }
 0x512   : > { %v4685_v6 = vadd.f32 %v4684_v14, %v4661_v51 }
 0x514   : > { %v4709_v20 = vadd.f32 %v4708_v4, %v4685_v6 }
 0x516   : > { %v4733_v3 = vadd.f32 %v4732_v46, %v4709_v20 }
 0x517   : > { %v4754_v52 = vpop.f32.mrf.mxu1 }
 0x518   : > { %v4755_v7 = vadd.f32 %v4754_v52, %v4733_v3 }
 0x51a   : > { %v4907_v2 = vmul.f32 0.5, %v4755_v7 }
 0x51c   : > { %5849 = vtanh.f32 %v4907_v2  ;;  %v5510_v2 = vpop.permute.xlu2 %5509 }
 0x522   : > { %v5850_v5 = vpop.eup %5849 }
 0x523   : > { %v4915_v21 = vadd.f32 1.0, %v5850_v5 }
 0x525   : > { %v4919_v23 = vmul.f32 0.5, %v4915_v21 }
 0x527   : > { %v5231_v30 = vand.u32 4294901760, %v4919_v23 }
 0x529   : > { %5232 = vmatpush.msrb.mxu0 %v5231_v30  ;;  %v5258_v22 = vsub.f32 %v4919_v23, %v5231_v30  ;;  %5308 = vmatpush.msrb.mxu3 %v5231_v30 }
 0x52a   : > { %5238 = vmatmul.f32.vlgmr.msrb.gmra.mxu0 %v7697_v32  ;;  %5312 = vmatmul.f32.vlgmr.msrb.gmra.mxu3 %v7690_v34 }
 0x52b   : > { %v5259_v26 = vand.u32 4294901760, %v5258_v22  ;;  %5285 = vmatpush.msrb.mxu2 %v5258_v22 }
 0x52c   : > { %5288 = vmatmul.f32.vlgmr.msrb.gmra.mxu2 %v7687_v61 }
 0x52d   : > { %v5260_v12 = vsub.f32 %v5258_v22, %v5259_v26  ;;  %5334 = vmatpush.msra.mxu0 %v5259_v26 }
 0x52f   : > { %v5261_v56 = vand.u32 4294901760, %v5260_v12 }
 0x531   : > { %5262 = vmatpush.msrb.mxu1 %v5261_v56 }
 0x532   : > { %5336 = vmatmul.f32.vlgmr.msra.gmra.mxu0 %v7684_v15  ;;  %5264 = vmatmul.f32.vlgmr.msrb.gmra.mxu1 %v7684_v15 }
 0x533   : > { %5356 = vmatpush.msra.mxu1 %v5231_v30 }
 0x53a   : > { %5358 = vmatmul.f32.vlgmr.msra.gmra.mxu1 %v7684_v15 }
 0x555   : > { %v4854_v57 = vpop.f32.mrf.mxu1 }
 0x557   : > { %v4830_v1 = vpop.f32.mrf.mxu0 }
 0x55b   : > { %v4780_v37 = vpop.f32.mrf.mxu2 }
 0x55c   : > { %v4781_v50 = vadd.f32 %v4780_v37, %v7675_v29 }
 0x563   : > { %v4806_v42 = vpop.f32.mrf.mxu3  ;;  %v4878_v55 = vpop.f32.mrf.mxu2 }
 0x564   : > { %v4807_v63 = vadd.f32 %v4806_v42, %v4781_v50 }
 0x566   : > { %v4831_v38 = vadd.f32 %v4830_v1, %v4807_v63 }
 0x568   : > { %v4855_v62 = vadd.f32 %v4854_v57, %v4831_v38 }
 0x56a   : > { %v4879_v44 = vadd.f32 %v4878_v55, %v4855_v62 }
 0x56b   : > { %v4900_v47 = vpop.f32.mrf.mxu3 }
 0x56c   : > { %v4901_v9 = vadd.f32 %v4900_v47, %v4879_v44 }
 0x56e   : > { %v4908_v45 = vmul.f32 0.5, %v4901_v9 }
 0x570   : > { %5851 = vtanh.f32 %v4908_v45 }
 0x571   : > { %v4947_v41 = vpop.f32.mrf.mxu0 }
 0x576   : > { %v5852_v54 = vpop.eup %5851 }
 0x577   : > { %v4916_v8 = vadd.f32 1.0, %v5852_v54  ;;  %v5021_v24 = vpop.f32.mrf.mxu3 }
 0x579   : > { %v4920_v35 = vmul.f32 0.5, %v4916_v8  ;;  %v4973_v17 = vpop.f32.mrf.mxu1  ;;  %v4997_v19 = vpop.f32.mrf.mxu2 }
 0x57a   : > { %v5045_v27 = vpop.f32.mrf.mxu0  ;;  %v4974_v16 = vadd.f32 %v4973_v17, %v4947_v41  ;;  %v5540_v17 = vstv %s5724_s13 }
 0x57b   : > { %v5377_v10 = vand.u32 4294901760, %v4920_v35 }
 0x57d   : > { %v5404_v53 = vsub.f32 %v4920_v35, %v5377_v10  ;;  %5378 = vmatpush.msra.mxu2 %v5377_v10  ;;  %5454 = vmatpush.msrb.mxu1 %v5377_v10 }
 0x57e   : > { %5384 = vmatmul.f32.vlgmr.msra.gmra.mxu2 %v7697_v32  ;;  %5458 = vmatmul.f32.vlgmr.msrb.gmra.mxu1 %v7690_v34  ;;  %v4998_v32 = vadd.f32 %v4997_v19, %v4974_v16 }
 0x57f   : > { %5431 = vmatpush.msrb.mxu0 %v5404_v53  ;;  %v5405_v29 = vand.u32 4294901760, %v5404_v53 }
 0x580   : > { %5434 = vmatmul.f32.vlgmr.msrb.gmra.mxu0 %v7687_v61  ;;  %v5022_v6 = vadd.f32 %v5021_v24, %v4998_v32 }
 0x581   : > { %5480 = vmatpush.msrb.mxu2 %v5405_v29  ;;  %v5406_v28 = vsub.f32 %v5404_v53, %v5405_v29  ;;  %v5067_v0 = vpop.f32.mrf.mxu1  ;;  %v5093_v48 = vpop.f32.mrf.mxu2 }
 0x582   : > { %v5143_v58 = vpop.f32.mrf.mxu0  ;;  %v5046_v52 = vadd.f32 %v5045_v27, %v5022_v6 }
 0x583   : > { %v5407_v33 = vand.u32 4294901760, %v5406_v28 }
 0x584   : > { %v5068_v21 = vadd.f32 %v5067_v0, %v5046_v52 }
 0x585   : > { %5408 = vmatpush.msra.mxu3 %v5407_v33 }
 0x586   : > { %5410 = vmatmul.f32.vlgmr.msra.gmra.mxu3 %v7684_v15  ;;  %5482 = vmatmul.f32.vlgmr.msrb.gmra.mxu2 %v7684_v15  ;;  %v5512_v22 = vmul.f32 %v5510_v2, %v5068_v21 }
 0x587   : > { %5502 = vmatpush.msrb.mxu3 %v5377_v10 }
 0x588   : > { %v5119_v11 = vpop.f32.mrf.mxu3  ;;  %v5516_v36 = vrot.slane %v5512_v22, 4 }
 0x589   : > { %v5167_v40 = vpop.f32.mrf.mxu1  ;;  %v5191_v31 = vpop.f32.mrf.mxu2  ;;  %v5120_v49 = vadd.f32 %v5119_v11, %v5093_v48 }
 0x58a   : > { %v5517_v37 = vadd.f32 %v5516_v36, %v5512_v22 }
 0x58b   : > { %v5144_v18 = vadd.f32 %v5143_v58, %v5120_v49 }
 0x58c   : > { %v5518_v57 = vrot.slane %v5517_v37, 2 }
 0x58d   : > { %v5168_v25 = vadd.f32 %v5167_v40, %v5144_v18 }
 0x58e   : > { %5504 = vmatmul.f32.vlgmr.msrb.gmra.mxu3 %v7684_v15  ;;  %v5519_v45 = vadd.f32 %v5518_v57, %v5517_v37 }
 0x58f   : > { %v5192_v46 = vadd.f32 %v5191_v31, %v5168_v25 }
 0x590   : > { %v5213_v13 = vpop.f32.mrf.mxu3  ;;  %v5520_v29 = vrot.slane %v5519_v45, 1 }
 0x591   : > { %v5214_v7 = vadd.f32 %v5213_v13, %v5192_v46 }
 0x592   : > { %v5521_v24 = vadd.f32 %v5520_v29, %v5519_v45 }
 0x593   : > { %v5513_v23 = vmul.f32 %v5510_v2, %v5214_v7 }
 0x594   : > { %v5541_v40 = vadd.f32 %v5540_v17, %v5521_v24 }
 0x595   : > { %v5522_v60 = vrot.slane %v5513_v23, 4 }
 0x596   : > { %v5545_v49 = vmul.f32 0.5, %v5541_v40 }
 0x597   : > { %v5523_v12 = vadd.f32 %v5522_v60, %v5513_v23 }
 0x599   : > { %v5524_v50 = vrot.slane %v5523_v12, 2 }
 0x59b   : > { %v5525_v38 = vadd.f32 %v5524_v50, %v5523_v12 }
 0x59d   : > { %v5526_v54 = vrot.slane %v5525_v38, 1 }
 0x59f   : > { %v5527_v28 = vadd.f32 %v5526_v54, %v5525_v38 }
 0x5a1   : > { %v5542_v0 = vadd.f32 %v5540_v17, %v5527_v28 }
 0x5a3   : > { %v5546_v58 = vmul.f32 0.5, %v5542_v0 }
 0x5a5   : > { %5853 = vtanh.f32 %v5546_v58 }
 0x5a7   : > { %v5239_v34 = vpop.f32.mrf.mxu0 }
 0x5ab   : > { %v5854_v16 = vpop.eup %5853 }
 0x5ad   : > { %v5313_v14 = vpop.f32.mrf.mxu3 }
 0x5af   : > { %v5265_v61 = vpop.f32.mrf.mxu1  ;;  %v5289_v59 = vpop.f32.mrf.mxu2 }
 0x5b0   : > { %v5266_v39 = vadd.f32 %v5265_v61, %v5239_v34  ;;  %v5337_v4 = vpop.f32.mrf.mxu0 }
 0x5b2   : > { %v5290_v15 = vadd.f32 %v5289_v59, %v5266_v39 }
 0x5b4   : > { %v5314_v51 = vadd.f32 %v5313_v14, %v5290_v15  ;;  %v5554_v14 = vadd.f32 1.0, %v5854_v16 }
 0x5b6   : > { %v5338_v20 = vadd.f32 %v5337_v4, %v5314_v51  ;;  %v5558_v4 = vmul.f32 0.5, %v5554_v14 }
 0x5b7   : > { %v5359_v3 = vpop.f32.mrf.mxu1 }
 0x5b8   : > { %v5360_v5 = vadd.f32 %v5359_v3, %v5338_v20  ;;  %v5574_v3 = vlaneseq }
 0x5ba   : > { %v5514_v30 = vmul.f32 %v5510_v2, %v5360_v5  ;;  %vm5576_vm5 = vcmp.lt.s32.totalorder %v5574_v3, 512 }
 0x5bc   : > { %v5528_v26 = vrot.slane %v5514_v30, 4 }
 0x5be   : > { %v5529_v56 = vadd.f32 %v5528_v26, %v5514_v30 }
 0x5c0   : > { %v5530_v42 = vrot.slane %v5529_v56, 2 }
 0x5c2   : > { %v5531_v44 = vadd.f32 %v5530_v42, %v5529_v56 }
 0x5c4   : > { %v5532_v35 = vrot.slane %v5531_v44, 1 }
 0x5c6   : > { %v5533_v41 = vadd.f32 %v5532_v35, %v5531_v44 }
 0x5c8   : > { %v5543_v48 = vadd.f32 %v5540_v17, %v5533_v41 }
 0x5ca   : > { %v5547_v13 = vmul.f32 0.5, %v5543_v48 }
 0x5cc   : > { %5855 = vtanh.f32 %v5547_v13 }
 0x5cd   : > { %5857 = vtanh.f32 %v5545_v49 }
 0x5d2   : > { %v5856_v15 = vpop.eup %5855 }
 0x5d3   : > { %v5858_v32 = vpop.eup %5857  ;;  %v5555_v25 = vadd.f32 1.0, %v5856_v15 }
 0x5d4   : > { %v5553_v51 = vadd.f32 1.0, %v5858_v32 }
 0x5d5   : > { %v5559_v20 = vmul.f32 0.5, %v5555_v25 }
 0x5d6   : > { %v5557_v52 = vmul.f32 0.5, %v5553_v51 }
 0x5d7   : > { %v5566_v5 = vrot.slane %v5559_v20, 6 }
 0x5fb   : > { %v5459_v62 = vpop.f32.mrf.mxu1 }
 0x5fd   : > { %v5435_v63 = vpop.f32.mrf.mxu0 }
 0x601   : > { %v5385_v43 = vpop.f32.mrf.mxu2 }
 0x609   : > { %v5411_v1 = vpop.f32.mrf.mxu3  ;;  %v5483_v9 = vpop.f32.mrf.mxu2 }
 0x60a   : > { %v5412_v55 = vadd.f32 %v5411_v1, %v5385_v43 }
 0x60c   : > { %v5436_v47 = vadd.f32 %v5435_v63, %v5412_v55 }
 0x60e   : > { %v5460_v8 = vadd.f32 %v5459_v62, %v5436_v47 }
 0x610   : > { %v5484_v10 = vadd.f32 %v5483_v9, %v5460_v8 }
 0x611   : > { %v5505_v53 = vpop.f32.mrf.mxu3 }
 0x612   : > { %v5506_v33 = vadd.f32 %v5505_v53, %v5484_v10 }
 0x614   : > { %v5515_v19 = vmul.f32 %v5510_v2, %v5506_v33  ;;  %v5565_v2 = vrot.slane %v5558_v4, 7 }
 0x616   : > { %v5534_v27 = vrot.slane %v5515_v19, 4  ;;  %v5569_v23 = vsel %vm5568_vm3, %v5557_v52, %v5565_v2 }
 0x618   : > { %v5535_v11 = vadd.f32 %v5534_v27, %v5515_v19 }
 0x61a   : > { %v5536_v31 = vrot.slane %v5535_v11, 2 }
 0x61c   : > { %v5537_v61 = vadd.f32 %v5536_v31, %v5535_v11 }
 0x61e   : > { %v5538_v34 = vrot.slane %v5537_v61, 1 }
 0x620   : > { %v5539_v39 = vadd.f32 %v5538_v34, %v5537_v61 }
 0x622   : > { %v5544_v59 = vadd.f32 %v5540_v17, %v5539_v39 }
 0x624   : > { %v5548_v18 = vmul.f32 0.5, %v5544_v59 }
 0x626   : > { %5859 = vtanh.f32 %v5548_v18 }
 0x62c   : > { %v5860_v6 = vpop.eup %5859 }
 0x62d   : > { %v5556_v46 = vadd.f32 1.0, %v5860_v6 }
 0x62f   : > { %v5560_v7 = vmul.f32 0.5, %v5556_v46 }
 0x631   : > { %v5567_v21 = vrot.slane %v5560_v7, 5 }
 0x633   : > { %v5571_v30 = vsel %vm5570_vm4, %v5566_v5, %v5567_v21 }
 0x634   : > { %v5572_v22 = vsel %vm669_vm0, %v5569_v23, %v5571_v30 }
 0x635   : > { %5578 = vst.msk [vmem:[%s443_s11] sm:$0xf] %vm5576_vm5, %v5572_v22 }
 0x636   : > { %5993 = shalt.err (!%p5990_p12)
}
 0x637   : > { %5744 = dma.vmem_to_hbm [thread:$0]  (%p6173_p3), %s5593_s21, 64, %s5595_s17, %s5580_s16  }
 0x638 PF: > { %s7945_s15 = sld [smem:[#allocation16_spill]] }
 0x639   : > { %s7947_s28 = sld [smem:[#allocation18_spill]] }
 0x63e   : > { %s5606_s29 = sand.u32 1, %s7945_s15  }
 0x63f   : > { %p7948_p13 = scmp.ge.s32.totalorder %s7947_s28, 2  ;;  %s5607_s13 = scalar_lea.sflag [#allocation4], %s5606_s29 }
 0x641   : > { %p5761_p9 = pnand %p7948_p13, %p6142_p6 }
 0x643   : > { %p5762_p0 = pneg %p5761_p9 }
 0x645   : > { %6027 = dma.done.wait (%p5762_p0), %s5607_s13, 64  }
 0x646   : > { %6029 = vsyncadd (%p5762_p0), %s5607_s13, 4294967232  ;;  %s7949_s16 = sld [smem:[#allocation20_spill]]  ;;  %s7952_s13 = smov %s6036_s14 }
 0x647   : > { %s7950_s27 = sld [smem:[#allocation17_spill]] }
 0x648   : > { %s7951_s15 = sld [smem:[#allocation22_spill]] }
 0x64c   : > { %p27_p5 = scmp.ge.s32.totalorder %s7949_s16, 4  }
 0x64d   : > { %s7953_s14 = smov %s7950_s27 }
 0x64e   :  { %29 = sbr.rel (!%p27_p5) target bundleno = 11 (0xb), region = 130 }
 0x653   :  { %5613 = vsyncpa [#allocation3], 1 }
 0x654   :  { %5615 = vsyncpa [#allocation3 + $0x1], 1 }
 0x655   :  { %5616 = vsyncpa [#allocation7], 1 }
 0x656   :  { %5618 = vsyncpa [#allocation7 + $0x1], 1 }
 0x657   :  { %5619 = vsyncpa [#allocation4], 1 }
 0x658   :  { %5621 = vsyncpa [#allocation4 + $0x1], 1 }
 0x659   :  { %5622 = vsyncpa [#allocation5], 1 }
 0x65a   :  { %5624 = vsyncpa [#allocation5 + $0x1], 1 }

</bundles_post_ra>
